<compile_context>
chip_gen: v6e
topology: v6e:2x2x1
jax: 0.10.0
libtpu: 0.0.40
codegen_flags: <defaults>
</compile_context>

<pallas_src>
import functools

import jax
import jax.numpy as jnp
from jax import lax
from jax.experimental import pallas as pl
from jax.experimental.pallas import tpu as pltpu


# ----------------------------- Pallas kernel ---------------------------------
def _fused_concat_conv3x3_bn_kernel(
        x1s_ref, x1t_ref, x1b_ref,     # branch 1: strip / top halo row / bottom halo row
        x2s_ref, x2t_ref, x2b_ref,     # branch 2
        x3s_ref, x3t_ref, x3b_ref,     # branch 3
        w_ref, bias_ref, o_ref, xp_ref):
    # x*s_ref:  (1, TH, W, Ci)     bf16  row strip of one branch (NHWC)
    # x*t_ref:  (1, 1,  W, Ci)     bf16  row above the strip (clamped at the top edge)
    # x*b_ref:  (1, 1,  W, Ci)     bf16  row below the strip (clamped at the bottom edge)
    # w_ref:    (Cout, 9*Ctot)     bf16  BN-scale-folded weights, columns ordered (kh, kw, ci)
    # bias_ref: (Cout, 1)          f32   folded BatchNorm (eval) bias
    # o_ref:    (1, Cout, TH*W)          channel-major output strip (lane-dense stores)
    # xp_ref:   (TH+2, W+2, Ctot)  bf16  VMEM scratch: zero-padded, channel-concatenated strip
    TH = x1s_ref.shape[1]
    W = x1s_ref.shape[2]
    Ctot = xp_ref.shape[-1]

    r = pl.program_id(1)
    is_first = r == 0
    is_last = r == pl.num_programs(1) - 1

    # Zero only the width-halo columns (covers the corners).  Top/bottom halo rows are written
    # below (real data or zeros), so every cell of xp_ref is rewritten every grid step -- no
    # stale VMEM even with per-core private scratch under "parallel" semantics.
    zcol = jnp.zeros((TH + 2, 1, Ctot), xp_ref.dtype)
    xp_ref[:, 0:1, :] = zcol
    xp_ref[:, W + 1:W + 2, :] = zcol

    # Fused channel concat: place each branch at its channel offset in the padded strip.
    c0 = 0
    for s_ref, t_ref, b_ref in ((x1s_ref, x1t_ref, x1b_ref),
                                (x2s_ref, x2t_ref, x2b_ref),
                                (x3s_ref, x3t_ref, x3b_ref)):
        Ci = s_ref.shape[-1]
        top = jnp.where(is_first, jnp.zeros_like(t_ref[0, 0]), t_ref[0, 0])   # (W, Ci)
        bot = jnp.where(is_last, jnp.zeros_like(b_ref[0, 0]), b_ref[0, 0])    # (W, Ci)
        xp_ref[0:1, 1:W + 1, c0:c0 + Ci] = top[None]
        xp_ref[1:TH + 1, 1:W + 1, c0:c0 + Ci] = s_ref[0]
        xp_ref[TH + 1:TH + 2, 1:W + 1, c0:c0 + Ci] = bot[None]
        c0 += Ci

    # 3x3 conv as 9 accumulating MXU matmuls on shifted views of the padded strip
    # (no im2col scratch).  bf16 operands, f32 accumulation; result is channel-major.
    acc = None
    for t in range(9):
        dy, dx = divmod(t, 3)
        win = xp_ref[dy:dy + TH, dx:dx + W, :].reshape(TH * W, Ctot)          # (TH*W, Ctot)
        w_t = w_ref[:, t * Ctot:(t + 1) * Ctot]                               # (Cout, Ctot)
        part = lax.dot_general(w_t, win, (((1,), (1,)), ((), ())),
                               preferred_element_type=jnp.float32)            # (Cout, TH*W)
        acc = part if acc is None else acc + part

    # BN scale already folded into the weights; only the bias add remains.
    o_ref[0] = (acc + bias_ref[...]).astype(o_ref.dtype)


def _pick_row_tile(H, W):
    # Production default: largest TH dividing H with TH*W a multiple of 128 (lane-dense
    # output blocks).  e.g. H = W = 352 -> TH = 32.
    for th in (64, 32, 16, 8):
        if H % th == 0 and (th * W) % 128 == 0:
            return th
    return H


def fused_concat_conv3x3_bn_pallas(x1u, x2u, x3u, w_hwio, scale, bias, *,
                                   row_tile=None, out_dtype=jnp.bfloat16):
    # x*u: (B, H, W, Ci) bf16 NHWC branches; w_hwio: (3, 3, Ctot, Cout) f32;
    # scale/bias: (Cout,) f32 folded BatchNorm (eval) parameters.
    B, H, W, C1 = x1u.shape
    C2 = x2u.shape[-1]
    C3 = x3u.shape[-1]
    Ctot = C1 + C2 + C3
    Cout = w_hwio.shape[-1]
    assert w_hwio.shape[:3] == (3, 3, Ctot)

    TH = row_tile if row_tile is not None else _pick_row_tile(H, W)
    assert H % TH == 0 and (TH * W) % 128 == 0, (H, W, TH)
    n_rt = H // TH

    # Fold BN scale into the weights in f32, then cast matmul operands to bf16.
    w_cm = (w_hwio.reshape(9 * Ctot, Cout) * scale[None, :]).T.astype(jnp.bfloat16)  # (Cout, 9*Ctot)
    bias2 = bias.reshape(Cout, 1).astype(jnp.float32)

    def strip_spec(Ci):
        return pl.BlockSpec((1, TH, W, Ci), lambda b, r: (b, r, 0, 0))

    def top_spec(Ci):
        # block size 1 along H -> the block index *is* the row index; clamp at the top edge
        # (row 0 is fetched but replaced by zeros in-kernel when r == 0).
        return pl.BlockSpec((1, 1, W, Ci),
                            lambda b, r: (b, jnp.maximum(r * TH - 1, 0), 0, 0))

    def bot_spec(Ci):
        return pl.BlockSpec((1, 1, W, Ci),
                            lambda b, r: (b, jnp.minimum(r * TH + TH, H - 1), 0, 0))

    in_specs = []
    for Ci in (C1, C2, C3):
        in_specs += [strip_spec(Ci), top_spec(Ci), bot_spec(Ci)]
    in_specs += [pl.BlockSpec((Cout, 9 * Ctot), lambda b, r: (0, 0)),
                 pl.BlockSpec((Cout, 1), lambda b, r: (0, 0))]

    out_flat = pl.pallas_call(
        _fused_concat_conv3x3_bn_kernel,
        out_shape=jax.ShapeDtypeStruct((B, Cout, H * W), out_dtype),
        grid_spec=pltpu.PrefetchScalarGridSpec(
            num_scalar_prefetch=0,
            grid=(B, n_rt),
            in_specs=in_specs,
            out_specs=pl.BlockSpec((1, Cout, TH * W), lambda b, r: (b, 0, r)),
            scratch_shapes=[pltpu.VMEM((TH + 2, W + 2, Ctot), jnp.bfloat16)],
        ),
        compiler_params=pltpu.CompilerParams(
            dimension_semantics=("parallel", "parallel"),
            # Conservative everywhere (<= v7x's 64 MiB physical VMEM).  At production sizes
            # (TH=32, W=352, 3C=96) per-step usage is ~12 MB incl. double buffering; tune to
            # ~48-56 MiB on v7x and ~96 MiB on v5e/v6e if deeper buffering is added.
            vmem_limit_bytes=48 * 1024 * 1024),
    )(x1u, x1u, x1u, x2u, x2u, x2u, x3u, x3u, x3u, w_cm, bias2)
    return out_flat                                          # (B, Cout, H*W), channel-major


# ------------------------- JAX glue (bilinear upsample) -----------------------
def _interp_matrix(n_in, n_out):
    # Bilinear interpolation matrix, PyTorch align_corners=True: src = dst*(n_in-1)/(n_out-1)
    if n_in == 1:
        return jnp.ones((n_out, 1), jnp.float32)
    src = jnp.arange(n_out, dtype=jnp.float32) * (n_in - 1) / (n_out - 1)
    lo = jnp.clip(jnp.floor(src).astype(jnp.int32), 0, n_in - 2)
    frac = src - lo.astype(jnp.float32)
    rows = jnp.arange(n_out)
    M = jnp.zeros((n_out, n_in), jnp.float32)
    M = M.at[rows, lo].add(1.0 - frac)
    M = M.at[rows, lo + 1].add(frac)
    return M


def upsample2x_nchw(x_nchw):
    _, _, H, W = x_nchw.shape
    Mh = _interp_matrix(H, 2 * H)
    Mw = _interp_matrix(W, 2 * W)
    return jnp.einsum('ih,bchw,jw->bcij', Mh, x_nchw, Mw)


def upsample2x_nchw_to_nhwc(x_nchw):
    # Layout change folded into the einsum output indexing (no separate transpose pass).
    _, _, H, W = x_nchw.shape
    Mh = _interp_matrix(H, 2 * H)
    Mw = _interp_matrix(W, 2 * W)
    return jnp.einsum('ih,bchw,jw->bijc', Mh, x_nchw, Mw)


def replace_aggregation_final_forward(x1, x2, x3, params, *,
                                      row_tile=None, out_dtype=jnp.bfloat16):
    # x1: (B, C, H/4, W/4), x2: (B, C, H/2, W/2), x3: (B, C, H, W)  -- NCHW (PyTorch layout)
    B, C, H, W = x3.shape
    x1u = upsample2x_nchw_to_nhwc(upsample2x_nchw(x1)).astype(jnp.bfloat16)   # (B, H, W, C)
    x2u = upsample2x_nchw_to_nhwc(x2).astype(jnp.bfloat16)                    # (B, H, W, C)
    x3u = jnp.transpose(x3, (0, 2, 3, 1)).astype(jnp.bfloat16)                # (B, H, W, C)

    eps = 1e-5
    scale = params["bn_gamma"] / jnp.sqrt(params["bn_var"] + eps)
    bias = params["bn_beta"] - params["bn_mean"] * scale

    y_flat = fused_concat_conv3x3_bn_pallas(
        x1u, x2u, x3u, params["conv_w"], scale, bias,
        row_tile=row_tile, out_dtype=out_dtype)              # (B, 3C, H*W), channel-major
    return y_flat.reshape(B, y_flat.shape[1], H, W)          # free reshape; already NCHW


# ------------------------------------ main ------------------------------------
if __name__ == "__main__":
    channel = 4
    C3 = 3 * channel
    B, H, W = 2, 16, 16

    key = jax.random.PRNGKey(0)
    k1, k2, k3, kw = jax.random.split(key, 4)
    x1 = jax.random.normal(k1, (B, channel, H // 4, W // 4), jnp.float32)
    x2 = jax.random.normal(k2, (B, channel, H // 2, W // 2), jnp.float32)
    x3 = jax.random.normal(k3, (B, channel, H, W), jnp.float32)

    params = {
        "conv_w": 0.1 * jax.random.normal(kw, (3, 3, C3, C3), jnp.float32),   # (kh,kw,Cin,Cout)
        "bn_gamma": jnp.ones((C3,), jnp.float32),
        "bn_beta": jnp.zeros((C3,), jnp.float32),
        "bn_mean": jnp.zeros((C3,), jnp.float32),
        "bn_var": jnp.ones((C3,), jnp.float32),
    }

    # row_tile=8 -> 2 row tiles per image, exercising the 2-row halo / clamped index maps.
    fwd = jax.jit(functools.partial(replace_aggregation_final_forward, row_tile=8))
    out = jax.block_until_ready(fwd(x1, x2, x3, params))
    assert out.shape == (B, C3, H, W), out.shape

    # Pure-JAX reference with the same bf16 operand quantization / BN-scale folding as the
    # kernel (f32 accumulation), to validate the fused concat + halo + conv + bias path.
    x1u = upsample2x_nchw_to_nhwc(upsample2x_nchw(x1))
    x2u = upsample2x_nchw_to_nhwc(x2)
    x3u = jnp.transpose(x3, (0, 2, 3, 1))
    xcat = jnp.concatenate([x1u, x2u, x3u], axis=-1).astype(jnp.bfloat16)
    eps = 1e-5
    scale = params["bn_gamma"] / jnp.sqrt(params["bn_var"] + eps)
    bias = params["bn_beta"] - params["bn_mean"] * scale
    w_folded = (params["conv_w"] * scale).astype(jnp.bfloat16)
    ref = lax.conv_general_dilated(
        xcat, w_folded, (1, 1), "SAME",
        dimension_numbers=("NHWC", "HWIO", "NHWC"),
        preferred_element_type=jnp.float32)
    ref = jnp.transpose(ref + bias, (0, 3, 1, 2))            # NCHW, f32

    err = float(jnp.max(jnp.abs(out.astype(jnp.float32) - ref)))
    assert jnp.allclose(out.astype(jnp.float32), ref, atol=3e-2, rtol=3e-2), err

    print("KERNEL_OK")
</pallas_src>

<mosaic_0001>
module attributes {stable_mosaic.version = 11 : i64} {
  func.func private @main(%arg0: i32) attributes {dimension_semantics = [#tpu.dimension_semantics<core_parallel>], iteration_bounds = array<i64: 2>, tpu.core_type = #tpu.core_type<sc_scalar_subcore>, window_params = []} {
    return
  }
}

module attributes {stable_mosaic.version = 11 : i64} {
  func.func private @main(%arg0: i32) attributes {dimension_semantics = [#tpu.dimension_semantics<core_parallel>], iteration_bounds = array<i64: 2>, tpu.core_type = #tpu.core_type<sc_scalar_subcore>, window_params = []} {
    return
  }
}

module attributes {stable_mosaic.version = 11 : i64} {
  func.func @_fused_concat_conv3x3_bn_kernel(%arg0: i32, %arg1: i32, %arg2: memref<1x8x16x4xbf16, #tpu.memory_space<vmem>>, %arg3: memref<1x1x16x4xbf16, #tpu.memory_space<vmem>>, %arg4: memref<1x1x16x4xbf16, #tpu.memory_space<vmem>>, %arg5: memref<1x8x16x4xbf16, #tpu.memory_space<vmem>>, %arg6: memref<1x1x16x4xbf16, #tpu.memory_space<vmem>>, %arg7: memref<1x1x16x4xbf16, #tpu.memory_space<vmem>>, %arg8: memref<1x8x16x4xbf16, #tpu.memory_space<vmem>>, %arg9: memref<1x1x16x4xbf16, #tpu.memory_space<vmem>>, %arg10: memref<1x1x16x4xbf16, #tpu.memory_space<vmem>>, %arg11: memref<12x108xbf16, #tpu.memory_space<vmem>>, %arg12: memref<12x1xf32, #tpu.memory_space<vmem>>, %arg13: memref<1x12x128xbf16, #tpu.memory_space<vmem>>, %arg14: memref<10x18x12xbf16, #tpu.memory_space<vmem>>) attributes {dimension_semantics = [#tpu.dimension_semantics<parallel>, #tpu.dimension_semantics<parallel>], iteration_bounds = array<i64: 2, 2>, scalar_prefetch = 0 : i64, scratch_operands = 1 : i64, tpu.core_type = #tpu.core_type<tc>, window_params = [{transform_indices = @transform_0, window_bounds = array<i64: 1, 8, 16, 4>}, {transform_indices = @transform_1, window_bounds = array<i64: 1, 1, 16, 4>}, {transform_indices = @transform_2, window_bounds = array<i64: 1, 1, 16, 4>}, {transform_indices = @transform_3, window_bounds = array<i64: 1, 8, 16, 4>}, {transform_indices = @transform_4, window_bounds = array<i64: 1, 1, 16, 4>}, {transform_indices = @transform_5, window_bounds = array<i64: 1, 1, 16, 4>}, {transform_indices = @transform_6, window_bounds = array<i64: 1, 8, 16, 4>}, {transform_indices = @transform_7, window_bounds = array<i64: 1, 1, 16, 4>}, {transform_indices = @transform_8, window_bounds = array<i64: 1, 1, 16, 4>}, {pipeline_mode = #tpu.pipeline_mode<synchronous>, transform_indices = @transform_9, window_bounds = array<i64: 12, 108>}, {pipeline_mode = #tpu.pipeline_mode<synchronous>, transform_indices = @transform_10, window_bounds = array<i64: 12, 1>}, {transform_indices = @transform_11, window_bounds = array<i64: 1, 12, 128>}]} {
    %c0_i32 = arith.constant 0 : i32
    %0 = arith.cmpi eq, %arg1, %c0_i32 : i32
    %c1_i32 = arith.constant 1 : i32
    %1 = arith.cmpi eq, %arg1, %c1_i32 : i32
    %cst = arith.constant 0.000000e+00 : bf16
    %2 = vector.broadcast %cst : bf16 to vector<10x1x12xbf16>
    %c0 = arith.constant 0 : index
    %c0_0 = arith.constant 0 : index
    %c0_1 = arith.constant 0 : index
    %3 = vector.load %arg14[%c0, %c0_0, %c0_1] : memref<10x18x12xbf16, #tpu.memory_space<vmem>>, vector<10x1x12xbf16>
    tpu.vector_store %arg14[%c0, %c0_0, %c0_1], %2 {strides = array<i32>} : memref<10x18x12xbf16, #tpu.memory_space<vmem>>, vector<10x1x12xbf16>,
    %c0_2 = arith.constant 0 : index
    %c17 = arith.constant 17 : index
    %c0_3 = arith.constant 0 : index
    %4 = vector.load %arg14[%c0_2, %c17, %c0_3] : memref<10x18x12xbf16, #tpu.memory_space<vmem>>, vector<10x1x12xbf16>
    tpu.vector_store %arg14[%c0_2, %c17, %c0_3], %2 {strides = array<i32>} : memref<10x18x12xbf16, #tpu.memory_space<vmem>>, vector<10x1x12xbf16>,
    %cst_4 = arith.constant 0.000000e+00 : bf16
    %5 = vector.broadcast %cst_4 : bf16 to vector<16x4xbf16>
    %c0_5 = arith.constant 0 : index
    %c0_6 = arith.constant 0 : index
    %c0_7 = arith.constant 0 : index
    %c0_8 = arith.constant 0 : index
    %6 = vector.load %arg3[%c0_5, %c0_6, %c0_7, %c0_8] : memref<1x1x16x4xbf16, #tpu.memory_space<vmem>>, vector<1x1x16x4xbf16>
    %7 = vector.shape_cast %6 : vector<1x1x16x4xbf16> to vector<16x4xbf16>
    %8 = arith.select %0, %5, %7 : vector<16x4xbf16>
    %cst_9 = arith.constant 0.000000e+00 : bf16
    %9 = vector.broadcast %cst_9 : bf16 to vector<16x4xbf16>
    %c0_10 = arith.constant 0 : index
    %c0_11 = arith.constant 0 : index
    %c0_12 = arith.constant 0 : index
    %c0_13 = arith.constant 0 : index
    %10 = vector.load %arg4[%c0_10, %c0_11, %c0_12, %c0_13] : memref<1x1x16x4xbf16, #tpu.memory_space<vmem>>, vector<1x1x16x4xbf16>
    %11 = vector.shape_cast %10 : vector<1x1x16x4xbf16> to vector<16x4xbf16>
    %12 = arith.select %1, %9, %11 : vector<16x4xbf16>
    %13 = vector.shape_cast %8 : vector<16x4xbf16> to vector<1x16x4xbf16>
    %c0_14 = arith.constant 0 : index
    %c1 = arith.constant 1 : index
    %c0_15 = arith.constant 0 : index
    %14 = vector.load %arg14[%c0_14, %c1, %c0_15] : memref<10x18x12xbf16, #tpu.memory_space<vmem>>, vector<1x16x4xbf16>
    tpu.vector_store %arg14[%c0_14, %c1, %c0_15], %13 {strides = array<i32>} : memref<10x18x12xbf16, #tpu.memory_space<vmem>>, vector<1x16x4xbf16>,
    %c0_16 = arith.constant 0 : index
    %c0_17 = arith.constant 0 : index
    %c0_18 = arith.constant 0 : index
    %c0_19 = arith.constant 0 : index
    %15 = vector.load %arg2[%c0_16, %c0_17, %c0_18, %c0_19] : memref<1x8x16x4xbf16, #tpu.memory_space<vmem>>, vector<1x8x16x4xbf16>
    %16 = vector.shape_cast %15 : vector<1x8x16x4xbf16> to vector<8x16x4xbf16>
    %c1_20 = arith.constant 1 : index
    %c1_21 = arith.constant 1 : index
    %c0_22 = arith.constant 0 : index
    %17 = vector.load %arg14[%c1_20, %c1_21, %c0_22] : memref<10x18x12xbf16, #tpu.memory_space<vmem>>, vector<8x16x4xbf16>
    tpu.vector_store %arg14[%c1_20, %c1_21, %c0_22], %16 {strides = array<i32>} : memref<10x18x12xbf16, #tpu.memory_space<vmem>>, vector<8x16x4xbf16>,
    %18 = vector.shape_cast %12 : vector<16x4xbf16> to vector<1x16x4xbf16>
    %c9 = arith.constant 9 : index
    %c1_23 = arith.constant 1 : index
    %c0_24 = arith.constant 0 : index
    %19 = vector.load %arg14[%c9, %c1_23, %c0_24] : memref<10x18x12xbf16, #tpu.memory_space<vmem>>, vector<1x16x4xbf16>
    tpu.vector_store %arg14[%c9, %c1_23, %c0_24], %18 {strides = array<i32>} : memref<10x18x12xbf16, #tpu.memory_space<vmem>>, vector<1x16x4xbf16>,
    %cst_25 = arith.constant 0.000000e+00 : bf16
    %20 = vector.broadcast %cst_25 : bf16 to vector<16x4xbf16>
    %c0_26 = arith.constant 0 : index
    %c0_27 = arith.constant 0 : index
    %c0_28 = arith.constant 0 : index
    %c0_29 = arith.constant 0 : index
    %21 = vector.load %arg6[%c0_26, %c0_27, %c0_28, %c0_29] : memref<1x1x16x4xbf16, #tpu.memory_space<vmem>>, vector<1x1x16x4xbf16>
    %22 = vector.shape_cast %21 : vector<1x1x16x4xbf16> to vector<16x4xbf16>
    %23 = arith.select %0, %20, %22 : vector<16x4xbf16>
    %cst_30 = arith.constant 0.000000e+00 : bf16
    %24 = vector.broadcast %cst_30 : bf16 to vector<16x4xbf16>
    %c0_31 = arith.constant 0 : index
    %c0_32 = arith.constant 0 : index
    %c0_33 = arith.constant 0 : index
    %c0_34 = arith.constant 0 : index
    %25 = vector.load %arg7[%c0_31, %c0_32, %c0_33, %c0_34] : memref<1x1x16x4xbf16, #tpu.memory_space<vmem>>, vector<1x1x16x4xbf16>
    %26 = vector.shape_cast %25 : vector<1x1x16x4xbf16> to vector<16x4xbf16>
    %27 = arith.select %1, %24, %26 : vector<16x4xbf16>
    %28 = vector.shape_cast %23 : vector<16x4xbf16> to vector<1x16x4xbf16>
    %c0_35 = arith.constant 0 : index
    %c1_36 = arith.constant 1 : index
    %c4 = arith.constant 4 : index
    %29 = vector.load %arg14[%c0_35, %c1_36, %c4] : memref<10x18x12xbf16, #tpu.memory_space<vmem>>, vector<1x16x4xbf16>
    tpu.vector_store %arg14[%c0_35, %c1_36, %c4], %28 {strides = array<i32>} : memref<10x18x12xbf16, #tpu.memory_space<vmem>>, vector<1x16x4xbf16>,
    %c0_37 = arith.constant 0 : index
    %c0_38 = arith.constant 0 : index
    %c0_39 = arith.constant 0 : index
    %c0_40 = arith.constant 0 : index
    %30 = vector.load %arg5[%c0_37, %c0_38, %c0_39, %c0_40] : memref<1x8x16x4xbf16, #tpu.memory_space<vmem>>, vector<1x8x16x4xbf16>
    %31 = vector.shape_cast %30 : vector<1x8x16x4xbf16> to vector<8x16x4xbf16>
    %c1_41 = arith.constant 1 : index
    %c1_42 = arith.constant 1 : index
    %c4_43 = arith.constant 4 : index
    %32 = vector.load %arg14[%c1_41, %c1_42, %c4_43] : memref<10x18x12xbf16, #tpu.memory_space<vmem>>, vector<8x16x4xbf16>
    tpu.vector_store %arg14[%c1_41, %c1_42, %c4_43], %31 {strides = array<i32>} : memref<10x18x12xbf16, #tpu.memory_space<vmem>>, vector<8x16x4xbf16>,
    %33 = vector.shape_cast %27 : vector<16x4xbf16> to vector<1x16x4xbf16>
    %c9_44 = arith.constant 9 : index
    %c1_45 = arith.constant 1 : index
    %c4_46 = arith.constant 4 : index
    %34 = vector.load %arg14[%c9_44, %c1_45, %c4_46] : memref<10x18x12xbf16, #tpu.memory_space<vmem>>, vector<1x16x4xbf16>
    tpu.vector_store %arg14[%c9_44, %c1_45, %c4_46], %33 {strides = array<i32>} : memref<10x18x12xbf16, #tpu.memory_space<vmem>>, vector<1x16x4xbf16>,
    %cst_47 = arith.constant 0.000000e+00 : bf16
    %35 = vector.broadcast %cst_47 : bf16 to vector<16x4xbf16>
    %c0_48 = arith.constant 0 : index
    %c0_49 = arith.constant 0 : index
    %c0_50 = arith.constant 0 : index
    %c0_51 = arith.constant 0 : index
    %36 = vector.load %arg9[%c0_48, %c0_49, %c0_50, %c0_51] : memref<1x1x16x4xbf16, #tpu.memory_space<vmem>>, vector<1x1x16x4xbf16>
    %37 = vector.shape_cast %36 : vector<1x1x16x4xbf16> to vector<16x4xbf16>
    %38 = arith.select %0, %35, %37 : vector<16x4xbf16>
    %cst_52 = arith.constant 0.000000e+00 : bf16
    %39 = vector.broadcast %cst_52 : bf16 to vector<16x4xbf16>
    %c0_53 = arith.constant 0 : index
    %c0_54 = arith.constant 0 : index
    %c0_55 = arith.constant 0 : index
    %c0_56 = arith.constant 0 : index
    %40 = vector.load %arg10[%c0_53, %c0_54, %c0_55, %c0_56] : memref<1x1x16x4xbf16, #tpu.memory_space<vmem>>, vector<1x1x16x4xbf16>
    %41 = vector.shape_cast %40 : vector<1x1x16x4xbf16> to vector<16x4xbf16>
    %42 = arith.select %1, %39, %41 : vector<16x4xbf16>
    %43 = vector.shape_cast %38 : vector<16x4xbf16> to vector<1x16x4xbf16>
    %c0_57 = arith.constant 0 : index
    %c1_58 = arith.constant 1 : index
    %c8 = arith.constant 8 : index
    %44 = vector.load %arg14[%c0_57, %c1_58, %c8] : memref<10x18x12xbf16, #tpu.memory_space<vmem>>, vector<1x16x4xbf16>
    tpu.vector_store %arg14[%c0_57, %c1_58, %c8], %43 {strides = array<i32>} : memref<10x18x12xbf16, #tpu.memory_space<vmem>>, vector<1x16x4xbf16>,
    %c0_59 = arith.constant 0 : index
    %c0_60 = arith.constant 0 : index
    %c0_61 = arith.constant 0 : index
    %c0_62 = arith.constant 0 : index
    %45 = vector.load %arg8[%c0_59, %c0_60, %c0_61, %c0_62] : memref<1x8x16x4xbf16, #tpu.memory_space<vmem>>, vector<1x8x16x4xbf16>
    %46 = vector.shape_cast %45 : vector<1x8x16x4xbf16> to vector<8x16x4xbf16>
    %c1_63 = arith.constant 1 : index
    %c1_64 = arith.constant 1 : index
    %c8_65 = arith.constant 8 : index
    %47 = vector.load %arg14[%c1_63, %c1_64, %c8_65] : memref<10x18x12xbf16, #tpu.memory_space<vmem>>, vector<8x16x4xbf16>
    tpu.vector_store %arg14[%c1_63, %c1_64, %c8_65], %46 {strides = array<i32>} : memref<10x18x12xbf16, #tpu.memory_space<vmem>>, vector<8x16x4xbf16>,
    %48 = vector.shape_cast %42 : vector<16x4xbf16> to vector<1x16x4xbf16>
    %c9_66 = arith.constant 9 : index
    %c1_67 = arith.constant 1 : index
    %c8_68 = arith.constant 8 : index
    %49 = vector.load %arg14[%c9_66, %c1_67, %c8_68] : memref<10x18x12xbf16, #tpu.memory_space<vmem>>, vector<1x16x4xbf16>
    tpu.vector_store %arg14[%c9_66, %c1_67, %c8_68], %48 {strides = array<i32>} : memref<10x18x12xbf16, #tpu.memory_space<vmem>>, vector<1x16x4xbf16>,
    %c0_69 = arith.constant 0 : index
    %c0_70 = arith.constant 0 : index
    %c0_71 = arith.constant 0 : index
    %50 = vector.load %arg14[%c0_69, %c0_70, %c0_71] : memref<10x18x12xbf16, #tpu.memory_space<vmem>>, vector<8x16x12xbf16>
    %51 = vector.shape_cast %50 : vector<8x16x12xbf16> to vector<128x12xbf16>
    %c0_72 = arith.constant 0 : index
    %c0_73 = arith.constant 0 : index
    %52 = vector.load %arg11[%c0_72, %c0_73] : memref<12x108xbf16, #tpu.memory_space<vmem>>, vector<12x12xbf16>
    %cst_74 = arith.constant dense<0.000000e+00> : vector<12x128xf32>
    %53 = tpu.matmul %52, %51, %cst_74 {dimension_numbers = #tpu.dot_dimension_numbers<[1], [1], [0], [0], [0, 0, 1, 0], [], []>} : vector<12x12xbf16>, vector<128x12xbf16>, vector<12x128xf32> -> vector<12x128xf32>
    %c0_75 = arith.constant 0 : index
    %c1_76 = arith.constant 1 : index
    %c0_77 = arith.constant 0 : index
    %54 = vector.load %arg14[%c0_75, %c1_76, %c0_77] : memref<10x18x12xbf16, #tpu.memory_space<vmem>>, vector<8x16x12xbf16>
    %55 = vector.shape_cast %54 : vector<8x16x12xbf16> to vector<128x12xbf16>
    %c0_78 = arith.constant 0 : index
    %c12 = arith.constant 12 : index
    %56 = vector.load %arg11[%c0_78, %c12] : memref<12x108xbf16, #tpu.memory_space<vmem>>, vector<12x12xbf16>
    %cst_79 = arith.constant dense<0.000000e+00> : vector<12x128xf32>
    %57 = tpu.matmul %56, %55, %cst_79 {dimension_numbers = #tpu.dot_dimension_numbers<[1], [1], [0], [0], [0, 0, 1, 0], [], []>} : vector<12x12xbf16>, vector<128x12xbf16>, vector<12x128xf32> -> vector<12x128xf32>
    %58 = arith.addf %53, %57 : vector<12x128xf32>
    %c0_80 = arith.constant 0 : index
    %c2 = arith.constant 2 : index
    %c0_81 = arith.constant 0 : index
    %59 = vector.load %arg14[%c0_80, %c2, %c0_81] : memref<10x18x12xbf16, #tpu.memory_space<vmem>>, vector<8x16x12xbf16>
    %60 = vector.shape_cast %59 : vector<8x16x12xbf16> to vector<128x12xbf16>
    %c0_82 = arith.constant 0 : index
    %c24 = arith.constant 24 : index
    %61 = vector.load %arg11[%c0_82, %c24] : memref<12x108xbf16, #tpu.memory_space<vmem>>, vector<12x12xbf16>
    %cst_83 = arith.constant dense<0.000000e+00> : vector<12x128xf32>
    %62 = tpu.matmul %61, %60, %cst_83 {dimension_numbers = #tpu.dot_dimension_numbers<[1], [1], [0], [0], [0, 0, 1, 0], [], []>} : vector<12x12xbf16>, vector<128x12xbf16>, vector<12x128xf32> -> vector<12x128xf32>
    %63 = arith.addf %58, %62 : vector<12x128xf32>
    %c1_84 = arith.constant 1 : index
    %c0_85 = arith.constant 0 : index
    %c0_86 = arith.constant 0 : index
    %64 = vector.load %arg14[%c1_84, %c0_85, %c0_86] : memref<10x18x12xbf16, #tpu.memory_space<vmem>>, vector<8x16x12xbf16>
    %65 = vector.shape_cast %64 : vector<8x16x12xbf16> to vector<128x12xbf16>
    %c0_87 = arith.constant 0 : index
    %c36 = arith.constant 36 : index
    %66 = vector.load %arg11[%c0_87, %c36] : memref<12x108xbf16, #tpu.memory_space<vmem>>, vector<12x12xbf16>
    %cst_88 = arith.constant dense<0.000000e+00> : vector<12x128xf32>
    %67 = tpu.matmul %66, %65, %cst_88 {dimension_numbers = #tpu.dot_dimension_numbers<[1], [1], [0], [0], [0, 0, 1, 0], [], []>} : vector<12x12xbf16>, vector<128x12xbf16>, vector<12x128xf32> -> vector<12x128xf32>
    %68 = arith.addf %63, %67 : vector<12x128xf32>
    %c1_89 = arith.constant 1 : index
    %c1_90 = arith.constant 1 : index
    %c0_91 = arith.constant 0 : index
    %69 = vector.load %arg14[%c1_89, %c1_90, %c0_91] : memref<10x18x12xbf16, #tpu.memory_space<vmem>>, vector<8x16x12xbf16>
    %70 = vector.shape_cast %69 : vector<8x16x12xbf16> to vector<128x12xbf16>
    %c0_92 = arith.constant 0 : index
    %c48 = arith.constant 48 : index
    %71 = vector.load %arg11[%c0_92, %c48] : memref<12x108xbf16, #tpu.memory_space<vmem>>, vector<12x12xbf16>
    %cst_93 = arith.constant dense<0.000000e+00> : vector<12x128xf32>
    %72 = tpu.matmul %71, %70, %cst_93 {dimension_numbers = #tpu.dot_dimension_numbers<[1], [1], [0], [0], [0, 0, 1, 0], [], []>} : vector<12x12xbf16>, vector<128x12xbf16>, vector<12x128xf32> -> vector<12x128xf32>
    %73 = arith.addf %68, %72 : vector<12x128xf32>
    %c1_94 = arith.constant 1 : index
    %c2_95 = arith.constant 2 : index
    %c0_96 = arith.constant 0 : index
    %74 = vector.load %arg14[%c1_94, %c2_95, %c0_96] : memref<10x18x12xbf16, #tpu.memory_space<vmem>>, vector<8x16x12xbf16>
    %75 = vector.shape_cast %74 : vector<8x16x12xbf16> to vector<128x12xbf16>
    %c0_97 = arith.constant 0 : index
    %c60 = arith.constant 60 : index
    %76 = vector.load %arg11[%c0_97, %c60] : memref<12x108xbf16, #tpu.memory_space<vmem>>, vector<12x12xbf16>
    %cst_98 = arith.constant dense<0.000000e+00> : vector<12x128xf32>
    %77 = tpu.matmul %76, %75, %cst_98 {dimension_numbers = #tpu.dot_dimension_numbers<[1], [1], [0], [0], [0, 0, 1, 0], [], []>} : vector<12x12xbf16>, vector<128x12xbf16>, vector<12x128xf32> -> vector<12x128xf32>
    %78 = arith.addf %73, %77 : vector<12x128xf32>
    %c2_99 = arith.constant 2 : index
    %c0_100 = arith.constant 0 : index
    %c0_101 = arith.constant 0 : index
    %79 = vector.load %arg14[%c2_99, %c0_100, %c0_101] : memref<10x18x12xbf16, #tpu.memory_space<vmem>>, vector<8x16x12xbf16>
    %80 = vector.shape_cast %79 : vector<8x16x12xbf16> to vector<128x12xbf16>
    %c0_102 = arith.constant 0 : index
    %c72 = arith.constant 72 : index
    %81 = vector.load %arg11[%c0_102, %c72] : memref<12x108xbf16, #tpu.memory_space<vmem>>, vector<12x12xbf16>
    %cst_103 = arith.constant dense<0.000000e+00> : vector<12x128xf32>
    %82 = tpu.matmul %81, %80, %cst_103 {dimension_numbers = #tpu.dot_dimension_numbers<[1], [1], [0], [0], [0, 0, 1, 0], [], []>} : vector<12x12xbf16>, vector<128x12xbf16>, vector<12x128xf32> -> vector<12x128xf32>
    %83 = arith.addf %78, %82 : vector<12x128xf32>
    %c2_104 = arith.constant 2 : index
    %c1_105 = arith.constant 1 : index
    %c0_106 = arith.constant 0 : index
    %84 = vector.load %arg14[%c2_104, %c1_105, %c0_106] : memref<10x18x12xbf16, #tpu.memory_space<vmem>>, vector<8x16x12xbf16>
    %85 = vector.shape_cast %84 : vector<8x16x12xbf16> to vector<128x12xbf16>
    %c0_107 = arith.constant 0 : index
    %c84 = arith.constant 84 : index
    %86 = vector.load %arg11[%c0_107, %c84] : memref<12x108xbf16, #tpu.memory_space<vmem>>, vector<12x12xbf16>
    %cst_108 = arith.constant dense<0.000000e+00> : vector<12x128xf32>
    %87 = tpu.matmul %86, %85, %cst_108 {dimension_numbers = #tpu.dot_dimension_numbers<[1], [1], [0], [0], [0, 0, 1, 0], [], []>} : vector<12x12xbf16>, vector<128x12xbf16>, vector<12x128xf32> -> vector<12x128xf32>
    %88 = arith.addf %83, %87 : vector<12x128xf32>
    %c2_109 = arith.constant 2 : index
    %c2_110 = arith.constant 2 : index
    %c0_111 = arith.constant 0 : index
    %89 = vector.load %arg14[%c2_109, %c2_110, %c0_111] : memref<10x18x12xbf16, #tpu.memory_space<vmem>>, vector<8x16x12xbf16>
    %90 = vector.shape_cast %89 : vector<8x16x12xbf16> to vector<128x12xbf16>
    %c0_112 = arith.constant 0 : index
    %c96 = arith.constant 96 : index
    %91 = vector.load %arg11[%c0_112, %c96] : memref<12x108xbf16, #tpu.memory_space<vmem>>, vector<12x12xbf16>
    %cst_113 = arith.constant dense<0.000000e+00> : vector<12x128xf32>
    %92 = tpu.matmul %91, %90, %cst_113 {dimension_numbers = #tpu.dot_dimension_numbers<[1], [1], [0], [0], [0, 0, 1, 0], [], []>} : vector<12x12xbf16>, vector<128x12xbf16>, vector<12x128xf32> -> vector<12x128xf32>
    %93 = arith.addf %88, %92 : vector<12x128xf32>
    %c0_114 = arith.constant 0 : index
    %c0_115 = arith.constant 0 : index
    %94 = vector.load %arg12[%c0_114, %c0_115] : memref<12x1xf32, #tpu.memory_space<vmem>>, vector<12x1xf32>
    %95 = vector.broadcast %94 : vector<12x1xf32> to vector<12x128xf32>
    %96 = arith.addf %93, %95 : vector<12x128xf32>
    %97 = arith.truncf %96 : vector<12x128xf32> to vector<12x128xbf16>
    %c0_116 = arith.constant 0 : index
    %c0_117 = arith.constant 0 : index
    %c0_118 = arith.constant 0 : index
    %98 = vector.load %arg13[%c0_116, %c0_117, %c0_118] : memref<1x12x128xbf16, #tpu.memory_space<vmem>>, vector<1x12x128xbf16>
    %99 = vector.shape_cast %98 : vector<1x12x128xbf16> to vector<12x128xbf16>
    %100 = vector.shape_cast %97 : vector<12x128xbf16> to vector<1x12x128xbf16>
    tpu.vector_store %arg13[%c0_116, %c0_117, %c0_118], %100 {strides = array<i32>} : memref<1x12x128xbf16, #tpu.memory_space<vmem>>, vector<1x12x128xbf16>,
    return
  }
  func.func @transform_0(%arg0: i32, %arg1: i32) -> (i32, i32, i32, i32) {
    %c0_i32 = arith.constant 0 : i32
    %c0_i32_0 = arith.constant 0 : i32
    %c0_i32_1 = arith.constant 0 : i32
    return %arg0, %arg1, %c0_i32, %c0_i32_0 : i32, i32, i32, i32
  }
  func.func @transform_1(%arg0: i32, %arg1: i32) -> (i32, i32, i32, i32) {
    %c8_i32 = arith.constant 8 : i32
    %0 = arith.muli %arg1, %c8_i32 : i32
    %c1_i32 = arith.constant 1 : i32
    %1 = arith.subi %0, %c1_i32 : i32
    %c0_i32 = arith.constant 0 : i32
    %2 = arith.maxsi %1, %c0_i32 : i32
    %c0_i32_0 = arith.constant 0 : i32
    %c0_i32_1 = arith.constant 0 : i32
    %c0_i32_2 = arith.constant 0 : i32
    return %arg0, %2, %c0_i32_0, %c0_i32_1 : i32, i32, i32, i32
  }
  func.func @transform_2(%arg0: i32, %arg1: i32) -> (i32, i32, i32, i32) {
    %c8_i32 = arith.constant 8 : i32
    %0 = arith.muli %arg1, %c8_i32 : i32
    %c8_i32_0 = arith.constant 8 : i32
    %1 = arith.addi %0, %c8_i32_0 : i32
    %c15_i32 = arith.constant 15 : i32
    %2 = arith.minsi %1, %c15_i32 : i32
    %c0_i32 = arith.constant 0 : i32
    %c0_i32_1 = arith.constant 0 : i32
    %c0_i32_2 = arith.constant 0 : i32
    return %arg0, %2, %c0_i32, %c0_i32_1 : i32, i32, i32, i32
  }
  func.func @transform_3(%arg0: i32, %arg1: i32) -> (i32, i32, i32, i32) {
    %c0_i32 = arith.constant 0 : i32
    %c0_i32_0 = arith.constant 0 : i32
    %c0_i32_1 = arith.constant 0 : i32
    return %arg0, %arg1, %c0_i32, %c0_i32_0 : i32, i32, i32, i32
  }
  func.func @transform_4(%arg0: i32, %arg1: i32) -> (i32, i32, i32, i32) {
    %c8_i32 = arith.constant 8 : i32
    %0 = arith.muli %arg1, %c8_i32 : i32
    %c1_i32 = arith.constant 1 : i32
    %1 = arith.subi %0, %c1_i32 : i32
    %c0_i32 = arith.constant 0 : i32
    %2 = arith.maxsi %1, %c0_i32 : i32
    %c0_i32_0 = arith.constant 0 : i32
    %c0_i32_1 = arith.constant 0 : i32
    %c0_i32_2 = arith.constant 0 : i32
    return %arg0, %2, %c0_i32_0, %c0_i32_1 : i32, i32, i32, i32
  }
  func.func @transform_5(%arg0: i32, %arg1: i32) -> (i32, i32, i32, i32) {
    %c8_i32 = arith.constant 8 : i32
    %0 = arith.muli %arg1, %c8_i32 : i32
    %c8_i32_0 = arith.constant 8 : i32
    %1 = arith.addi %0, %c8_i32_0 : i32
    %c15_i32 = arith.constant 15 : i32
    %2 = arith.minsi %1, %c15_i32 : i32
    %c0_i32 = arith.constant 0 : i32
    %c0_i32_1 = arith.constant 0 : i32
    %c0_i32_2 = arith.constant 0 : i32
    return %arg0, %2, %c0_i32, %c0_i32_1 : i32, i32, i32, i32
  }
  func.func @transform_6(%arg0: i32, %arg1: i32) -> (i32, i32, i32, i32) {
    %c0_i32 = arith.constant 0 : i32
    %c0_i32_0 = arith.constant 0 : i32
    %c0_i32_1 = arith.constant 0 : i32
    return %arg0, %arg1, %c0_i32, %c0_i32_0 : i32, i32, i32, i32
  }
  func.func @transform_7(%arg0: i32, %arg1: i32) -> (i32, i32, i32, i32) {
    %c8_i32 = arith.constant 8 : i32
    %0 = arith.muli %arg1, %c8_i32 : i32
    %c1_i32 = arith.constant 1 : i32
    %1 = arith.subi %0, %c1_i32 : i32
    %c0_i32 = arith.constant 0 : i32
    %2 = arith.maxsi %1, %c0_i32 : i32
    %c0_i32_0 = arith.constant 0 : i32
    %c0_i32_1 = arith.constant 0 : i32
    %c0_i32_2 = arith.constant 0 : i32
    return %arg0, %2, %c0_i32_0, %c0_i32_1 : i32, i32, i32, i32
  }
  func.func @transform_8(%arg0: i32, %arg1: i32) -> (i32, i32, i32, i32) {
    %c8_i32 = arith.constant 8 : i32
    %0 = arith.muli %arg1, %c8_i32 : i32
    %c8_i32_0 = arith.constant 8 : i32
    %1 = arith.addi %0, %c8_i32_0 : i32
    %c15_i32 = arith.constant 15 : i32
    %2 = arith.minsi %1, %c15_i32 : i32
    %c0_i32 = arith.constant 0 : i32
    %c0_i32_1 = arith.constant 0 : i32
    %c0_i32_2 = arith.constant 0 : i32
    return %arg0, %2, %c0_i32, %c0_i32_1 : i32, i32, i32, i32
  }
  func.func @transform_9(%arg0: i32, %arg1: i32) -> (i32, i32) {
    %c0_i32 = arith.constant 0 : i32
    %c0_i32_0 = arith.constant 0 : i32
    %c0_i32_1 = arith.constant 0 : i32
    return %c0_i32, %c0_i32_0 : i32, i32
  }
  func.func @transform_10(%arg0: i32, %arg1: i32) -> (i32, i32) {
    %c0_i32 = arith.constant 0 : i32
    %c0_i32_0 = arith.constant 0 : i32
    %c0_i32_1 = arith.constant 0 : i32
    return %c0_i32, %c0_i32_0 : i32, i32
  }
  func.func @transform_11(%arg0: i32, %arg1: i32) -> (i32, i32, i32) {
    %c0_i32 = arith.constant 0 : i32
    %c0_i32_0 = arith.constant 0 : i32
    return %arg0, %c0_i32, %arg1 : i32, i32, i32
  }
}

</mosaic_0001>

<bundles_post_ra>
// kernel: replace_aggregation_final_forward.1
= control target key start
LH: loop header
LB: loop body
LE: loop exit
PB: predicated region body
PF: predicated region fallthrough
CT: control target
= control target key end

     0   :  { %s6420_s0 = inlined_call_operand.vmem [shape: bf16[2,16,16,4], index: 0, kind: input, shape index: {}, may-alias: {0,1,2}]   ;;  %s6421_s1 = inlined_call_operand.vmem [shape: bf16[2,16,16,4], index: 1, kind: input, shape index: {}, may-alias: {0,1,2}]   ;;  %s6422_s2 = inlined_call_operand.vmem [shape: bf16[2,16,16,4], index: 2, kind: input, shape index: {}, may-alias: {0,1,2}]   ;;  %s6423_s3 = inlined_call_operand.vmem [shape: bf16[2,16,16,4], index: 3, kind: input, shape index: {}, may-alias: {3,4,5}]   ;;  %s6424_s4 = inlined_call_operand.vmem [shape: bf16[2,16,16,4], index: 4, kind: input, shape index: {}, may-alias: {3,4,5}]   ;;  %s6425_s5 = inlined_call_operand.vmem [shape: bf16[2,16,16,4], index: 5, kind: input, shape index: {}, may-alias: {3,4,5}]   ;;  %s6426_s6 = inlined_call_operand.vmem [shape: bf16[2,16,16,4], index: 6, kind: input, shape index: {}, may-alias: {6,7,8}]   ;;  %s6427_s7 = inlined_call_operand.vmem [shape: bf16[2,16,16,4], index: 7, kind: input, shape index: {}, may-alias: {6,7,8}]   ;;  %s6428_s8 = inlined_call_operand.vmem [shape: bf16[2,16,16,4], index: 8, kind: input, shape index: {}, may-alias: {6,7,8}]   ;;  %s6429_s9 = inlined_call_operand.vmem [shape: bf16[12,108], index: 9, kind: input, shape index: {}]   ;;  %s6430_s10 = inlined_call_operand.vmem [shape: f32[12,1], index: 10, kind: input, shape index: {}]   ;;  %s6431_s11 = inlined_call_operand.vmem [shape: bf16[2,12,256], index: 11, kind: output, shape index: {}]  }
   0x1   :  { %6455 = sst [smem:[#allocation16_spill]] %s6421_s1 }
   0x2   :  { %6456 = sst [smem:[#allocation17_spill]] %s6423_s3 }
   0x3   :  { %6457 = sst [smem:[#allocation18_spill]] %s6426_s6 }
   0x4   :  { %s4832_s17 = smov 0   ;;  %s4834_s18 = smov 0  }
   0x5   :  { %s4836_s19 = smov 0   ;;  %s4838_s20 = smov 0  }
   0x6   :  { %s4840_s21 = smov 0   ;;  %s4842_s22 = smov 0  }
   0x7   :  { %s4844_s23 = smov 0  }
   0x8 LB: > { %6458 = sst [smem:[#allocation4_spill]] %s4749_s21  ;;  %s30_s24 = sadd.s32 1, %s4749_s21  ;;  %s4757_s23 = sphi %s4844_s23, %s21_s23   ;;  %s4753_s22 = sphi %s4842_s22, %s6543_s22   ;;  %s4749_s21 = sphi %s4840_s21, %s6542_s21   ;;  %s4745_s20 = sphi %s4838_s20, %s6541_s20   ;;  %s4741_s19 = sphi %s4836_s19, %s6540_s19   ;;  %s4737_s18 = sphi %s4834_s18, %s6545_s18   ;;  %s4733_s17 = sphi %s4832_s17, %s6544_s17  }
   0x9   : > { %6459 = sst [smem:[#allocation5_spill]] %s4753_s22  ;;  %p31_p0 = scmp.ge.s32.totalorder %s30_s24, 2 }
   0xa   : > { %s33_s25 = sadd.s32 1, %s4753_s22  ;;  %s4137_s26 = sadd.s32 4294967295, %s4757_s23  }
   0xb   : > { %p394_p1 = scmp.ne.s32.totalorder %s4737_s18, %s4733_s17  ;;  %s6547_s24 = smov (%p31_p0, %s30_s24), 0 }
   0xc   : > { %6460 = sst [smem:[#allocation6_spill]] %s6547_s24  ;;  %s6549_s25 = smov (!%p31_p0, %s33_s25), %s4753_s22 }
   0xd   : > { %s380_s27 = ssub.s32 %s4749_s21, %s6547_s24  ;;  %p395_p2 = scmp.eq.s32.totalorder %s4137_s26, 3 }
   0xe   : > { %p35_p3 = scmp.ge.s32.totalorder %s6549_s25, 2  ;;  %p4159_p4 = scmp.ge.s32.totalorder %s4757_s23, 1 }
   0xf   : > { %p4878_p5 = por %p395_p2, %p394_p1  ;;  %p587_p6 = scmp.lt.s32.totalorder %s4757_s23, 5 }
  0x10   : > { %s6551_s25 = smov (%p35_p3, %s6549_s25), 0  ;;  %s384_s12 = sadd.s32 1, %s4737_s18 }
  0x11   : > { %6462 = sst [smem:[#allocation7_spill]] %s6551_s25  ;;  %p588_p7 = pnand %p4159_p4, %p587_p6 }
  0x12   : > { %s379_s29 = ssub.s32 %s4753_s22, %s6551_s25 }
  0x13   : > { %s381_s30 = sor.u32 %s380_s27, %s379_s29 }
  0x14   : > { %p382_p8 = scmp.eq.s32.totalorder %s381_s30, 0  ;;  %591 = sbr.rel (%p588_p7) target bundleno = 743 (0x2e7), region = 64 }
  0x16   : > { %s4889_s13 = scalar_select %p382_p8, %s4737_s18, %s384_s12  }
  0x18   : > { %6463 = sst [smem:[#allocation8_spill]] %s4889_s13 }
  0x19   : > { %s4892_s14 = sshll.u32 %s4741_s19, 3  ;;  %p730_p9 = scmp.lt.s32.totalorder %s4745_s20, 1  ;;  %vm868_vm0 = vsmask.f32 256  ;;  %vm867_vm1 = vcmask 90112   ;;  %vm6440_vm7 = vcmask 27648  }
  0x1a   : > { %p732_p10 = scmp.lt.s32.totalorder %s4892_s14, 15  ;;  %v891_v0 = vld [vmem:[#allocation2 + $0x54] sm:$0x1]  ;;  %vm4899_vm2 = vmand %vm867_vm1, %vm868_vm0  ;;  %vm900_vm3 = vsmask.f32 7938  ;;  %s6468_s3 = sld [smem:[#allocation17_spill]] }
  0x1b   : > { %s731_s15 = scalar_select %p730_p9, %s4745_s20, 1  ;;  %v892_v2 = vsel %vm4899_vm2, 0, %v891_v0  ;;  %vm4908_vm4 = vmand %vm867_vm1, %vm900_vm3  ;;  %v888_v4 = vld [vmem:[#allocation2 + $0x48] sm:$0x1]  ;;  %v923_v6 = vld [vmem:[#allocation2 + $0x5c] sm:$0x1] }
  0x1c   : > { %s733_s16 = scalar_select %p732_p10, %s4892_s14, 15  ;;  %893 = vst [vmem:[#allocation2 + $0x54] sm:$0x1] %v892_v2  ;;  %v889_v5 = vsel %vm4899_vm2, 0, %v888_v4  ;;  %v924_v7 = vsel %vm4908_vm4, 0, %v923_v6  ;;  %vm975_vm8 = vcmask 24576   ;;  %vm5197_vm10 = vmand %vm6440_vm7, %vm900_vm3 }
  0x1d   : > { %s4903_s26 = sshll.u32 %s731_s15, 5  ;;  %890 = vst [vmem:[#allocation2 + $0x48] sm:$0x1] %v889_v5  ;;  %v920_v8 = vld [vmem:[#allocation2 + $0x50] sm:$0x1]  ;;  %s6469_s6 = sld [smem:[#allocation18_spill]]  ;;  %vm5206_vm11 = vmand %vm975_vm8, %vm868_vm0 }
  0x1e   : > { %s4162_s27 = sshll.u32 %s733_s16, 1  ;;  %v885_v9 = vld [vmem:[#allocation2 + $0x3c] sm:$0x1]  ;;  %925 = vst [vmem:[#allocation2 + $0x5c] sm:$0x1] %v924_v7  ;;  %v921_v10 = vsel %vm4908_vm4, 0, %v920_v8 }
  0x1f   : > { %s736_s29 = sadd.s32 %s4903_s26, %s4162_s27  ;;  %v886_v11 = vsel %vm4899_vm2, 0, %v885_v9  ;;  %s4930_s27 = sadd.s32 4294967295, %s4892_s14  ;;  %922 = vst [vmem:[#allocation2 + $0x50] sm:$0x1] %v921_v10  ;;  %vm946_vm5 = vsmask.f32 4368 }
  0x20   : > { %s4917_s30 = sshll.u32 %s736_s29, 2  ;;  %887 = vst [vmem:[#allocation2 + $0x3c] sm:$0x1] %v886_v11  ;;  %p742_p11 = scmp.gt.s32.totalorder %s4930_s27, 0  ;;  %vm4953_vm6 = vmor %vm868_vm0, %vm946_vm5  ;;  %vm6441_vm13 = vmmov 0   ;;  %vm6445_vm14 = vcmask 60448  }
  0x21   : > { %s4927_s16 = scalar_lea.vmem %s6468_s3, %s4917_s30  ;;  %p4167_p12 = scmp.lt.s32.totalorder %s4930_s27, 15  ;;  %vm5514_vm15 = vmand %vm6445_vm14, %vm900_vm3  ;;  %vm1282_vm1 = vcmask 57376   ;;  %vm6443_vm8 = vcmask 93248  }
  0x22   : > { %v1299_v12 = vld [vmem:[%s4927_s16 + $0x30] sm:$0xf]  ;;  %v1297_v13 = vld [vmem:[%s4927_s16 + $0x28] sm:$0xf]  ;;  %v1300_v14 = vld [vmem:[%s4927_s16 + $0x34] sm:$0xf]  ;;  %s5109_s13 = scalar_lea.vmem %s6420_s0, %s4917_s30 }
  0x23   : > { %s4939_s24 = scalar_lea.vmem %s6469_s6, %s4917_s30  ;;  %v1406_v15 = vshrl.u32 %v1299_v12, 16  ;;  %v1409_v16 = vshll.u32 %v1299_v12, 16  ;;  %v1389_v17 = vshrl.u32 %v1297_v13, 16  ;;  %v1392_v18 = vshll.u32 %v1297_v13, 16  ;;  %v1298_v29 = vld [vmem:[%s4927_s16 + $0x2c] sm:$0xf]  ;;  %vm5527_vm5 = vmand %vm1282_vm1, %vm868_vm0 }
  0x24   : > { %v1659_v19 = vld [vmem:[%s4939_s24 + $0x34] sm:$0xf]  ;;  %v1414_v20 = vshrl.u32 %v1300_v14, 16  ;;  %v1658_v22 = vld [vmem:[%s4939_s24 + $0x30] sm:$0xf]  ;;  %v1417_v28 = vshll.u32 %v1300_v14, 16 }
  0x25   : > { %v1773_v21 = vshrl.u32 %v1659_v19, 16  ;;  %v1408_v23 = vrot.slane %v1406_v15, 7  ;;  %v1391_v24 = vrot.slane %v1389_v17, 7  ;;  %v1765_v25 = vshrl.u32 %v1658_v22, 16  ;;  %s743_s25 = scalar_select %p742_p11, %s4930_s27, 0 }
  0x26   : > { %v1416_v26 = vrot.slane %v1414_v20, 7  ;;  %v1768_v32 = vshll.u32 %v1658_v22, 16  ;;  %v1776_v33 = vshll.u32 %v1659_v19, 16  ;;  %s6434_s12 = smov 4   ;;  %v1397_v37 = vshrl.u32 %v1298_v29, 16  ;;  %s6436_s15 = smov 8  }
  0x27   : > { %v1775_v27 = vrot.slane %v1773_v21, 7  ;;  %v1411_v30 = vor.u32 %v1409_v16, %v1408_v23  ;;  %v1394_v31 = vor.u32 %v1392_v18, %v1391_v24  ;;  %v1767_v36 = vrot.slane %v1765_v25, 7  ;;  %v1295_v40 = vld [vmem:[%s4927_s16 + $0x20] sm:$0xf]  ;;  %v1656_v42 = vld [vmem:[%s4939_s24 + $0x28] sm:$0xf] }
  0x28   : > { %v1421_v34 = vrot.slane %v1416_v26, 4  ;;  %v1412_v38 = vrot.slane %v1408_v23, 4  ;;  %v1419_v39 = vor.u32 %v1417_v28, %v1416_v26  ;;  %v1657_v43 = vld [vmem:[%s4939_s24 + $0x2c] sm:$0xf]  ;;  %s6553_s25 = smov (!%p4167_p12, %s743_s25), 15  ;;  %v1400_v44 = vshll.u32 %v1298_v29, 16 }
  0x29   : > { %1475 = vrot.lane.b32.xlu0 %v1411_v30, %s6434_s12  ;;  %1469 = vrot.lane.b32.xlu1 %v1394_v31, %s6434_s12  ;;  %v1780_v35 = vrot.slane %v1775_v27, 4  ;;  %v1770_v45 = vor.u32 %v1768_v32, %v1767_v36  ;;  %v1399_v46 = vrot.slane %v1397_v37, 7  ;;  %v1778_v47 = vor.u32 %v1776_v33, %v1775_v27  ;;  %s4172_s29 = sshll.u32 %s6553_s25, 1  ;;  %v1296_v62 = vld [vmem:[%s4927_s16 + $0x24] sm:$0xf]  ;;  %s758_s25 = sadd.s32 8, %s4892_s14 }
  0x2a   : > { %v1372_v48 = vshrl.u32 %v1295_v40, 16  ;;  %v1420_v49 = vsel %vm4953_vm6, %v1412_v38, %v1419_v39  ;;  %v1771_v50 = vrot.slane %v1767_v36, 4  ;;  %v1748_v51 = vshrl.u32 %v1656_v42, 16  ;;  %s4966_s27 = sadd.s32 %s4172_s29, %s4903_s26  ;;  %v1293_v7 = vld [vmem:[%s4927_s16 + $0x18] sm:$0xf]  ;;  %p5018_p13 = scmp.lt.s32.totalorder %s758_s25, 15 }
  0x2b   : > { %v1756_v52 = vshrl.u32 %v1657_v43, 16  ;;  %v1395_v53 = vrot.slane %v1391_v24, 4  ;;  %v1404_v54 = vrot.slane %v1399_v46, 4  ;;  %v1402_v55 = vor.u32 %v1400_v44, %v1399_v46  ;;  %v1654_v8 = vld [vmem:[%s4939_s24 + $0x20] sm:$0xf]  ;;  %p865_p0 = scmp.eq.s32.totalorder %s4741_s19, 0 }
  0x2c   : > { %v1374_v56 = vrot.slane %v1372_v48, 7  ;;  %v1375_v57 = vshll.u32 %v1295_v40, 16  ;;  %v1779_v58 = vsel %vm4953_vm6, %v1771_v50, %v1778_v47  ;;  %v1750_v59 = vrot.slane %v1748_v51, 7  ;;  %v1655_v9 = vld [vmem:[%s4939_s24 + $0x24] sm:$0xf]  ;;  %s6555_s25 = smov (!%p5018_p13, %s758_s25), 15 }
  0x2d   : > { %1479 = vrot.lane.b32.xlu0 %v1421_v34, %s6434_s12  ;;  %1838 = vrot.lane.b32.xlu1 %v1780_v35, %s6436_s15  ;;  %v1758_v60 = vrot.slane %v1756_v52, 7  ;;  %v1759_v61 = vshll.u32 %v1657_v43, 16  ;;  %v1751_v0 = vshll.u32 %v1656_v42, 16  ;;  %v1380_v2 = vshrl.u32 %v1296_v62, 16  ;;  %v1294_v17 = vld [vmem:[%s4927_s16 + $0x1c] sm:$0xf] }
  0x2e   : > { %v1377_v63 = vor.u32 %v1375_v57, %v1374_v56  ;;  %v1403_v4 = vsel %vm4953_vm6, %v1395_v53, %v1402_v55  ;;  %v1754_v5 = vrot.slane %v1750_v59, 4  ;;  %v1355_v12 = vshrl.u32 %v1293_v7, 16  ;;  %v1291_v20 = vld [vmem:[%s4927_s16 + $0x10] sm:$0xf]  ;;  %v1652_v21 = vld [vmem:[%s4939_s24 + $0x18] sm:$0xf] }
  0x2f   : > { %v1761_v6 = vor.u32 %v1759_v61, %v1758_v60  ;;  %v1753_v10 = vor.u32 %v1751_v0, %v1750_v59  ;;  %v1382_v11 = vrot.slane %v1380_v2, 7  ;;  %v1383_v14 = vshll.u32 %v1296_v62, 16  ;;  %v1653_v26 = vld [vmem:[%s4939_s24 + $0x1c] sm:$0xf]  ;;  %v1292_v38 = vld [vmem:[%s4927_s16 + $0x14] sm:$0xf] }
  0x30   : > { %v1731_v15 = vshrl.u32 %v1654_v8, 16  ;;  %v1739_v16 = vshrl.u32 %v1655_v9, 16  ;;  %v1763_v18 = vrot.slane %v1758_v60, 4  ;;  %v1378_v19 = vrot.slane %v1374_v56, 4  ;;  %v5001_v43 = vld [vmem:[%s4939_s24 + $0x10] sm:$0xf] }
  0x31   : > { %1834 = vrot.lane.b32.xlu0 %v1770_v45, %s6436_s15  ;;  %1477 = vrot.lane.b32.xlu1 %v1420_v49, %s6434_s12  ;;  %v1762_v13 = vsel %vm4953_vm6, %v1754_v5, %v1761_v6  ;;  %v1387_v22 = vrot.slane %v1382_v11, 4  ;;  %v1357_v23 = vrot.slane %v1355_v12, 7  ;;  %v1358_v24 = vshll.u32 %v1293_v7, 16  ;;  %v1651_v44 = vld [vmem:[%s4939_s24 + $0x14] sm:$0xf]  ;;  %s6473_s1 = sld [smem:[#allocation16_spill]] }
  0x32   : > { %v1363_v25 = vshrl.u32 %v1294_v17, 16  ;;  %v1385_v27 = vor.u32 %v1383_v14, %v1382_v11  ;;  %v1733_v28 = vrot.slane %v1731_v15, 7  ;;  %v4990_v29 = vrot.slane %v1739_v16, 7  ;;  %v5008_v49 = vld [vmem:[%s4927_s16 + $0x8] sm:$0xf]  ;;  %s6557_s25 = smov (!%p5018_p13, %s6555_s25), 15 }
  0x33   : > { %v1742_v30 = vshll.u32 %v1655_v9, 16  ;;  %v1366_v31 = vshll.u32 %v1294_v17, 16  ;;  %v1338_v32 = vshrl.u32 %v1291_v20, 16  ;;  %v1714_v33 = vshrl.u32 %v1652_v21, 16  ;;  %v1290_v61 = vld [vmem:[%s4927_s16 + $0xc] sm:$0xf] }
  0x34   : > { %v1722_v34 = vshrl.u32 %v1653_v26, 16  ;;  %v1360_v35 = vor.u32 %v1358_v24, %v1357_v23  ;;  %v1734_v36 = vshll.u32 %v1654_v8, 16  ;;  %v4994_v37 = vrot.slane %v1363_v25, 7  ;;  %v5036_v5 = vld [vmem:[%s4939_s24 + $0xc] sm:$0xf]  ;;  %s6474_s6 = smov 8  }
  0x35   : > { %1473 = vrot.lane.b32.xlu0 %v1404_v54, %s6434_s12  ;;  %1836 = vrot.lane.b32.xlu1 %v1779_v58, %s6436_s15  ;;  %v1386_v39 = vsel %vm4953_vm6, %v1378_v19, %v1385_v27  ;;  %v1737_v40 = vrot.slane %v1733_v28, 4  ;;  %v1744_v42 = vor.u32 %v1742_v30, %v4990_v29  ;;  %v1361_v45 = vrot.slane %v1357_v23, 4  ;;  %v5068_v23 = vld [vmem:[%s4927_s16 + $0x4] sm:$0xf]  ;;  %s6475_s22 = smov 4   ;;  %p866_p1 = scmp.eq.s32.totalorder %s4741_s19, 1 }
  0x36   : > { %v1368_v46 = vor.u32 %v1366_v31, %v4994_v37  ;;  %v5005_v47 = vrot.slane %v1338_v32, 7  ;;  %v1341_v48 = vshll.u32 %v1291_v20, 16  ;;  %v1716_v50 = vrot.slane %v1714_v33, 7  ;;  %s4765_s21 = smov 92  }
  0x37   : > { %v5011_v51 = vrot.slane %v1722_v34, 7  ;;  %v1725_v52 = vshll.u32 %v1653_v26, 16  ;;  %v1717_v53 = vshll.u32 %v1652_v21, 16  ;;  %v1736_v54 = vor.u32 %v1734_v36, %v1733_v28 }
  0x38   : > { %v1697_v55 = vshrl.u32 %v5001_v43, 16  ;;  %v1705_v56 = vshrl.u32 %v1651_v44, 16  ;;  %v1745_v57 = vsel %vm4953_vm6, %v1737_v40, %v1744_v42  ;;  %v1746_v58 = vrot.slane %v4990_v29, 4 }
  0x39   : > { %1471 = vrot.lane.b32.xlu1 %v1403_v4, %s6434_s12  ;;  %1463 = vrot.lane.b32.xlu0 %v1377_v63, %s6434_s12  ;;  %v1346_v59 = vshrl.u32 %v1292_v38, 16  ;;  %v1321_v60 = vshrl.u32 %v5008_v49, 16  ;;  %v1370_v62 = vrot.slane %v4994_v37, 4  ;;  %v1369_v63 = vsel %vm4953_vm6, %v1361_v45, %v1368_v46  ;;  %v5033_v4 = vld [vmem:[%s4939_s24 + $0x8] sm:$0xf] }
  0x3a   : > { %v1343_v0 = vor.u32 %v1341_v48, %v5005_v47  ;;  %v1349_v2 = vshll.u32 %v1292_v38, 16  ;;  %v1720_v6 = vrot.slane %v1716_v50, 4  ;;  %v1727_v7 = vor.u32 %v1725_v52, %v5011_v51 }
  0x3b   : > { %v5039_v8 = vor.u32 %v1717_v53, %v1716_v50  ;;  %v1729_v9 = vrot.slane %v5011_v51, 4  ;;  %v1699_v11 = vrot.slane %v1697_v55, 7  ;;  %v5050_v12 = vrot.slane %v1705_v56, 7  ;;  %v5136_v53 = vld [vmem:[%s4939_s24 + $0x4] sm:$0xf] }
  0x3c   : > { %v1329_v14 = vshrl.u32 %v1290_v61, 16  ;;  %v5056_v15 = vrot.slane %v1346_v59, 7  ;;  %v1323_v16 = vrot.slane %v1321_v60, 7  ;;  %v1680_v17 = vshrl.u32 %v5033_v4, 16 }
  0x3d   : > { %1830 = vrot.lane.b32.xlu1 %v1762_v13, %s6436_s15  ;;  %1828 = vrot.lane.b32.xlu0 %v1753_v10, %s6436_s15  ;;  %v5043_v10 = vld [vmem:[%s4927_s16] sm:$0xf]  ;;  %v1708_v13 = vshll.u32 %v1651_v44, 16  ;;  %v1344_v19 = vrot.slane %v5005_v47, 4  ;;  %v1324_v20 = vshll.u32 %v5008_v49, 16  ;;  %v1332_v21 = vshll.u32 %v1290_v61, 16 }
  0x3e   : > { %v1728_v24 = vsel %vm4953_vm6, %v1720_v6, %v1727_v7  ;;  %v1351_v25 = vor.u32 %v1349_v2, %v5056_v15  ;;  %v1700_v26 = vshll.u32 %v5001_v43, 16  ;;  %v1327_v27 = vrot.slane %v1323_v16, 4  ;;  %v5121_v47 = vld [vmem:[%s4939_s24] sm:$0xf]  ;;  %v990_v6 = vld [vmem:[%s5109_s13 + $0x28] sm:$0xf] }
  0x3f   : > { %v1703_v28 = vrot.slane %v1699_v11, 4  ;;  %v1710_v29 = vor.u32 %v1708_v13, %v5050_v12  ;;  %v5083_v30 = vrot.slane %v1329_v14, 7  ;;  %v1691_v31 = vshll.u32 %v5036_v5, 16  ;;  %v993_v14 = vld [vmem:[%s5109_s13 + $0x34] sm:$0xf] }
  0x40   : > { %v1682_v32 = vrot.slane %v1680_v17, 7  ;;  %v1312_v34 = vshrl.u32 %v5068_v23, 16  ;;  %v1307_v38 = vshll.u32 %v5043_v10, 16  ;;  %v1353_v42 = vrot.slane %v5056_v15, 4 }
  0x41   : > { %1832 = vrot.lane.b32.xlu1 %v1763_v18, %s6436_s15  ;;  %1467 = vrot.lane.b32.xlu0 %v1387_v22, %s6434_s12  ;;  %v1688_v18 = vshrl.u32 %v5036_v5, 16  ;;  %v1304_v22 = vshrl.u32 %v5043_v10, 16  ;;  %v1334_v36 = vor.u32 %v1332_v21, %v5083_v30  ;;  %v5114_v43 = vsel %vm4953_vm6, %v1344_v19, %v1351_v25  ;;  %v1199_v25 = vld [vmem:[#allocation2 + $0x54] sm:$0xf] }
  0x42   : > { %v5116_v44 = vor.u32 %v1324_v20, %v1323_v16  ;;  %v5118_v45 = vor.u32 %v1700_v26, %v1699_v11  ;;  %v5127_v48 = vsel %vm4953_vm6, %v1703_v28, %v1710_v29  ;;  %v1712_v49 = vrot.slane %v5050_v12, 4 }
  0x43   : > { %v5086_v33 = vrot.slane %v1688_v18, 7  ;;  %v5093_v37 = vrot.slane %v1304_v22, 7  ;;  %v1336_v50 = vrot.slane %v5083_v30, 4  ;;  %v5139_v56 = vrot.slane %v1312_v34, 7  ;;  %v991_v22 = vld [vmem:[%s5109_s13 + $0x2c] sm:$0xf] }
  0x44   : > { %v5148_v59 = vsel %vm4953_vm6, %v1327_v27, %v1334_v36  ;;  %v1671_v5 = vshrl.u32 %v5136_v53, 16  ;;  %v1674_v13 = vshll.u32 %v5136_v53, 16  ;;  %v1082_v20 = vshrl.u32 %v990_v6, 16 }
  0x45   : > { %1465 = vrot.lane.b32.xlu1 %v1386_v39, %s6434_s12  ;;  %1457 = vrot.lane.b32.xlu0 %v1360_v35, %s6434_s12  ;;  %s5046_s12 = sshll.u32 %s4966_s27, 2  ;;  %v1683_v39 = vshll.u32 %v5033_v4, 16  ;;  %v1693_v55 = vor.u32 %v1691_v31, %v5086_v33  ;;  %v5151_v60 = vor.u32 %v1307_v38, %v5093_v37  ;;  %v1310_v2 = vrot.slane %v5093_v37, 4 }
  0x46   : > { %s5062_s27 = scalar_select %p865_p0, 1, 0  ;;  %v1663_v4 = vshrl.u32 %v5121_v47, 16  ;;  %v1319_v16 = vrot.slane %v5139_v56, 4  ;;  %v1085_v21 = vshll.u32 %v990_v6, 16  ;;  %v1107_v27 = vshrl.u32 %v993_v14, 16 }
  0x47   : > { %s752_s3 = scalar_lea.vmem %s6473_s1, %s5046_s12  ;;  %s5101_s1 = scalar_lea.vmem %s6424_s4, %s5046_s12  ;;  %v5153_v61 = vor.u32 %v1683_v39, %v1682_v32  ;;  %v1084_v34 = vrot.slane %v1082_v20, 7  ;;  %v988_v39 = vld [vmem:[%s5109_s13 + $0x20] sm:$0xf]  ;;  %vm1641_vm1 = vcmask 90176  }
  0x48   : > { %v935_v35 = vstv %s5062_s27  ;;  %v932_v40 = vld [vmem:[%s752_s3] sm:$0xf]  ;;  %v933_v46 = vld [vmem:[%s752_s3 + $0x4] sm:$0xf]  ;;  %v1109_v38 = vrot.slane %v1107_v27, 7  ;;  %v1065_v20 = vshrl.u32 %v988_v39, 16  ;;  %s5270_s30 = scalar_lea.vmem %s6427_s7, %s5046_s12 }
  0x49   : > { %1824 = vrot.lane.b32.xlu1 %v1745_v57, %s6436_s15  ;;  %1822 = vrot.lane.b32.xlu0 %v1736_v54, %s6436_s15  ;;  %s5090_s15 = sshll.u32 %s6557_s25, 1  ;;  %vm5131_vm9 = vcmp.eq.s32.totalorder %v935_v35, 1  ;;  %v1686_v54 = vrot.slane %v1682_v32, 4  ;;  %v1192_v32 = vld [vmem:[#allocation2 + $0x48] sm:$0xf]  ;;  %v1110_v35 = vshll.u32 %v993_v14, 16 }
  0x4a   : > { %s767_s27 = sadd.s32 %s5090_s15, %s4903_s26  ;;  %v5143_v57 = vsel %vm5131_vm9, 0, %v932_v40  ;;  %v5167_v7 = vsel %vm5131_vm9, 0, %v933_v46  ;;  %v917_v40 = vld [vmem:[#allocation2 + $0x44] sm:$0x1]  ;;  %v1087_v46 = vor.u32 %v1085_v21, %v1084_v34  ;;  %v1114_v6 = vrot.slane %v1109_v38, 4  ;;  %s4762_s25 = smov 116  }
  0x4b   : > { %v949_v10 = vshrl.u32 %v5143_v57, 16  ;;  %v5178_v15 = vsel %vm4953_vm6, %v1686_v54, %v1693_v55  ;;  %v952_v19 = vshll.u32 %v5143_v57, 16  ;;  %v6480_v54 = vmov 0  ;;  %v1203_v55 = vld [vmem:[#allocation2 + $0x5c] sm:$0x1]  ;;  %s4764_s3 = smov 104  }
  0x4c   : > { %v6481_v54 = vsel %vm5206_vm11, 4294967295, %v6480_v54  ;;  %v1196_v14 = vld [vmem:[#allocation2 + $0x50] sm:$0x1]  ;;  %v1068_v21 = vshll.u32 %v988_v39, 16  ;;  %s4770_s15 = smov 32  }
  0x4d   : > { %1826 = vrot.lane.b32.xlu1 %v1746_v58, %s6474_s6  ;;  %1461 = vrot.lane.b32.xlu0 %v1370_v62, %s6475_s22  ;;  %v1241_v58 = vld [vmem:[%s5101_s1] sm:$0xf]  ;;  %v1315_v62 = vshll.u32 %v5068_v23, 16  ;;  %v957_v23 = vshrl.u32 %v5167_v7, 16  ;;  %v5192_v28 = vrot.slane %v949_v10, 7  ;;  %v1112_v10 = vor.u32 %v1110_v35, %v1109_v38 }
  0x4e   : > { %v5172_v11 = vsel %vm5131_vm9, 0, %v1241_v58  ;;  %v1088_v58 = vrot.slane %v1084_v34, 4  ;;  %v6446_v35 = vmov 0.0   ;;  %v918_v38 = vsel %vm4908_vm4, 0, %v917_v40 }
  0x4f   : > { %v5182_v18 = vor.u32 %v1315_v62, %v5139_v56  ;;  %v1253_v29 = vshll.u32 %v5172_v11, 16  ;;  %v1093_v62 = vshll.u32 %v991_v22, 16  ;;  %4446 = vmatprep.subr.bf16.mxu1 %v6446_v35  ;;  %4426 = vmatprep.subr.bf16.mxu0 %v6446_v35  ;;  %919 = vst [vmem:[#allocation2 + $0x44] sm:$0x1] %v918_v38  ;;  %v982_v38 = vld [vmem:[%s5109_s13 + $0x8] sm:$0xf] }
  0x50   : > { %4462 = vmatprep.mubr.msk.bf16.mxu1 %vm6441_vm13, %v6446_v35  ;;  %4442 = vmatprep.mubr.msk.bf16.mxu0 %vm6441_vm13, %v6446_v35  ;;  %vm2412_vm13 = vcmask 1042432  }
  0x51   : > { %1459 = vrot.lane.b32.xlu1 %v1369_v63, %s6475_s22  ;;  %1451 = vrot.lane.b32.xlu0 %v1343_v0, %s6475_s22  ;;  %v992_v63 = vld [vmem:[%s5109_s13 + $0x30] sm:$0xf]  ;;  %v1695_v0 = vrot.slane %v5086_v33, 4 }
  0x52   : > { %v1102_v17 = vshll.u32 %v992_v63, 16 }
  0x55   : > { %1818 = vrot.lane.b32.xlu1 %v1728_v24, %s6474_s6  ;;  %1816 = vrot.lane.b32.xlu0 %v5039_v8, %s6474_s6  ;;  %v1099_v8 = vshrl.u32 %v992_v63, 16  ;;  %v1250_v24 = vshrl.u32 %v5172_v11, 16 }
  0x57   : > { %v1101_v26 = vrot.slane %v1099_v8, 7 }
  0x59   : > { %1820 = vrot.lane.b32.xlu1 %v1729_v9, %s6474_s6  ;;  %1455 = vrot.lane.b32.xlu0 %v1353_v42, %s6475_s22  ;;  %v1104_v36 = vor.u32 %v1102_v17, %v1101_v26  ;;  %v1105_v51 = vrot.slane %v1101_v26, 4  ;;  %v1090_v9 = vshrl.u32 %v991_v22, 16  ;;  %v5202_v42 = vrot.slane %v1663_v4, 7  ;;  %v989_v17 = vld [vmem:[%s5109_s13 + $0x24] sm:$0xf] }
  0x5a   : > { %v1193_v4 = vsel %vm5197_vm10, %v1087_v46, %v1192_v32  ;;  %v882_v22 = vld [vmem:[#allocation2 + $0x30] sm:$0x1]  ;;  %v5228_v32 = vrot.slane %v1671_v5, 7 }
  0x5b   : > { %v1200_v63 = vsel %vm5197_vm10, %v1104_v36, %v1199_v25  ;;  %v1092_v8 = vrot.slane %v1090_v9, 7  ;;  %1194 = vst [vmem:[#allocation2 + $0x48] sm:$0xf] %v1193_v4  ;;  %v1204_v25 = vsel %vm5206_vm11, %v1114_v6, %v1203_v55  ;;  %v1113_v26 = vsel %vm4953_vm6, %v1105_v51, %v1112_v10  ;;  %v914_v9 = vld [vmem:[#allocation2 + $0x38] sm:$0x1] }
  0x5c   : > { %1201 = vst [vmem:[#allocation2 + $0x54] sm:$0xf] %v1200_v63  ;;  %1205 = vst [vmem:[#allocation2 + $0x5c] sm:$0x1] %v1204_v25  ;;  %v1067_v36 = vrot.slane %v1065_v20, 7  ;;  %v1073_v51 = vshrl.u32 %v989_v17, 16 }
  0x5d   : > { %1453 = vrot.lane.b32.xlu1 %v5114_v43, %s6475_s22  ;;  %1445 = vrot.lane.b32.xlu0 %v5116_v44, %s6475_s22  ;;  %v1097_v27 = vrot.slane %v1092_v8, 4  ;;  %v1095_v34 = vor.u32 %v1093_v62, %v1092_v8  ;;  %v1185_v43 = vld [vmem:[#allocation2 + $0x3c] sm:$0xf]  ;;  %v986_v44 = vld [vmem:[%s5109_s13 + $0x18] sm:$0xf]  ;;  %v1076_v55 = vshll.u32 %v989_v17, 16 }
  0x5e   : > { %1202 = vst.msk [vmem:[#allocation2 + $0x58] sm:$0xf] %vm6440_vm7, %v1113_v26  ;;  %v883_v5 = vsel %vm4899_vm2, 0, %v882_v22  ;;  %v987_v62 = vld [vmem:[%s5109_s13 + $0x1c] sm:$0xf]  ;;  %v1070_v40 = vor.u32 %v1068_v21, %v1067_v36  ;;  %v1075_v6 = vrot.slane %v1073_v51, 7 }
  0x5f   : > { %v1197_v39 = vsel %vm5206_vm11, %v1097_v27, %v1196_v14  ;;  %v1096_v46 = vsel %vm4953_vm6, %v1088_v58, %v1095_v34  ;;  %v879_v63 = vld [vmem:[#allocation2 + $0x24] sm:$0x1]  ;;  %v1071_v58 = vrot.slane %v1067_v36, 4  ;;  %884 = vst [vmem:[#allocation2 + $0x30] sm:$0x1] %v883_v5  ;;  %v1048_v10 = vshrl.u32 %v986_v44, 16 }
  0x60   : > { %1198 = vst [vmem:[#allocation2 + $0x50] sm:$0x1] %v1197_v39  ;;  %1195 = vst.msk [vmem:[#allocation2 + $0x4c] sm:$0xf] %vm6440_vm7, %v1096_v46  ;;  %v984_v14 = vld [vmem:[%s5109_s13 + $0x10] sm:$0xf]  ;;  %v1186_v20 = vsel %vm5197_vm10, %v1070_v40, %v1185_v43  ;;  %v1078_v22 = vor.u32 %v1076_v55, %v1075_v6 }
  0x61   : > { %1812 = vrot.lane.b32.xlu1 %v5127_v48, %s6474_s6  ;;  %1810 = vrot.lane.b32.xlu0 %v5118_v45, %s6474_s6  ;;  %v5248_v8 = vrot.slane %v957_v23, 7  ;;  %v1666_v17 = vshll.u32 %v5121_v47, 16  ;;  %v1051_v48 = vshll.u32 %v986_v44, 16  ;;  %v915_v45 = vsel %vm4908_vm4, 0, %v914_v9  ;;  %v911_v4 = vld [vmem:[#allocation2 + $0x2c] sm:$0x1] }
  0x62   : > { %v1080_v21 = vrot.slane %v1075_v6, 4  ;;  %v1050_v25 = vrot.slane %v1048_v10, 7  ;;  %916 = vst [vmem:[#allocation2 + $0x38] sm:$0x1] %v915_v45  ;;  %v985_v26 = vld [vmem:[%s5109_s13 + $0x14] sm:$0xf]  ;;  %v1079_v51 = vsel %vm4953_vm6, %v1071_v58, %v1078_v22 }
  0x63   : > { %v876_v23 = vld [vmem:[#allocation2 + $0x18] sm:$0x1]  ;;  %1187 = vst [vmem:[#allocation2 + $0x3c] sm:$0xf] %v1186_v20  ;;  %v1056_v27 = vshrl.u32 %v987_v62, 16  ;;  %v1059_v34 = vshll.u32 %v987_v62, 16 }
  0x64   : > { %v880_v44 = vsel %vm4899_vm2, 0, %v879_v63  ;;  %v1031_v36 = vshrl.u32 %v984_v14, 16  ;;  %v1242_v43 = vld [vmem:[%s5101_s1 + $0x4] sm:$0xf]  ;;  %v1053_v9 = vor.u32 %v1051_v48, %v1050_v25  ;;  %v1054_v39 = vrot.slane %v1050_v25, 4  ;;  %s5439_s1 = sshll.u32 %s767_s27, 2 }
  0x65   : > { %1814 = vrot.lane.b32.xlu1 %v1712_v49, %s6474_s6  ;;  %1449 = vrot.lane.b32.xlu0 %v1336_v50, %s6475_s22  ;;  %881 = vst [vmem:[#allocation2 + $0x24] sm:$0x1] %v880_v44  ;;  %v1034_v46 = vshll.u32 %v984_v14, 16  ;;  %1188 = vst.msk [vmem:[#allocation2 + $0x40] sm:$0xf] %vm6440_vm7, %v1079_v51  ;;  %v1058_v12 = vrot.slane %v1056_v27, 7  ;;  %s814_s26 = scalar_lea.vmem %s6425_s5, %s5439_s1  ;;  %s859_s27 = scalar_lea.vmem %s6428_s8, %s5439_s1 }
  0x66   : > { %v1033_v49 = vrot.slane %v1031_v36, 7  ;;  %v912_v30 = vsel %vm4908_vm4, 0, %v911_v4  ;;  %v1039_v50 = vshrl.u32 %v985_v26, 16  ;;  %v908_v55 = vld [vmem:[#allocation2 + $0x20] sm:$0x1]  ;;  %v5279_v5 = vrot.slane %v1250_v24, 7 }
  0x67   : > { %v1189_v62 = vld [vmem:[#allocation2 + $0x44] sm:$0x1]  ;;  %913 = vst [vmem:[#allocation2 + $0x2c] sm:$0x1] %v912_v30  ;;  %v1042_v63 = vshll.u32 %v985_v26, 16  ;;  %v877_v40 = vsel %vm4899_vm2, 0, %v876_v23  ;;  %v1061_v45 = vor.u32 %v1059_v34, %v1058_v12 }
  0x68   : > { %v1014_v6 = vshrl.u32 %v982_v38, 16  ;;  %v1600_v58 = vld [vmem:[%s5270_s30] sm:$0xf]  ;;  %v1190_v10 = vsel %vm5206_vm11, %v1080_v21, %v1189_v62  ;;  %v1178_v14 = vld [vmem:[#allocation2 + $0x30] sm:$0xf]  ;;  %v1063_v48 = vrot.slane %v1058_v12, 4  ;;  %v1036_v4 = vor.u32 %v1034_v46, %v1033_v49 }
  0x69   : > { %878 = vst [vmem:[#allocation2 + $0x18] sm:$0x1] %v877_v40  ;;  %1447 = vrot.lane.b32.xlu1 %v5148_v59, %s6475_s22  ;;  %1439 = vrot.lane.b32.xlu0 %v5151_v60, %s6475_s22  ;;  %1191 = vst [vmem:[#allocation2 + $0x44] sm:$0x1] %v1190_v10  ;;  %v1179_v24 = vsel %vm5197_vm10, %v1053_v9, %v1178_v14  ;;  %v1041_v20 = vrot.slane %v1039_v50, 7  ;;  %v1037_v22 = vrot.slane %v1033_v49, 4 }
  0x6a   : > { %v5292_v25 = vrot.slane %v1014_v6, 7  ;;  %v5295_v21 = vld [vmem:[%s5109_s13 + $0xc] sm:$0xf]  ;;  %v5299_v26 = vsel %vm5131_vm9, 0, %v1242_v43  ;;  %1180 = vst [vmem:[#allocation2 + $0x30] sm:$0xf] %v1179_v24  ;;  %v1062_v59 = vsel %vm4953_vm6, %v1054_v39, %v1061_v45  ;;  %v1255_v37 = vor.u32 %v1253_v29, %v5279_v5 }
  0x6b   : > { %v1182_v23 = vld [vmem:[#allocation2 + $0x38] sm:$0x1]  ;;  %v1017_v60 = vshll.u32 %v982_v38, 16  ;;  %v909_v27 = vsel %vm4908_vm4, 0, %v908_v55  ;;  %v5307_v34 = vsel %vm5131_vm9, 0, %v1600_v58  ;;  %v1046_v36 = vrot.slane %v1041_v20, 4 }
  0x6c   : > { %v1183_v44 = vsel %vm5206_vm11, %v1063_v48, %v1182_v23  ;;  %1181 = vst.msk [vmem:[#allocation2 + $0x34] sm:$0xf] %vm6440_vm7, %v1062_v59  ;;  %v1044_v43 = vor.u32 %v1042_v63, %v1041_v20  ;;  %910 = vst [vmem:[#allocation2 + $0x20] sm:$0x1] %v909_v27  ;;  %v1669_v51 = vrot.slane %v5202_v42, 4  ;;  %v1676_v38 = vor.u32 %v1674_v13, %v5228_v32 }
  0x6d   : > { %1184 = vst [vmem:[#allocation2 + $0x38] sm:$0x1] %v1183_v44  ;;  %v1171_v9 = vld [vmem:[#allocation2 + $0x24] sm:$0xf]  ;;  %v1019_v39 = vor.u32 %v1017_v60, %v5292_v25  ;;  %v1022_v46 = vshrl.u32 %v5295_v21, 16  ;;  %1806 = vrot.lane.b32.xlu1 %v5178_v15, %s6474_s6  ;;  %1804 = vrot.lane.b32.xlu0 %v5153_v61, %s6474_s6  ;;  %v964_v12 = vrot.slane %v5248_v8, 4  ;;  %v1318_v15 = vsel %vm4953_vm6, %v1310_v2, %v5182_v18 }
  0x6e   : > { %v1258_v49 = vshrl.u32 %v5299_v26, 16  ;;  %v1601_v30 = vld [vmem:[%s5270_s30 + $0x4] sm:$0xf]  ;;  %v1172_v53 = vsel %vm5197_vm10, %v1036_v4, %v1171_v9  ;;  %v1045_v13 = vsel %vm4953_vm6, %v1037_v22, %v1044_v43  ;;  %v1609_v61 = vshrl.u32 %v5307_v34, 16  ;;  %v1175_v50 = vld [vmem:[#allocation2 + $0x2c] sm:$0x1] }
  0x6f   : > { %1173 = vst [vmem:[#allocation2 + $0x24] sm:$0xf] %v1172_v53  ;;  %1174 = vst.msk [vmem:[#allocation2 + $0x28] sm:$0xf] %vm6440_vm7, %v1045_v13  ;;  %v1024_v55 = vrot.slane %v1022_v46, 7  ;;  %v5339_v63 = vor.u32 %v952_v19, %v5192_v28  ;;  %v1668_v2 = vor.u32 %v1666_v17, %v5202_v42  ;;  %v1176_v18 = vsel %vm5206_vm11, %v1046_v36, %v1175_v50  ;;  %s4766_s30 = smov 80  }
  0x70   : > { %v873_v62 = vld [vmem:[#allocation2 + $0xc] sm:$0x1]  ;;  %v1164_v40 = vld [vmem:[#allocation2 + $0x18] sm:$0xf]  ;;  %v980_v6 = vld [vmem:[%s5109_s13] sm:$0xf]  ;;  %v1677_v10 = vsel %vm4953_vm6, %v1669_v51, %v1676_v38 }
  0x71   : > { %v905_v58 = vld [vmem:[#allocation2 + $0x14] sm:$0x1]  ;;  %v5354_v57 = vsel %vm5131_vm9, 0, %v1601_v30  ;;  %1177 = vst [vmem:[#allocation2 + $0x2c] sm:$0x1] %v1176_v18  ;;  %v1165_v11 = vsel %vm5197_vm10, %v1019_v39, %v1164_v40  ;;  %v1029_v19 = vrot.slane %v1024_v55, 4  ;;  %1808 = vrot.lane.b32.xlu1 %v1695_v0, %s6474_s6  ;;  %1443 = vrot.lane.b32.xlu0 %v1319_v16, %s6475_s22  ;;  %vm5540_vm9 = vmand %vm6443_vm8, %vm900_vm3 }
  0x72   : > { %v981_v47 = vld [vmem:[%s5109_s13 + $0x4] sm:$0xf]  ;;  %v870_v29 = vld [vmem:[#allocation2] sm:$0x1]  ;;  %v5365_v42 = vrot.slane %v1258_v49, 7  ;;  %v1020_v52 = vrot.slane %v5292_v25, 4 }
  0x73   : > { %1166 = vst [vmem:[#allocation2 + $0x18] sm:$0xf] %v1165_v11  ;;  %v1025_v17 = vshll.u32 %v5295_v21, 16  ;;  %v874_v14 = vsel %vm4899_vm2, 0, %v873_v62  ;;  %v902_v48 = vld [vmem:[#allocation2 + $0x8] sm:$0x1] }
  0x74   : > { %v1261_v45 = vshll.u32 %v5299_v26, 16  ;;  %v1168_v33 = vld [vmem:[#allocation2 + $0x20] sm:$0x1]  ;;  %875 = vst [vmem:[#allocation2 + $0xc] sm:$0x1] %v874_v14  ;;  %v997_v0 = vshrl.u32 %v980_v6, 16 }
  0x75   : > { %v1000_v4 = vshll.u32 %v980_v6, 16  ;;  %v906_v56 = vsel %vm4908_vm4, 0, %v905_v58  ;;  %v1617_v16 = vshrl.u32 %v5354_v57, 16  ;;  %v1169_v24 = vsel %vm5206_vm11, %v1029_v19, %v1168_v33  ;;  %v894_v25 = vld [vmem:[#allocation2 + $0x60] sm:$0x1]  ;;  %1441 = vrot.lane.b32.xlu1 %v1318_v15, %s6475_s22  ;;  %1266 = vrot.lane.b32.xlu0 %v1255_v37, %s6475_s22 }
  0x76   : > { %v1027_v20 = vor.u32 %v1025_v17, %v1024_v55  ;;  %907 = vst [vmem:[#allocation2 + $0x14] sm:$0x1] %v906_v56  ;;  %v1005_v22 = vshrl.u32 %v981_v47, 16  ;;  %v994_v21 = vld [vmem:[%s5109_s13 + $0x38] sm:$0xf]  ;;  %v999_v23 = vrot.slane %v997_v0, 7  ;;  %v1263_v40 = vor.u32 %v1261_v45, %v5365_v42 }
  0x77   : > { %1170 = vst [vmem:[#allocation2 + $0x20] sm:$0x1] %v1169_v24  ;;  %v1008_v26 = vshll.u32 %v981_v47, 16  ;;  %v871_v59 = vsel %vm4899_vm2, 0, %v870_v29  ;;  %v903_v60 = vsel %vm4908_vm4, 0, %v902_v48  ;;  %v955_v36 = vrot.slane %v5192_v28, 4 }
  0x78   : > { %v1028_v27 = vsel %vm4953_vm6, %v1020_v52, %v1027_v20  ;;  %v1007_v44 = vrot.slane %v1005_v22, 7  ;;  %872 = vst [vmem:[#allocation2] sm:$0x1] %v871_v59  ;;  %904 = vst [vmem:[#allocation2 + $0x8] sm:$0x1] %v903_v60  ;;  %v960_v43 = vshll.u32 %v5167_v7, 16  ;;  %v1002_v51 = vor.u32 %v1000_v4, %v999_v23 }
  0x79   : > { %1167 = vst.msk [vmem:[#allocation2 + $0x1c] sm:$0xf] %vm6440_vm7, %v1028_v27  ;;  %v1003_v38 = vrot.slane %v999_v23, 4  ;;  %v895_v9 = vsel %vm4899_vm2, 0, %v894_v25  ;;  %v1116_v39 = vshrl.u32 %v994_v21, 16  ;;  %v1119_v53 = vshll.u32 %v994_v21, 16  ;;  %1800 = vrot.lane.b32.xlu1 %v1677_v10, %s6474_s6  ;;  %1798 = vrot.lane.b32.xlu0 %v1668_v2, %s6474_s6 }
  0x7a   : > { %v1012_v46 = vrot.slane %v1007_v44, 4  ;;  %v1010_v49 = vor.u32 %v1008_v26, %v1007_v44  ;;  %v962_v30 = vor.u32 %v960_v43, %v5248_v8  ;;  %896 = vst [vmem:[#allocation2 + $0x60] sm:$0x1] %v895_v9  ;;  %v1678_v13 = vrot.slane %v5228_v32, 4  ;;  %v5396_v15 = vld [vmem:[%s4927_s16 + $0x38] sm:$0xf] }
  0x7b   : > { %v1612_v28 = vshll.u32 %v5307_v34, 16  ;;  %v1256_v7 = vrot.slane %v5279_v5, 4  ;;  %v5398_v50 = vrot.slane %v1116_v39, 7  ;;  %v1265_v55 = vrot.slane %v5365_v42, 4  ;;  %v5406_v37 = vld [vmem:[%s4927_s16 + $0x3c] sm:$0xf] }
  0x7c   : > { %v1611_v62 = vrot.slane %v1609_v61, 7  ;;  %v1157_v32 = vld [vmem:[#allocation2 + $0xc] sm:$0xf]  ;;  %v1011_v5 = vsel %vm4953_vm6, %v1003_v38, %v1010_v49  ;;  %v963_v18 = vsel %vm4953_vm6, %v955_v36, %v962_v30  ;;  %v1619_v6 = vrot.slane %v1617_v16, 7  ;;  %v926_v14 = vld [vmem:[#allocation2 + $0x68] sm:$0x1] }
  0x7d   : > { %v1620_v58 = vshll.u32 %v5354_v57, 16  ;;  %v1158_v2 = vsel %vm5197_vm10, %v1002_v51, %v1157_v32  ;;  %v1161_v10 = vld [vmem:[#allocation2 + $0x14] sm:$0x1]  ;;  %1160 = vst.msk [vmem:[#allocation2 + $0x10] sm:$0xf] %vm6440_vm7, %v1011_v5  ;;  %v1121_v61 = vor.u32 %v1119_v53, %v5398_v50  ;;  %v1423_v57 = vshrl.u32 %v5396_v15, 16  ;;  %1802 = vrot.lane.b32.xlu1 %v1678_v13, %s6474_s6  ;;  %1270 = vrot.lane.b32.xlu0 %v1265_v55, %s6475_s22 }
  0x7e   : > { %974 = vst.msk [vmem:[#allocation2 + $0x4] sm:$0xf] %vm6440_vm7, %v963_v18  ;;  %1159 = vst [vmem:[#allocation2 + $0xc] sm:$0xf] %v1158_v2  ;;  %v1162_v34 = vsel %vm5206_vm11, %v1012_v46, %v1161_v10  ;;  %v1431_v11 = vshrl.u32 %v5406_v37, 16  ;;  %v1614_v29 = vor.u32 %v1612_v28, %v1611_v62  ;;  %v1615_v42 = vrot.slane %v1611_v62, 4 }
  0x7f   : > { %1163 = vst [vmem:[#allocation2 + $0x14] sm:$0x1] %v1162_v34  ;;  %v970_v19 = vld [vmem:[#allocation2] sm:$0xf]  ;;  %v977_v47 = vld [vmem:[#allocation2 + $0x8] sm:$0x1]  ;;  %v1264_v45 = vsel %vm4953_vm6, %v1256_v7, %v1263_v40  ;;  %v1622_v33 = vor.u32 %v1620_v58, %v1619_v6 }
  0x80   : > { %v971_v52 = vsel %vm5197_vm10, %v5339_v63, %v970_v19  ;;  %v978_v17 = vsel %vm5206_vm11, %v964_v12, %v977_v47  ;;  %v995_v48 = vld [vmem:[%s5109_s13 + $0x3c] sm:$0xf]  ;;  %v927_v63 = vsel %vm4908_vm4, 0, %v926_v14  ;;  %v1660_v8 = vld [vmem:[%s4939_s24 + $0x38] sm:$0xf]  ;;  %v1425_v16 = vrot.slane %v1423_v57, 7 }
  0x81   : > { %972 = vst [vmem:[#allocation2] sm:$0xf] %v971_v52  ;;  %979 = vst [vmem:[#allocation2 + $0x8] sm:$0x1] %v978_v17  ;;  %v1206_v0 = vld [vmem:[#allocation2 + $0x60] sm:$0xf]  ;;  %1625 = vrot.lane.b32.xlu1 %v1614_v29, %s6474_s6  ;;  %1268 = vrot.lane.b32.xlu0 %v1264_v45, %s6475_s22  ;;  %v1623_v59 = vsel %vm4953_vm6, %v1615_v42, %v1622_v33 }
  0x82   : > { %v1124_v4 = vshrl.u32 %v995_v48, 16  ;;  %v1661_v56 = vld [vmem:[%s4939_s24 + $0x3c] sm:$0xf]  ;;  %s5447_s16 = scalar_select %p866_p1, 1, 0  ;;  %v1207_v12 = vsel %vm5197_vm10, %v1121_v61, %v1206_v0  ;;  %v1426_v24 = vshll.u32 %v5396_v15, 16 }
  0x83   : > { %928 = vst [vmem:[#allocation2 + $0x68] sm:$0x1] %v927_v63  ;;  %1208 = vst [vmem:[#allocation2 + $0x60] sm:$0xf] %v1207_v12  ;;  %v1127_v22 = vshll.u32 %v995_v48, 16  ;;  %v1624_v25 = vrot.slane %v1619_v6, 4  ;;  %s5611_s24 = scalar_lea.vmem %s6422_s2, %s5439_s1 }
  0x84   : > { %v1126_v20 = vrot.slane %v1124_v4, 7  ;;  %v1433_v21 = vrot.slane %v1431_v11, 7  ;;  %v1434_v23 = vshll.u32 %v5406_v37, 16  ;;  %v1122_v26 = vrot.slane %v5398_v50, 4  ;;  %v1246_v51 = vld [vmem:[%s814_s26 + $0x4] sm:$0xf] }
  0x85   : > { %v1782_v60 = vshrl.u32 %v1660_v8, 16  ;;  %v1790_v27 = vshrl.u32 %v1661_v56, 16  ;;  %v942_v36 = vstv %s5447_s16  ;;  %1629 = vrot.lane.b32.xlu1 %v1624_v25, %s6474_s6  ;;  %1627 = vrot.lane.b32.xlu0 %v1623_v59, %s6474_s6  ;;  %v1428_v9 = vor.u32 %v1426_v24, %v1425_v16  ;;  %v5470_v39 = vld [vmem:[%s6429_s9] sm:$0x3f]   ;;  %s4768_s1 = smov 56   ;;  %s4769_s13 = smov 44  }
  0x86   : > { %v1129_v44 = vor.u32 %v1127_v22, %v1126_v20  ;;  %v1131_v43 = vrot.slane %v1126_v20, 4  ;;  %v1429_v46 = vrot.slane %v1425_v16, 4  ;;  %v1436_v49 = vor.u32 %v1434_v23, %v1433_v21  ;;  %v1245_v30 = vld [vmem:[%s814_s26] sm:$0xf]  ;;  %v1605_v62 = vld [vmem:[%s859_s27 + $0x4] sm:$0xf] }
  0x87   : > { %v1784_v53 = vrot.slane %v1782_v60, 7  ;;  %v1792_v13 = vrot.slane %v1790_v27, 7  ;;  %v1793_v28 = vshll.u32 %v1661_v56, 16  ;;  %vm5473_vm12 = vcmp.eq.s32.totalorder %v942_v36, 1  ;;  %v1604_v58 = vld [vmem:[%s859_s27] sm:$0xf] }
  0x88   : > { %v1130_v38 = vsel %vm4953_vm6, %v1122_v26, %v1129_v44  ;;  %v1248_v55 = vsel %vm5473_vm12, 0, %v1246_v51  ;;  %v1438_v37 = vrot.slane %v1433_v21, 4  ;;  %v1785_v32 = vshll.u32 %v1660_v8, 16  ;;  %v1553_v20 = vld [vmem:[#allocation2 + $0x54] sm:$0xf] }
  0x89   : > { %1209 = vst.msk [vmem:[#allocation2 + $0x64] sm:$0xf] %vm6440_vm7, %v1130_v38  ;;  %1481 = vrot.lane.b32.xlu1 %v1428_v9, %s6475_s22  ;;  %2185 = vrot.lane.b32.xlu0 %v5470_v39, %s4762_s25  ;;  %v1247_v5 = vsel %vm5473_vm12, 0, %v1245_v30  ;;  %v1437_v18 = vsel %vm4953_vm6, %v1429_v46, %v1436_v49  ;;  %v1788_v40 = vrot.slane %v1784_v53, 4  ;;  %v1795_v6 = vor.u32 %v1793_v28, %v1792_v13  ;;  %v1546_v22 = vld [vmem:[#allocation2 + $0x48] sm:$0xf]  ;;  %vm5550_vm7 = vmand %vm1641_vm1, %vm868_vm0 }
  0x8a   : > { %v1210_v15 = vld [vmem:[#allocation2 + $0x68] sm:$0x1]  ;;  %v1576_v2 = vshrl.u32 %v1248_v55, 16  ;;  %v1607_v10 = vsel %vm5473_vm12, 0, %v1605_v62  ;;  %v1568_v34 = vshrl.u32 %v1247_v5, 16  ;;  %v1787_v61 = vor.u32 %v1785_v32, %v1784_v53 }
  0x8b   : > { %v1211_v50 = vsel %vm5206_vm11, %v1131_v43, %v1210_v15  ;;  %v1606_v57 = vsel %vm5473_vm12, 0, %v1604_v58  ;;  %v1796_v11 = vsel %vm4953_vm6, %v1788_v40, %v1795_v6  ;;  %v1579_v47 = vshll.u32 %v1248_v55, 16  ;;  %v1557_v44 = vld [vmem:[#allocation2 + $0x5c] sm:$0x1]  ;;  %v1550_v28 = vld [vmem:[#allocation2 + $0x50] sm:$0x1] }
  0x8c   : > { %1212 = vst [vmem:[#allocation2 + $0x68] sm:$0x1] %v1211_v50  ;;  %v5499_v19 = vrot.slane %v1576_v2, 7  ;;  %v1935_v29 = vshrl.u32 %v1607_v10, 16  ;;  %v1570_v42 = vrot.slane %v1568_v34, 7  ;;  %v1927_v52 = vshrl.u32 %v1606_v57, 16 }
  0x8d   : > { %1485 = vrot.lane.b32.xlu0 %v1438_v37, %s6475_s22  ;;  %1483 = vrot.lane.b32.xlu1 %v1437_v18, %s6475_s22  ;;  %v1797_v17 = vrot.slane %v1792_v13, 4  ;;  %v1571_v14 = vshll.u32 %v1247_v5, 16  ;;  %v1938_v0 = vshll.u32 %v1607_v10, 16  ;;  %v1930_v8 = vshll.u32 %v1606_v57, 16  ;;  %v1539_v5 = vld [vmem:[#allocation2 + $0x3c] sm:$0xf] }
  0x8e   : > { %v1574_v48 = vrot.slane %v1570_v42, 4  ;;  %v1581_v45 = vor.u32 %v1579_v47, %v5499_v19  ;;  %v1937_v33 = vrot.slane %v1935_v29, 7  ;;  %v1929_v63 = vrot.slane %v1927_v52, 7 }
  0x8f   : > { %v1573_v4 = vor.u32 %v1571_v14, %v1570_v42  ;;  %v1583_v38 = vrot.slane %v5499_v19, 4  ;;  %vm2211_vm0 = vcmask 97280   ;;  %vm1985_vm3 = vsmask.f32 3328 }
  0x90   : > { %v1582_v56 = vsel %vm4953_vm6, %v1574_v48, %v1581_v45  ;;  %v1933_v12 = vrot.slane %v1929_v63, 4  ;;  %v1940_v16 = vor.u32 %v1938_v0, %v1937_v33  ;;  %v1932_v25 = vor.u32 %v1930_v8, %v1929_v63 }
  0x91   : > { %1840 = vrot.lane.b32.xlu0 %v1787_v61, %s6474_s6  ;;  %1842 = vrot.lane.b32.xlu1 %v1796_v11, %s6474_s6  ;;  %v1942_v9 = vrot.slane %v1937_v33, 4  ;;  %vm1986_vm1 = vsmask.f32 7440  ;;  %vm6492_vm11 = vcmask 93248  }
  0x92   : > { %v1941_v21 = vsel %vm4953_vm6, %v1933_v12, %v1940_v16 }
  0x95   : > { %1844 = vrot.lane.b32.xlu0 %v1797_v17, %s6474_s6  ;;  %2471 = vrot.lane.b32.xlu1 %v5470_v39, %s4764_s3  ;;  %v1543_v17 = vld [vmem:[#allocation2 + $0x44] sm:$0x1]  ;;  %s726_s3 = sand.u32 1, %s4733_s17   ;;  %s4333_s17 = sshll.u32 (%p4878_p5), %s4745_s20, 2 }
  0x99   : > { %1584 = vrot.lane.b32.xlu0 %v1573_v4, %s6475_s22  ;;  %1586 = vrot.lane.b32.xlu1 %v1582_v56, %s6475_s22 }
  0x9b   : > { %v1476_v23 = vpop.permute.xlu0 %1475  ;;  %v1470_v26 = vpop.permute.xlu1 %1469 }
  0x9c   : > { %v1554_v59 = vsel %vm5514_vm15, %v1476_v23, %v1553_v20  ;;  %v1547_v60 = vsel %vm5514_vm15, %v1470_v26, %v1546_v22 }
  0x9d   : > { %1555 = vst [vmem:[#allocation2 + $0x54] sm:$0xf] %v1554_v59  ;;  %1548 = vst [vmem:[#allocation2 + $0x48] sm:$0xf] %v1547_v60  ;;  %1943 = vrot.lane.b32.xlu0 %v1932_v25, %s6474_s6  ;;  %1945 = vrot.lane.b32.xlu1 %v1941_v21, %s6474_s6 }
  0x9f   : > { %v1480_v36 = vpop.permute.xlu0 %1479  ;;  %v1839_v43 = vpop.permute.xlu1 %1838 }
  0xa0   : > { %v1558_v51 = vsel %vm5527_vm5, %v1480_v36, %v1557_v44  ;;  %v1532_v44 = vld [vmem:[#allocation2 + $0x30] sm:$0xf] }
  0xa1   : > { %1559 = vst [vmem:[#allocation2 + $0x5c] sm:$0x1] %v1558_v51  ;;  %2583 = vrot.lane.b32.xlu0 %v5470_v39, %s4765_s21  ;;  %2911 = vrot.lane.b32.xlu1 %v5470_v39, %s4766_s30  ;;  %s4160_s21 = sshll.u32 %s726_s3, 3 }
  0xa2   : > { %s728_s30 = scalar_lea.vmem [#allocation3], %s4160_s21 }
  0xa3   : > { %v1835_v49 = vpop.permute.xlu0 %1834  ;;  %v1478_v30 = vpop.permute.xlu1 %1477 }
  0xa4   : > { %v1912_v53 = vld [vmem:[#allocation2 + $0x54] sm:$0xf]  ;;  %1556 = vst.msk [vmem:[#allocation2 + $0x58] sm:$0xf] %vm6445_vm14, %v1478_v30  ;;  %v1905_v2 = vld [vmem:[#allocation2 + $0x48] sm:$0xf] }
  0xa5   : > { %v1913_v13 = vsel %vm5540_vm9, %v1835_v49, %v1912_v53  ;;  %1588 = vrot.lane.b32.xlu0 %v1583_v38, %s6475_s22  ;;  %1947 = vrot.lane.b32.xlu1 %v1942_v9, %s6474_s6  ;;  %s4767_s6 = smov 68  }
  0xa6   : > { %1914 = vst [vmem:[#allocation2 + $0x54] sm:$0xf] %v1913_v13 }
  0xa7   : > { %v1474_v50 = vpop.permute.xlu0 %1473  ;;  %v1837_v55 = vpop.permute.xlu1 %1836 }
  0xa8   : > { %v1916_v62 = vld [vmem:[#allocation2 + $0x5c] sm:$0x1]  ;;  %v1551_v37 = vsel %vm5527_vm5, %v1474_v50, %v1550_v28  ;;  %1915 = vst.msk [vmem:[#allocation2 + $0x58] sm:$0xf] %vm6443_vm8, %v1837_v55  ;;  %vm2413_vm8 = vcmask 1046532  }
  0xa9   : > { %v1917_v32 = vsel %vm5550_vm7, %v1839_v43, %v1916_v62  ;;  %1552 = vst [vmem:[#allocation2 + $0x50] sm:$0x1] %v1551_v37  ;;  %3095 = vrot.lane.b32.xlu0 %v5470_v39, %s4767_s6  ;;  %3208 = vrot.lane.b32.xlu1 %v5470_v39, %s4768_s1  ;;  %s3848_s6 = sadd.s32 (%p4878_p5), %s4741_s19, %s4333_s17 }
  0xaa   : > { %1918 = vst [vmem:[#allocation2 + $0x5c] sm:$0x1] %v1917_v32  ;;  %s4334_s22 = sshll.u32 (%p4878_p5), %s3848_s6, 2 }
  0xab   : > { %v1472_v18 = vpop.permute.xlu1 %1471  ;;  %v1464_v40 = vpop.permute.xlu0 %1463  ;;  %s3850_s1 = scalar_lea.vmem (%p4878_p5), %s6431_s11, %s4334_s22 }
  0xac   : > { %1549 = vst.msk [vmem:[#allocation2 + $0x4c] sm:$0xf] %vm6445_vm14, %v1472_v18  ;;  %v1540_v6 = vsel %vm5514_vm15, %v1464_v40, %v1539_v5  ;;  %vm5568_vm14 = vmor %vm2412_vm13, %vm2413_vm8  ;;  %vm6497_vm13 = vcmask 60448   ;;  %vm6498_vm8 = vcmask 93248  }
  0xad   : > { %1541 = vst [vmem:[#allocation2 + $0x3c] sm:$0xf] %v1540_v6  ;;  %v1973_v58 = vld [vmem:[#allocation2 + $0x54] sm:$0xf]  ;;  %3536 = vrot.lane.b32.xlu0 %v5470_v39, %s4769_s13 }
  0xae   : > { %v2157_v10 = vshrl.u32 %v1973_v58, 16  ;;  %v2160_v34 = vshll.u32 %v1973_v58, 16  ;;  %v2395_v19 = vld [vmem:[#allocation2 + $0x54] sm:$0xe] }
  0xaf   : > { %v1831_v61 = vpop.permute.xlu1 %1830  ;;  %v1829_v57 = vpop.permute.xlu0 %1828  ;;  %v1974_v11 = vld [vmem:[#allocation2 + $0x58] sm:$0xf]  ;;  %v4250_v56 = vrot.slane %v2395_v19, 9 }
  0xb0   : > { %1908 = vst.msk [vmem:[#allocation2 + $0x4c] sm:$0xf] %vm6492_vm11, %v1831_v61  ;;  %v1906_v47 = vsel %vm5540_vm9, %v1829_v57, %v1905_v2  ;;  %v2159_v29 = vrot.slane %v2157_v10, 4  ;;  %v2162_v42 = vrot.slane %v2160_v34, 5  ;;  %v2170_v52 = vshrl.u32 %v1974_v11, 16  ;;  %vm5580_vm11 = vmor %vm1985_vm3, %vm1986_vm1  ;;  %v4687_v41 = vld [vmem:[#allocation2 + $0x54] sm:$0xff]  }
  0xb1   : > { %1907 = vst [vmem:[#allocation2 + $0x48] sm:$0xf] %v1906_v47  ;;  %v4241_v14 = vcombine.low %v1973_v58, %v1974_v11  ;;  %v2466_v48 = vrot.slane %v1974_v11, 5  ;;  %v1984_v45 = vld [vmem:[#allocation2 + $0x5c] sm:$0x1]  ;;  %v2166_v33 = vshll.u32 %v1974_v11, 16  ;;  %vm6499_vm3 = vmmov %vm6497_vm13 }
  0xb2   : > { %v2163_v0 = vor.u32 %v2162_v42, %v2159_v29  ;;  %v2172_v63 = vrot.slane %v2170_v52, 4  ;;  %v2469_v4 = vrot.slane %v1984_v45, 5  ;;  %v1909_v16 = vld [vmem:[#allocation2 + $0x50] sm:$0x1]  ;;  %v2176_v21 = vshll.u32 %v1984_v45, 16  ;;  %vm6500_vm1 = vmmov %vm6498_vm8 }
  0xb3   : > { %v1833_v12 = vpop.permute.xlu1 %1832  ;;  %v1468_v20 = vpop.permute.xlu0 %1467  ;;  %v2345_v22 = vsel %vm2211_vm0, %v4241_v14, 0  ;;  %v2168_v25 = vrot.slane %v2166_v33, 5  ;;  %v2468_v23 = vrot.slane %v2466_v48, 4  ;;  %v5586_v51 = vsel %vm5568_vm14, %v4250_v56, %v2466_v48  ;;  %v1536_v33 = vld [vmem:[#allocation2 + $0x38] sm:$0x1] }
  0xb4   : > { %v1910_v26 = vsel %vm5550_vm7, %v1833_v12, %v1909_v16  ;;  %v1544_v59 = vsel %vm5527_vm5, %v1468_v20, %v1543_v17  ;;  %4447 = vmatpush3.bf16.xpose.msra.mxu1 %v2345_v22  ;;  %v2164_v60 = vrot.slane %v2163_v0, 4  ;;  %v2178_v13 = vrot.slane %v2176_v21, 5  ;;  %v1898_v11 = vld [vmem:[#allocation2 + $0x3c] sm:$0xf] }
  0xb5   : > { %1911 = vst [vmem:[#allocation2 + $0x50] sm:$0x1] %v1910_v26  ;;  %1545 = vst [vmem:[#allocation2 + $0x44] sm:$0x1] %v1544_v59  ;;  %4448 = vmatprep.subr.bf16.mxu1 %v6446_v35  ;;  %v2173_v43 = vor.u32 %v2172_v63, %v2168_v25  ;;  %v5590_v38 = vsel %vm5568_vm14, %v2468_v23, %v2469_v4  ;;  %v939_v59 = vld [vmem:[%s5611_s24] sm:$0xf] }
  0xb6   : > { %v4258_v9 = vcombine.low %v5586_v51, %v5590_v38  ;;  %v2169_v55 = vsel %vm5580_vm11, %v2164_v60, %v2168_v25 }
  0xb7   : > { %v1466_v49 = vpop.permute.xlu1 %1465  ;;  %v1458_v30 = vpop.permute.xlu0 %1457  ;;  %v2174_v53 = vrot.slane %v2173_v43, 4  ;;  %v1972_v28 = vld [vmem:[#allocation2 + $0x4c] sm:$0xf]  ;;  %v1525_v43 = vld [vmem:[#allocation2 + $0x24] sm:$0xf] }
  0xb8   : > { %1542 = vst.msk [vmem:[#allocation2 + $0x40] sm:$0xf] %vm6497_vm13, %v1466_v49  ;;  %v1533_v50 = vsel %vm5514_vm15, %v1458_v30, %v1532_v44  ;;  %v1971_v62 = vld [vmem:[#allocation2 + $0x48] sm:$0xf]  ;;  %v2146_v37 = vshrl.u32 %v1972_v28, 16  ;;  %v2142_v32 = vshll.u32 %v1972_v28, 16  ;;  %vm6502_vm13 = vmmov %vm6500_vm1 }
  0xb9   : > { %1534 = vst [vmem:[#allocation2 + $0x30] sm:$0xf] %v1533_v50  ;;  %v2179_v5 = vsel %vm5580_vm11, %v2174_v53, %v2178_v13  ;;  %v2133_v18 = vshrl.u32 %v1971_v62, 16  ;;  %v2136_v40 = vshll.u32 %v1971_v62, 16  ;;  %v4240_v6 = vcombine.low %v1971_v62, %v1972_v28  ;;  %v2394_v58 = vld [vmem:[#allocation2 + $0x48] sm:$0xe] }
  0xba   : > { %v4232_v2 = vcombine.low %v2169_v55, %v2179_v5  ;;  %v2144_v10 = vrot.slane %v2142_v32, 5  ;;  %v2148_v34 = vrot.slane %v2146_v37, 4  ;;  %v2459_v42 = vrot.slane %v1972_v28, 5 }
  0xbb   : > { %v1825_v61 = vpop.permute.xlu1 %1824  ;;  %v1823_v57 = vpop.permute.xlu0 %1822  ;;  %v2135_v19 = vrot.slane %v2133_v18, 4  ;;  %v2138_v47 = vrot.slane %v2136_v40, 5  ;;  %v2342_v29 = vsel %vm2211_vm0, %v4240_v6, 0  ;;  %v4249_v45 = vrot.slane %v2394_v58, 9 }
  0xbc   : > { %1901 = vst.msk [vmem:[#allocation2 + $0x40] sm:$0xf] %vm6498_vm8, %v1825_v61  ;;  %v1899_v52 = vsel %vm5540_vm9, %v1823_v57, %v1898_v11  ;;  %v2237_v17 = vsel %vm2211_vm0, %v4232_v2, 0  ;;  %4449 = vmatpush3.bf16.xpose.msra.mxu1 %v2342_v29  ;;  %v1983_v14 = vld [vmem:[#allocation2 + $0x50] sm:$0x1]  ;;  %v2149_v48 = vor.u32 %v2148_v34, %v2144_v10  ;;  %v2461_v4 = vrot.slane %v2459_v42, 4  ;;  %vm6504_vm8 = vmmov %vm6500_vm1 }
  0xbd   : > { %1900 = vst [vmem:[#allocation2 + $0x3c] sm:$0xf] %v1899_v52  ;;  %4427 = vmatpush3.bf16.xpose.msra.mxu0 %v2237_v17  ;;  %v2139_v0 = vor.u32 %v2138_v47, %v2135_v19  ;;  %v2152_v63 = vshll.u32 %v1983_v14, 16  ;;  %4450 = vmatprep.subr.bf16.mxu1 %v6446_v35  ;;  %v2462_v12 = vrot.slane %v1983_v14, 5  ;;  %v1902_v20 = vld [vmem:[#allocation2 + $0x44] sm:$0x1]  ;;  %v5621_v60 = vsel %vm5568_vm14, %v4249_v45, %v2459_v42 }
  0xbe   : > { %4428 = vmatprep.subr.bf16.mxu0 %v6446_v35  ;;  %v2150_v56 = vrot.slane %v2149_v48, 4  ;;  %v5635_v62 = vsel %vm5473_vm12, 0, %v939_v59  ;;  %v897_v45 = vld [vmem:[#allocation2 + $0x6c] sm:$0x1] }
  0xbf   : > { %v1827_v16 = vpop.permute.xlu1 %1826  ;;  %v1462_v22 = vpop.permute.xlu0 %1461  ;;  %v2140_v25 = vrot.slane %v2139_v0, 4  ;;  %v2154_v21 = vrot.slane %v2152_v63, 5  ;;  %v5625_v44 = vsel %vm5568_vm14, %v2461_v4, %v2462_v12  ;;  %v1214_v19 = vshrl.u32 %v5635_v62, 16 }
  0xc0   : > { %v1903_v23 = vsel %vm5550_vm7, %v1827_v16, %v1902_v20  ;;  %v1537_v26 = vsel %vm5527_vm5, %v1462_v22, %v1536_v33  ;;  %v4257_v53 = vcombine.low %v5621_v60, %v5625_v44  ;;  %v1891_v6 = vld [vmem:[#allocation2 + $0x30] sm:$0xf]  ;;  %v898_v4 = vsel %vm4899_vm2, 0, %v897_v45  ;;  %vm6501_vm2 = vmmov %vm6499_vm3 }
  0xc1   : > { %1904 = vst [vmem:[#allocation2 + $0x44] sm:$0x1] %v1903_v23  ;;  %1538 = vst [vmem:[#allocation2 + $0x38] sm:$0x1] %v1537_v26  ;;  %v2145_v49 = vsel %vm5580_vm11, %v2140_v25, %v2144_v10  ;;  %v2155_v30 = vsel %vm5580_vm11, %v2150_v56, %v2154_v21  ;;  %v1529_v56 = vld [vmem:[#allocation2 + $0x2c] sm:$0x1] }
  0xc2   : > { %v4231_v13 = vcombine.low %v2145_v49, %v2155_v30  ;;  %899 = vst [vmem:[#allocation2 + $0x6c] sm:$0x1] %v898_v4  ;;  %v5650_v25 = vrot.slane %v1214_v19, 7  ;;  %v1217_v21 = vshll.u32 %v5635_v62, 16  ;;  %v2519_v46 = vsel %vm2211_vm0, %v4257_v53, 0 }
  0xc3   : > { %v1460_v28 = vpop.permute.xlu1 %1459  ;;  %v1452_v50 = vpop.permute.xlu0 %1451  ;;  %v1970_v55 = vld [vmem:[#allocation2 + $0x40] sm:$0xf] }
  0xc4   : > { %1535 = vst.msk [vmem:[#allocation2 + $0x34] sm:$0xf] %vm6499_vm3, %v1460_v28  ;;  %v1526_v37 = vsel %vm5514_vm15, %v1452_v50, %v1525_v43  ;;  %v2234_v32 = vsel %vm2211_vm0, %v4231_v13, 0  ;;  %v1969_v5 = vld [vmem:[#allocation2 + $0x3c] sm:$0xf]  ;;  %v2122_v18 = vshrl.u32 %v1970_v55, 16  ;;  %vm6505_vm3 = vmmov %vm6501_vm2 }
  0xc5   : > { %v2118_v40 = vshll.u32 %v1970_v55, 16  ;;  %1527 = vst [vmem:[#allocation2 + $0x24] sm:$0xf] %v1526_v37  ;;  %4429 = vmatpush3.bf16.xpose.msra.mxu0 %v2234_v32  ;;  %v2109_v58 = vshrl.u32 %v1969_v5, 16  ;;  %v2112_v2 = vshll.u32 %v1969_v5, 16  ;;  %v4239_v10 = vcombine.low %v1969_v5, %v1970_v55 }
  0xc6   : > { %v2393_v34 = vld [vmem:[#allocation2 + $0x3c] sm:$0xe]  ;;  %v2452_v61 = vrot.slane %v1970_v55, 5  ;;  %4430 = vmatprep.subr.bf16.mxu0 %v6446_v35  ;;  %v2124_v11 = vrot.slane %v2122_v18, 4  ;;  %v1518_v55 = vld [vmem:[#allocation2 + $0x18] sm:$0xf] }
  0xc7   : > { %v2120_v57 = vrot.slane %v2118_v40, 5  ;;  %v4248_v47 = vrot.slane %v2393_v34, 9  ;;  %v1819_v29 = vpop.permute.xlu1 %1818  ;;  %v1817_v42 = vpop.permute.xlu0 %1816  ;;  %v2111_v52 = vrot.slane %v2109_v58, 4  ;;  %v2114_v17 = vrot.slane %v2112_v2, 5 }
  0xc8   : > { %v2339_v14 = vsel %vm2211_vm0, %v4239_v10, 0  ;;  %v2454_v48 = vrot.slane %v2452_v61, 4  ;;  %1894 = vst.msk [vmem:[#allocation2 + $0x34] sm:$0xf] %vm6500_vm1, %v1819_v29  ;;  %v1892_v33 = vsel %vm5540_vm9, %v1817_v42, %v1891_v6  ;;  %v1982_v0 = vld [vmem:[#allocation2 + $0x44] sm:$0x1]  ;;  %v1219_v6 = vor.u32 %v1217_v21, %v5650_v25 }
  0xc9   : > { %4451 = vmatpush3.bf16.xpose.msra.mxu1 %v2339_v14  ;;  %v2125_v63 = vor.u32 %v2124_v11, %v2120_v57  ;;  %1893 = vst [vmem:[#allocation2 + $0x30] sm:$0xf] %v1892_v33  ;;  %v2115_v12 = vor.u32 %v2114_v17, %v2111_v52  ;;  %v2128_v16 = vshll.u32 %v1982_v0, 16  ;;  %v2455_v20 = vrot.slane %v1982_v0, 5  ;;  %v1895_v26 = vld [vmem:[#allocation2 + $0x38] sm:$0x1] }
  0xca   : > { %4452 = vmatprep.subr.bf16.mxu1 %v6446_v35  ;;  %v5655_v1 = vsel %vm5568_vm14, %v4248_v47, %v2452_v61  ;;  %v1522_v21 = vld [vmem:[#allocation2 + $0x20] sm:$0x1] }
  0xcb   : > { %v2126_v22 = vrot.slane %v2125_v63, 4  ;;  %v1821_v23 = vpop.permute.xlu1 %1820  ;;  %v1456_v59 = vpop.permute.xlu0 %1455  ;;  %v2116_v43 = vrot.slane %v2115_v12, 4  ;;  %v2130_v49 = vrot.slane %v2128_v16, 5  ;;  %v5659_v30 = vsel %vm5568_vm14, %v2454_v48, %v2455_v20 }
  0xcc   : > { %v1896_v13 = vsel %vm5550_vm7, %v1821_v23, %v1895_v26  ;;  %v1530_v28 = vsel %vm5527_vm5, %v1456_v59, %v1529_v56  ;;  %v4256_v50 = vcombine.low %v5655_v1, %v5659_v30  ;;  %v1234_v56 = vld [vmem:[#allocation2 + $0x6c] sm:$0xf]  ;;  %v2713_v30 = vld [vmem:[#allocation2 + $0x54] sm:$0xf] }
  0xcd   : > { %1897 = vst [vmem:[#allocation2 + $0x38] sm:$0x1] %v1896_v13  ;;  %1531 = vst [vmem:[#allocation2 + $0x2c] sm:$0x1] %v1530_v28  ;;  %v2121_v62 = vsel %vm5580_vm11, %v2116_v43, %v2120_v57  ;;  %v2131_v37 = vsel %vm5580_vm11, %v2126_v22, %v2130_v49  ;;  %v1884_v57 = vld [vmem:[#allocation2 + $0x24] sm:$0xf]  ;;  %v1235_v22 = vsel %vm5197_vm10, %v1219_v6, %v1234_v56 }
  0xce   : > { %v4230_v32 = vcombine.low %v2121_v62, %v2131_v37  ;;  %1236 = vst [vmem:[#allocation2 + $0x6c] sm:$0xf] %v1235_v22  ;;  %vm6503_vm10 = vmmov %vm6501_vm2  ;;  %v2516_v53 = vsel %vm2211_vm0, %v4256_v50, 0 }
  0xcf   : > { %v1454_v5 = vpop.permute.xlu1 %1453  ;;  %v1446_v18 = vpop.permute.xlu0 %1445  ;;  %v1968_v40 = vld [vmem:[#allocation2 + $0x34] sm:$0xf] }
  0xd0   : > { %1528 = vst.msk [vmem:[#allocation2 + $0x28] sm:$0xf] %vm6501_vm2, %v1454_v5  ;;  %v1519_v58 = vsel %vm5514_vm15, %v1446_v18, %v1518_v55  ;;  %v2231_v2 = vsel %vm2211_vm0, %v4230_v32, 0  ;;  %v1967_v10 = vld [vmem:[#allocation2 + $0x30] sm:$0xf]  ;;  %v2098_v34 = vshrl.u32 %v1968_v40, 16 }
  0xd1   : > { %v2094_v61 = vshll.u32 %v1968_v40, 16  ;;  %1520 = vst [vmem:[#allocation2 + $0x18] sm:$0xf] %v1519_v58  ;;  %4431 = vmatpush3.bf16.xpose.msra.mxu0 %v2231_v2  ;;  %v2085_v11 = vshrl.u32 %v1967_v10, 16  ;;  %v2088_v19 = vshll.u32 %v1967_v10, 16  ;;  %v4238_v47 = vcombine.low %v1967_v10, %v1968_v40 }
  0xd2   : > { %v2392_v29 = vld [vmem:[#allocation2 + $0x30] sm:$0xe]  ;;  %v2445_v42 = vrot.slane %v1968_v40, 5  ;;  %4432 = vmatprep.subr.bf16.mxu0 %v6446_v35  ;;  %v2100_v17 = vrot.slane %v2098_v34, 4  ;;  %v1511_v40 = vld [vmem:[#allocation2 + $0xc] sm:$0xf] }
  0xd3   : > { %v2096_v52 = vrot.slane %v2094_v61, 5  ;;  %v4247_v14 = vrot.slane %v2392_v29, 9  ;;  %v1813_v48 = vpop.permute.xlu1 %1812  ;;  %v1811_v45 = vpop.permute.xlu0 %1810  ;;  %v2087_v33 = vrot.slane %v2085_v11, 4  ;;  %v2090_v0 = vrot.slane %v2088_v19, 5 }
  0xd4   : > { %v2336_v63 = vsel %vm2211_vm0, %v4238_v47, 0  ;;  %v2447_v4 = vrot.slane %v2445_v42, 4  ;;  %1887 = vst.msk [vmem:[#allocation2 + $0x28] sm:$0xf] %vm6502_vm13, %v1813_v48  ;;  %v1885_v12 = vsel %vm5540_vm9, %v1811_v45, %v1884_v57  ;;  %v1981_v16 = vld [vmem:[#allocation2 + $0x38] sm:$0x1]  ;;  %vm6506_vm13 = vmmov %vm6500_vm1 }
  0xd5   : > { %4453 = vmatpush3.bf16.xpose.msra.mxu1 %v2336_v63  ;;  %v2101_v20 = vor.u32 %v2100_v17, %v2096_v52  ;;  %1886 = vst [vmem:[#allocation2 + $0x24] sm:$0xf] %v1885_v12  ;;  %v2091_v23 = vor.u32 %v2090_v0, %v2087_v33  ;;  %v2104_v26 = vshll.u32 %v1981_v16, 16  ;;  %v2448_v59 = vrot.slane %v1981_v16, 5  ;;  %v1888_v13 = vld [vmem:[#allocation2 + $0x2c] sm:$0x1] }
  0xd6   : > { %4454 = vmatprep.subr.bf16.mxu1 %v6446_v35  ;;  %v5686_v37 = vsel %vm5568_vm14, %v4247_v14, %v2445_v42 }
  0xd7   : > { %v2102_v43 = vrot.slane %v2101_v20, 4  ;;  %v1815_v49 = vpop.permute.xlu1 %1814  ;;  %v1450_v28 = vpop.permute.xlu0 %1449  ;;  %v2092_v55 = vrot.slane %v2091_v23, 4  ;;  %v2106_v62 = vrot.slane %v2104_v26, 5  ;;  %v5690_v31 = vsel %vm5568_vm14, %v2447_v4, %v2448_v59  ;;  %v1515_v59 = vld [vmem:[#allocation2 + $0x14] sm:$0x1] }
  0xd8   : > { %v1889_v32 = vsel %vm5550_vm7, %v1815_v49, %v1888_v13  ;;  %v1523_v5 = vsel %vm5527_vm5, %v1450_v28, %v1522_v21  ;;  %v4255_v18 = vcombine.low %v5686_v37, %v5690_v31  ;;  %v1877_v56 = vld [vmem:[#allocation2 + $0x18] sm:$0xf] }
  0xd9   : > { %1890 = vst [vmem:[#allocation2 + $0x2c] sm:$0x1] %v1889_v32  ;;  %1524 = vst [vmem:[#allocation2 + $0x20] sm:$0x1] %v1523_v5  ;;  %v2097_v6 = vsel %vm5580_vm11, %v2092_v55, %v2096_v52  ;;  %v2107_v58 = vsel %vm5580_vm11, %v2102_v43, %v2106_v62 }
  0xda   : > { %v4229_v2 = vcombine.low %v2097_v6, %v2107_v58 }
  0xdb   : > { %v1448_v10 = vpop.permute.xlu1 %1447  ;;  %v1440_v34 = vpop.permute.xlu0 %1439  ;;  %v1966_v61 = vld [vmem:[#allocation2 + $0x28] sm:$0xf] }
  0xdc   : > { %1521 = vst.msk [vmem:[#allocation2 + $0x1c] sm:$0xf] %vm6503_vm10, %v1448_v10  ;;  %v1512_v57 = vsel %vm5514_vm15, %v1440_v34, %v1511_v40  ;;  %v2228_v11 = vsel %vm2211_vm0, %v4229_v2, 0  ;;  %v1965_v19 = vld [vmem:[#allocation2 + $0x24] sm:$0xf]  ;;  %v2074_v47 = vshrl.u32 %v1966_v61, 16  ;;  %vm6507_vm10 = vmmov %vm6501_vm2 }
  0xdd   : > { %v2070_v29 = vshll.u32 %v1966_v61, 16  ;;  %1513 = vst [vmem:[#allocation2 + $0xc] sm:$0xf] %v1512_v57  ;;  %4433 = vmatpush3.bf16.xpose.msra.mxu0 %v2228_v11  ;;  %v2061_v42 = vshrl.u32 %v1965_v19, 16  ;;  %v2064_v52 = vshll.u32 %v1965_v19, 16  ;;  %v4237_v17 = vcombine.low %v1965_v19, %v1966_v61  ;;  %v4691_v31 = vld [vmem:[#allocation2 + $0x24] sm:$0xff]  }
  0xde   : > { %v2391_v14 = vld [vmem:[#allocation2 + $0x24] sm:$0xe]  ;;  %v2438_v48 = vrot.slane %v1966_v61, 5  ;;  %4434 = vmatprep.subr.bf16.mxu0 %v6446_v35  ;;  %v2076_v33 = vrot.slane %v2074_v47, 4  ;;  %v1277_v34 = vld [vmem:[#allocation2] sm:$0xf] }
  0xdf   : > { %v2072_v45 = vrot.slane %v2070_v29, 5  ;;  %v4246_v0 = vrot.slane %v2391_v14, 9  ;;  %v1807_v63 = vpop.permute.xlu1 %1806  ;;  %v1805_v4 = vpop.permute.xlu0 %1804  ;;  %v2063_v12 = vrot.slane %v2061_v42, 4  ;;  %v2066_v16 = vrot.slane %v2064_v52, 5 }
  0xe0   : > { %v2333_v20 = vsel %vm2211_vm0, %v4237_v17, 0  ;;  %v2440_v22 = vrot.slane %v2438_v48, 4  ;;  %1880 = vst.msk [vmem:[#allocation2 + $0x1c] sm:$0xf] %vm6504_vm8, %v1807_v63  ;;  %v1878_v21 = vsel %vm5540_vm9, %v1805_v4, %v1877_v56  ;;  %v1980_v23 = vld [vmem:[#allocation2 + $0x2c] sm:$0x1]  ;;  %vm6508_vm8 = vmmov %vm6500_vm1 }
  0xe1   : > { %4455 = vmatpush3.bf16.xpose.msra.mxu1 %v2333_v20  ;;  %v2077_v26 = vor.u32 %v2076_v33, %v2072_v45  ;;  %1879 = vst [vmem:[#allocation2 + $0x18] sm:$0xf] %v1878_v21  ;;  %v2067_v43 = vor.u32 %v2066_v16, %v2063_v12  ;;  %v2080_v49 = vshll.u32 %v1980_v23, 16  ;;  %v2441_v13 = vrot.slane %v1980_v23, 5  ;;  %v1881_v62 = vld [vmem:[#allocation2 + $0x20] sm:$0x1] }
  0xe2   : > { %4456 = vmatprep.subr.bf16.mxu1 %v6446_v35  ;;  %v5716_v6 = vsel %vm5568_vm14, %v4246_v0, %v2438_v48 }
  0xe3   : > { %v2078_v28 = vrot.slane %v2077_v26, 4  ;;  %v1809_v55 = vpop.permute.xlu1 %1808  ;;  %v1444_v32 = vpop.permute.xlu0 %1443  ;;  %v2068_v5 = vrot.slane %v2067_v43, 4  ;;  %v2082_v40 = vrot.slane %v2080_v49, 5  ;;  %v5720_v58 = vsel %vm5568_vm14, %v2440_v22, %v2441_v13 }
  0xe4   : > { %v1882_v2 = vsel %vm5550_vm7, %v1809_v55, %v1881_v62  ;;  %v1516_v39 = vsel %vm5527_vm5, %v1444_v32, %v1515_v59  ;;  %v4254_v10 = vcombine.low %v5716_v6, %v5720_v58  ;;  %v1870_v21 = vld [vmem:[#allocation2 + $0xc] sm:$0xf]  ;;  %v1284_v55 = vld [vmem:[#allocation2 + $0x8] sm:$0x1] }
  0xe5   : > { %1883 = vst [vmem:[#allocation2 + $0x20] sm:$0x1] %v1882_v2  ;;  %1517 = vst [vmem:[#allocation2 + $0x14] sm:$0x1] %v1516_v39  ;;  %v2073_v61 = vsel %vm5580_vm11, %v2068_v5, %v2072_v45  ;;  %v2083_v57 = vsel %vm5580_vm11, %v2078_v28, %v2082_v40 }
  0xe6   : > { %v4228_v11 = vcombine.low %v2073_v61, %v2083_v57  ;;  %v2510_v15 = vsel %vm2211_vm0, %v4254_v10, 0 }
  0xe7   : > { %v1442_v19 = vpop.permute.xlu1 %1441  ;;  %v1267_v47 = vpop.permute.xlu0 %1266  ;;  %v1964_v29 = vld [vmem:[#allocation2 + $0x1c] sm:$0xf] }
  0xe8   : > { %1514 = vst.msk [vmem:[#allocation2 + $0x10] sm:$0xf] %vm6505_vm3, %v1442_v19  ;;  %v1278_v42 = vsel %vm5514_vm15, %v1267_v47, %v1277_v34  ;;  %v2225_v52 = vsel %vm2211_vm0, %v4228_v11, 0  ;;  %v1963_v17 = vld [vmem:[#allocation2 + $0x18] sm:$0xf]  ;;  %v2050_v14 = vshrl.u32 %v1964_v29, 16 }
  0xe9   : > { %v2046_v48 = vshll.u32 %v1964_v29, 16  ;;  %1279 = vst [vmem:[#allocation2] sm:$0xf] %v1278_v42  ;;  %4435 = vmatpush3.bf16.xpose.msra.mxu0 %v2225_v52  ;;  %v2037_v45 = vshrl.u32 %v1963_v17, 16  ;;  %v2040_v33 = vshll.u32 %v1963_v17, 16  ;;  %v4236_v0 = vcombine.low %v1963_v17, %v1964_v29 }
  0xea   : > { %v2390_v63 = vld [vmem:[#allocation2 + $0x18] sm:$0xe]  ;;  %v2431_v4 = vrot.slane %v1964_v29, 5  ;;  %4436 = vmatprep.subr.bf16.mxu0 %v6446_v35  ;;  %v2052_v12 = vrot.slane %v2050_v14, 4  ;;  %vm6510_vm3 = vcmask 27648  }
  0xeb   : > { %v2048_v56 = vrot.slane %v2046_v48, 5  ;;  %v4245_v16 = vrot.slane %v2390_v63, 9  ;;  %v1801_v20 = vpop.permute.xlu1 %1800  ;;  %v1799_v22 = vpop.permute.xlu0 %1798  ;;  %v2039_v23 = vrot.slane %v2037_v45, 4  ;;  %v2042_v26 = vrot.slane %v2040_v33, 5 }
  0xec   : > { %v2330_v59 = vsel %vm2211_vm0, %v4236_v0, 0  ;;  %v2433_v43 = vrot.slane %v2431_v4, 4  ;;  %1873 = vst.msk [vmem:[#allocation2 + $0x10] sm:$0xf] %vm6500_vm1, %v1801_v20  ;;  %v1871_v49 = vsel %vm5540_vm9, %v1799_v22, %v1870_v21  ;;  %v1979_v13 = vld [vmem:[#allocation2 + $0x20] sm:$0x1]  ;;  %vm6511_vm1 = vmmov %vm6501_vm2 }
  0xed   : > { %4457 = vmatpush3.bf16.xpose.msra.mxu1 %v2330_v59  ;;  %v2053_v28 = vor.u32 %v2052_v12, %v2048_v56  ;;  %1872 = vst [vmem:[#allocation2 + $0xc] sm:$0xf] %v1871_v49  ;;  %v2043_v62 = vor.u32 %v2042_v26, %v2039_v23  ;;  %v2056_v32 = vshll.u32 %v1979_v13, 16  ;;  %v2434_v5 = vrot.slane %v1979_v13, 5  ;;  %v1874_v39 = vld [vmem:[#allocation2 + $0x14] sm:$0x1] }
  0xee   : > { %4458 = vmatprep.subr.bf16.mxu1 %v6446_v35  ;;  %v5744_v11 = vsel %vm5568_vm14, %v4245_v16, %v2431_v4 }
  0xef   : > { %v2054_v40 = vrot.slane %v2053_v28, 4  ;;  %v1803_v2 = vpop.permute.xlu1 %1802  ;;  %v1271_v34 = vpop.permute.xlu0 %1270  ;;  %v2044_v61 = vrot.slane %v2043_v62, 4  ;;  %v2058_v57 = vrot.slane %v2056_v32, 5  ;;  %v5748_v19 = vsel %vm5568_vm14, %v2433_v43, %v2434_v5 }
  0xf0   : > { %v1875_v47 = vsel %vm5550_vm7, %v1803_v2, %v1874_v39  ;;  %v1285_v29 = vsel %vm5527_vm5, %v1271_v34, %v1284_v55  ;;  %v4253_v42 = vcombine.low %v5744_v11, %v5748_v19  ;;  %v1636_v45 = vld [vmem:[#allocation2] sm:$0xf] }
  0xf1   : > { %1876 = vst [vmem:[#allocation2 + $0x14] sm:$0x1] %v1875_v47  ;;  %1286 = vst [vmem:[#allocation2 + $0x8] sm:$0x1] %v1285_v29  ;;  %v2049_v52 = vsel %vm5580_vm11, %v2044_v61, %v2048_v56  ;;  %v2059_v17 = vsel %vm5580_vm11, %v2054_v40, %v2058_v57  ;;  %v1560_v61 = vld [vmem:[#allocation2 + $0x60] sm:$0xf] }
  0xf2   : > { %v4227_v14 = vcombine.low %v2049_v52, %v2059_v17 }
  0xf3   : > { %v1626_v48 = vpop.permute.xlu1 %1625  ;;  %v1269_v33 = vpop.permute.xlu0 %1268  ;;  %v1962_v0 = vld [vmem:[#allocation2 + $0x10] sm:$0xf] }
  0xf4   : > { %v1637_v63 = vsel %vm5540_vm9, %v1626_v48, %v1636_v45  ;;  %1281 = vst.msk [vmem:[#allocation2 + $0x4] sm:$0xf] %vm6501_vm2, %v1269_v33  ;;  %v2222_v4 = vsel %vm2211_vm0, %v4227_v14, 0  ;;  %v1961_v12 = vld [vmem:[#allocation2 + $0xc] sm:$0xf]  ;;  %v2026_v16 = vshrl.u32 %v1962_v0, 16  ;;  %vm6512_vm2 = vmmov %vm6508_vm8 }
  0xf5   : > { %v2022_v20 = vshll.u32 %v1962_v0, 16  ;;  %1638 = vst [vmem:[#allocation2] sm:$0xf] %v1637_v63  ;;  %4437 = vmatpush3.bf16.xpose.msra.mxu0 %v2222_v4  ;;  %v2013_v56 = vshrl.u32 %v1961_v12, 16  ;;  %v2016_v22 = vshll.u32 %v1961_v12, 16  ;;  %v4235_v21 = vcombine.low %v1961_v12, %v1962_v0 }
  0xf6   : > { %v2389_v23 = vld [vmem:[#allocation2 + $0xc] sm:$0xe]  ;;  %v2424_v26 = vrot.slane %v1962_v0, 5  ;;  %4438 = vmatprep.subr.bf16.mxu0 %v6446_v35  ;;  %v2028_v43 = vrot.slane %v2026_v16, 4  ;;  %v1564_v16 = vld [vmem:[#allocation2 + $0x68] sm:$0x1] }
  0xf7   : > { %v2024_v59 = vrot.slane %v2022_v20, 5  ;;  %v4244_v49 = vrot.slane %v2389_v23, 9  ;;  %v1630_v13 = vpop.permute.xlu1 %1629  ;;  %v1628_v28 = vpop.permute.xlu0 %1627  ;;  %v2015_v55 = vrot.slane %v2013_v56, 4  ;;  %v2018_v62 = vrot.slane %v2016_v22, 5 }
  0xf8   : > { %v2327_v32 = vsel %vm2211_vm0, %v4235_v21, 0  ;;  %v2426_v5 = vrot.slane %v2424_v26, 4  ;;  %v1643_v40 = vld [vmem:[#allocation2 + $0x8] sm:$0x1]  ;;  %1640 = vst.msk [vmem:[#allocation2 + $0x4] sm:$0xf] %vm6506_vm13, %v1628_v28 }
  0xf9   : > { %4459 = vmatpush3.bf16.xpose.msra.mxu1 %v2327_v32  ;;  %v1978_v2 = vld [vmem:[#allocation2 + $0x14] sm:$0x1]  ;;  %v2029_v39 = vor.u32 %v2028_v43, %v2024_v59  ;;  %v1644_v34 = vsel %vm5550_vm7, %v1630_v13, %v1643_v40  ;;  %v2019_v57 = vor.u32 %v2018_v62, %v2015_v55  ;;  %v5774_v33 = vsel %vm5568_vm14, %v4244_v49, %v2424_v26 }
  0xfa   : > { %v2032_v47 = vshll.u32 %v1978_v2, 16  ;;  %4460 = vmatprep.subr.bf16.mxu1 %v6446_v35  ;;  %v2427_v29 = vrot.slane %v1978_v2, 5  ;;  %1645 = vst [vmem:[#allocation2 + $0x8] sm:$0x1] %v1644_v34 }
  0xfb   : > { %v2030_v52 = vrot.slane %v2029_v39, 4  ;;  %v1482_v17 = vpop.permute.xlu1 %1481  ;;  %v5770_v14 = vpop.permute.xlu0 %2185  ;;  %v2020_v48 = vrot.slane %v2019_v57, 4 }
  0xfc   : > { %v2034_v45 = vrot.slane %v2032_v47, 5  ;;  %v5778_v0 = vsel %vm5568_vm14, %v2426_v5, %v2427_v29  ;;  %v1561_v63 = vsel %vm5514_vm15, %v1482_v17, %v1560_v61  ;;  %v1959_v4 = vld [vmem:[#allocation2] sm:$0xf]  ;;  %v940_v61 = vld [vmem:[%s5611_s24 + $0x4] sm:$0xf] }
  0xfd   : > { %v4252_v12 = vcombine.low %v5774_v33, %v5778_v0  ;;  %1562 = vst [vmem:[#allocation2 + $0x60] sm:$0xf] %v1561_v63  ;;  %v2025_v20 = vsel %vm5580_vm11, %v2020_v48, %v2024_v59  ;;  %v1989_v22 = vshrl.u32 %v1959_v4, 16  ;;  %v1992_v21 = vshll.u32 %v1959_v4, 16  ;;  %v2388_v5 = vld [vmem:[#allocation2] sm:$0xe] }
  0xfe   : > { %v2035_v56 = vsel %vm5580_vm11, %v2030_v52, %v2034_v45  ;;  %v4243_v63 = vrot.slane %v2388_v5, 9  ;;  %v3011_v0 = vld [vmem:[#allocation2 + $0x3c] sm:$0xe] }
  0xff   : > { %v4226_v23 = vcombine.low %v2025_v20, %v2035_v56  ;;  %v1486_v26 = vpop.permute.xlu0 %1485  ;;  %v1484_v43 = vpop.permute.xlu1 %1483  ;;  %v1960_v49 = vld [vmem:[#allocation2 + $0x4] sm:$0xf]  ;;  %v1991_v13 = vrot.slane %v1989_v22, 4  ;;  %v1994_v28 = vrot.slane %v1992_v21, 5  ;;  %v945_v56 = vsel %vm5473_vm12, 0, %v940_v61 }
 0x100   : > { %v1565_v55 = vsel %vm5527_vm5, %v1486_v26, %v1564_v16  ;;  %1563 = vst.msk [vmem:[#allocation2 + $0x64] sm:$0xf] %vm6507_vm10, %v1484_v43  ;;  %v2002_v59 = vshrl.u32 %v1960_v49, 16  ;;  %v4234_v32 = vcombine.low %v1959_v4, %v1960_v49  ;;  %v1998_v39 = vshll.u32 %v1960_v49, 16 }
 0x101   : > { %v2219_v62 = vsel %vm2211_vm0, %v4226_v23, 0  ;;  %1566 = vst [vmem:[#allocation2 + $0x68] sm:$0x1] %v1565_v55  ;;  %v1977_v40 = vld [vmem:[#allocation2 + $0x8] sm:$0x1]  ;;  %v1995_v2 = vor.u32 %v1994_v28, %v1991_v13  ;;  %v2417_v34 = vrot.slane %v1960_v49, 5 }
 0x102   : > { %4439 = vmatpush3.bf16.xpose.msra.mxu0 %v2219_v62  ;;  %v2324_v57 = vsel %vm2211_vm0, %v4234_v32, 0  ;;  %v2004_v47 = vrot.slane %v2002_v59, 4  ;;  %v2420_v29 = vrot.slane %v1977_v40, 5  ;;  %v2000_v48 = vrot.slane %v1998_v39, 5  ;;  %v1593_v39 = vld [vmem:[#allocation2 + $0x6c] sm:$0xf] }
 0x103   : > { %4440 = vmatprep.subr.bf16.mxu0 %v6446_v35  ;;  %4461 = vmatpush3.bf16.xpose.msra.mxu1 %v2324_v57  ;;  %v1841_v52 = vpop.permute.xlu0 %1840  ;;  %v1843_v17 = vpop.permute.xlu1 %1842  ;;  %v2008_v45 = vshll.u32 %v1977_v40, 16  ;;  %v2419_v4 = vrot.slane %v2417_v34, 4  ;;  %v1996_v20 = vrot.slane %v1995_v2, 4  ;;  %v5803_v23 = vsel %vm5568_vm14, %v4243_v63, %v2417_v34  ;;  %v4702_v57 = vld [vmem:[%s6429_s9] sm:$0x3f]  }
 0x104   : > { %v1919_v16 = vld [vmem:[#allocation2 + $0x60] sm:$0xf]  ;;  %1922 = vst.msk [vmem:[#allocation2 + $0x64] sm:$0xf] %vm6508_vm8, %v1843_v17  ;;  %4486 = vmatprep.subr.bf16.mxu1 %v6446_v35  ;;  %v2005_v21 = vor.u32 %v2004_v47, %v2000_v48  ;;  %v1222_v49 = vshrl.u32 %v945_v56, 16  ;;  %v1225_v62 = vshll.u32 %v945_v56, 16  ;;  %3720 = vrot.lane.b32.xlu1 %v4702_v57, %s4770_s15 }
 0x105   : > { %v1920_v22 = vsel %vm5540_vm9, %v1841_v52, %v1919_v16  ;;  %v5807_v26 = vsel %vm5568_vm14, %v2419_v4, %v2420_v29  ;;  %v2010_v7 = vrot.slane %v2008_v45, 5  ;;  %v2001_v5 = vsel %vm5580_vm11, %v1996_v20, %v2000_v48  ;;  %v929_v63 = vld [vmem:[#allocation2 + $0x74] sm:$0x1] }
 0x106   : > { %1921 = vst [vmem:[#allocation2 + $0x60] sm:$0xf] %v1920_v22  ;;  %v4251_v43 = vcombine.low %v5803_v23, %v5807_v26  ;;  %v2006_v13 = vrot.slane %v2005_v21, 4  ;;  %v1224_v32 = vrot.slane %v1222_v49, 7  ;;  %v1220_v34 = vrot.slane %v5650_v25, 4 }
 0x107   : > { %v1845_v28 = vpop.permute.xlu0 %1844  ;;  %v5811_v55 = vpop.permute.xlu1 %2471  ;;  %vm6509_vm12 = vmmov 0   ;;  %v930_v24 = vsel %vm4908_vm4, 0, %v929_v63  ;;  %v2522_v20 = vsel %vm2211_vm0, %v4258_v9, 0  ;;  %vm6513_vm4 = vnez %v6481_v54  ;;  %v4688_v9 = vld [vmem:[#allocation2 + $0x48] sm:$0xff]  }
 0x108   : > { %v1923_v59 = vld [vmem:[#allocation2 + $0x68] sm:$0x1]  ;;  %v2011_v40 = vsel %vm5580_vm11, %v2006_v13, %v2010_v7  ;;  %v1227_v47 = vor.u32 %v1225_v62, %v1224_v32  ;;  %931 = vst [vmem:[#allocation2 + $0x74] sm:$0x1] %v930_v24  ;;  %v1229_v3 = vrot.slane %v1224_v32, 4  ;;  %v2644_v13 = vsel %vm2211_vm0, %v4688_v9, 0 }
 0x109   : > { %v1924_v2 = vsel %vm5550_vm7, %v1845_v28, %v1923_v59  ;;  %v4225_v61 = vcombine.low %v2001_v5, %v2011_v40  ;;  %v4689_v28 = vld [vmem:[#allocation2 + $0x3c] sm:$0xff]   ;;  %v4690_v32 = vld [vmem:[#allocation2 + $0x30] sm:$0xff]   ;;  %v2513_v5 = vsel %vm2211_vm0, %v4255_v18, 0  ;;  %v2714_v40 = vld [vmem:[#allocation2 + $0x58] sm:$0xf] }
 0x10a   : > { %4463 = vmatmul.mubr.msk.bf16.vlgmr.msra.gmra.mxu1 %vm2211_vm0, %v4702_v57  ;;  %1925 = vst [vmem:[#allocation2 + $0x68] sm:$0x1] %v1924_v2  ;;  %v1228_v45 = vsel %vm4953_vm6, %v1220_v34, %v1227_v47  ;;  %v2641_v62 = vsel %vm2211_vm0, %v4689_v28, 0  ;;  %v2638_v50 = vsel %vm2211_vm0, %v4690_v32, 0  ;;  %v2864_v2 = vshrl.u32 %v2713_v30, 16 }
 0x10b   : > { %v1585_v29 = vpop.permute.xlu0 %1584  ;;  %4502 = vmatprep.mubr.msk.bf16.mxu1 %vm6509_vm12, %v6446_v35  ;;  %v1587_v52 = vpop.permute.xlu1 %1586  ;;  %v2216_v17 = vsel %vm2211_vm0, %v4225_v61, 0  ;;  %1237 = vst.msk [vmem:[#allocation2 + $0x70] sm:$0xf] %vm6510_vm3, %v1228_v45  ;;  %v2873_v34 = vshll.u32 %v2714_v40, 16  ;;  %v2877_v37 = vshrl.u32 %v2714_v40, 16  ;;  %v3083_v61 = vrot.slane %v2714_v40, 5 }
 0x10c   : > { %v1594_v48 = vsel %vm5514_vm15, %v1585_v29, %v1593_v39  ;;  %4441 = vmatpush3.bf16.xpose.msra.mxu0 %v2216_v17  ;;  %1596 = vst.msk [vmem:[#allocation2 + $0x70] sm:$0xf] %vm6511_vm1, %v1587_v52  ;;  %v2867_v39 = vshll.u32 %v2713_v30, 16  ;;  %v3013_v18 = vld [vmem:[#allocation2 + $0x54] sm:$0xe]  ;;  %v2866_v57 = vrot.slane %v2864_v2, 4 }
 0x10d   : > { %v4686_v25 = vld [vmem:[#allocation2 + $0x60] sm:$0xff]   ;;  %1595 = vst [vmem:[#allocation2 + $0x6c] sm:$0xf] %v1594_v48  ;;  %4466 = vmatprep.subr.bf16.mxu0 %v6446_v35  ;;  %v2715_v29 = vld [vmem:[#allocation2 + $0x5c] sm:$0x1]  ;;  %v5888_v52 = vrot.slane %v2873_v34, 5 }
 0x10e   : > { %v2650_v4 = vsel %vm2211_vm0, %v4686_v25, 0  ;;  %v2869_v47 = vrot.slane %v2867_v39, 5  ;;  %v2879_v17 = vrot.slane %v2877_v37, 4  ;;  %v2635_v48 = vsel %vm2211_vm0, %v4691_v31, 0  ;;  %v5892_v6 = vld [vmem:[#allocation2 + $0x64] sm:$0xf] }
 0x10f   : > { %v1946_v16 = vpop.permute.xlu1 %1945  ;;  %4487 = vmatpush3.bf16.xpose.msra.mxu1 %v2650_v4  ;;  %v1944_v22 = vpop.permute.xlu0 %1943  ;;  %v1238_v51 = vld [vmem:[#allocation2 + $0x74] sm:$0x1]  ;;  %v4284_v25 = vrot.slane %v3013_v18, 9  ;;  %v2716_v58 = vld [vmem:[#allocation2 + $0x60] sm:$0xf]  ;;  %v3085_v10 = vrot.slane %v3083_v61, 4 }
 0x110   : > { %1955 = vst.msk [vmem:[#allocation2 + $0x70] sm:$0xf] %vm6512_vm2, %v1946_v16  ;;  %4488 = vmatprep.subr.bf16.mxu1 %v6446_v35  ;;  %v1239_v38 = vsel %vm6513_vm4, %v1229_v3, %v1238_v51  ;;  %v3086_v45 = vrot.slane %v2715_v29, 5  ;;  %v2870_v63 = vor.u32 %v2869_v47, %v2866_v57  ;;  %v2880_v4 = vor.u32 %v2879_v17, %v5888_v52  ;;  %v2710_v24 = vld [vmem:[#allocation2 + $0x48] sm:$0xf] }
 0x111   : > { %1240 = vst [vmem:[#allocation2 + $0x74] sm:$0x1] %v1239_v38  ;;  %v2883_v16 = vshll.u32 %v2715_v29, 16  ;;  %v2888_v3 = vshrl.u32 %v2716_v58, 16  ;;  %v2897_v51 = vshll.u32 %v5892_v6, 16  ;;  %v2901_v38 = vshrl.u32 %v5892_v6, 16 }
 0x112   : > { %v5907_v9 = vsel %vm5568_vm14, %v3085_v10, %v3086_v45  ;;  %v2871_v11 = vrot.slane %v2870_v63, 4  ;;  %v2840_v19 = vshrl.u32 %v2710_v24, 16  ;;  %v3014_v32 = vld [vmem:[#allocation2 + $0x60] sm:$0xe]  ;;  %v2707_v57 = vld [vmem:[#allocation2 + $0x3c] sm:$0xf] }
 0x113   : > { %4443 = vmatmul.mubr.msk.bf16.vlgmr.msra.gmra.mxu0 %vm2211_vm0, %v5770_v14  ;;  %v2647_v14 = vsel %vm2211_vm0, %v4687_v41, 0  ;;  %v5858_v49 = vpop.permute.xlu0 %2583  ;;  %v5865_v44 = vpop.permute.xlu1 %2911  ;;  %v2507_v41 = vsel %vm2211_vm0, %v4253_v42, 0  ;;  %v2843_v42 = vshll.u32 %v2710_v24, 16  ;;  %v2903_v30 = vrot.slane %v2901_v38, 4  ;;  %v4693_v29 = vld [vmem:[#allocation2 + $0xc] sm:$0xff]  }
 0x114   : > { %v1952_v56 = vld [vmem:[#allocation2 + $0x6c] sm:$0xf]  ;;  %4467 = vmatpush3.bf16.xpose.msra.mxu0 %v2522_v20  ;;  %4482 = vmatprep.mubr.msk.bf16.mxu0 %vm6509_vm12, %v6446_v35  ;;  %v4692_v20 = vld [vmem:[#allocation2 + $0x18] sm:$0xff]   ;;  %v2842_v39 = vrot.slane %v2840_v19, 4  ;;  %v2876_v31 = vsel %vm5580_vm11, %v2871_v11, %v5888_v52  ;;  %v2504_v47 = vsel %vm2211_vm0, %v4252_v12, 0  ;;  %v4285_v17 = vrot.slane %v3014_v32, 9 }
 0x115   : > { %v1953_v21 = vsel %vm5540_vm9, %v1944_v22, %v1952_v56  ;;  %4468 = vmatprep.subr.bf16.mxu0 %v6446_v35  ;;  %v5901_v56 = vsel %vm5568_vm14, %v4284_v25, %v3083_v61  ;;  %v2711_v22 = vld [vmem:[#allocation2 + $0x4c] sm:$0xf]  ;;  %v2845_v34 = vrot.slane %v2843_v42, 5  ;;  %v5927_v61 = vld [vmem:[#allocation2 + $0x40] sm:$0xf]  ;;  %v2816_v12 = vshrl.u32 %v2707_v57, 16 }
 0x116   : > { %1954 = vst [vmem:[#allocation2 + $0x6c] sm:$0xf] %v1953_v21  ;;  %v3012_v21 = vld [vmem:[#allocation2 + $0x48] sm:$0xe]  ;;  %v2849_v28 = vshll.u32 %v2711_v22, 16  ;;  %v4292_v37 = vcombine.low %v5901_v56, %v5907_v9  ;;  %v2825_v24 = vshll.u32 %v5927_v61, 16 }
 0x117   : > { %4489 = vmatpush3.bf16.xpose.msra.mxu1 %v2647_v14  ;;  %v1589_v7 = vpop.permute.xlu0 %1588  ;;  %v1948_v59 = vpop.permute.xlu1 %1947  ;;  %v2891_v14 = vshll.u32 %v2716_v58, 16  ;;  %v2846_v33 = vor.u32 %v2845_v34, %v2842_v39  ;;  %v2709_v19 = vld [vmem:[#allocation2 + $0x44] sm:$0x1]  ;;  %v4282_v42 = vrot.slane %v3011_v0, 9  ;;  %v3638_v32 = vld [vmem:[#allocation2 + $0x60] sm:$0xe] }
 0x118   : > { %4490 = vmatprep.subr.bf16.mxu1 %v6446_v35  ;;  %v1597_v54 = vld [vmem:[#allocation2 + $0x74] sm:$0x1]  ;;  %v5925_v18 = vrot.slane %v2849_v28, 5  ;;  %v5952_v28 = vrot.slane %v2825_v24, 5  ;;  %v5972_v39 = vsel %vm2211_vm0, %v4292_v37, 0  ;;  %v2835_v37 = vshll.u32 %v2709_v19, 16 }
 0x119   : > { %v1598_v60 = vsel %vm5527_vm5, %v1589_v7, %v1597_v54  ;;  %v5910_v7 = vld [vmem:[#allocation2 + $0x50] sm:$0x1]  ;;  %v4283_v54 = vrot.slane %v3012_v21, 9  ;;  %v5949_v11 = vrot.slane %v2846_v33, 4 }
 0x11a   : > { %1599 = vst [vmem:[#allocation2 + $0x74] sm:$0x1] %v1598_v60  ;;  %v2632_v60 = vsel %vm2211_vm0, %v4692_v20, 0  ;;  %v3079_v2 = vrot.slane %v5910_v7, 5  ;;  %v2629_v20 = vsel %vm2211_vm0, %v4693_v29, 0  ;;  %v2859_v21 = vshll.u32 %v5910_v7, 16 }
 0x11b   : > { %v6024_v24 = vrot.slane %v2835_v37, 5 }
 0x11c   : > { %4469 = vmatpush3.bf16.xpose.msra.mxu0 %v2519_v46  ;;  %v2881_v46 = vrot.slane %v2880_v4, 4 }
 0x11d   : > { %4470 = vmatprep.subr.bf16.mxu0 %v6446_v35 }
 0x11f   : > { %4491 = vmatpush3.bf16.xpose.msra.mxu1 %v2644_v13  ;;  %v2885_v13 = vrot.slane %v2883_v16, 5  ;;  %v2819_v16 = vshll.u32 %v2707_v57, 16  ;;  %v3637_v57 = vld [vmem:[#allocation2 + $0x54] sm:$0xe] }
 0x120   : > { %4492 = vmatprep.subr.bf16.mxu1 %v6446_v35  ;;  %v4318_v33 = vrot.slane %v3637_v57, 9 }
 0x121   : > { %v1956_v27 = vld [vmem:[#allocation2 + $0x74] sm:$0x1] }
 0x122   : > { %v1957_v1 = vsel %vm5550_vm7, %v1948_v59, %v1956_v27  ;;  %v2853_v59 = vshrl.u32 %v2711_v22, 16  ;;  %v2890_v27 = vrot.slane %v2888_v3, 4 }
 0x123   : > { %1958 = vst [vmem:[#allocation2 + $0x74] sm:$0x1] %v1957_v1  ;;  %v5914_v1 = vrot.slane %v2897_v51, 5 }
 0x124   : > { %4471 = vmatpush3.bf16.xpose.msra.mxu0 %v2516_v53  ;;  %v3090_v53 = vrot.slane %v5892_v6, 5  ;;  %v2855_v25 = vrot.slane %v2853_v59, 4 }
 0x125   : > { %4472 = vmatprep.subr.bf16.mxu0 %v6446_v35  ;;  %v2904_v52 = vor.u32 %v2903_v30, %v5914_v1 }
 0x126   : > { %v3091_v56 = vsel %vm5568_vm14, %v4285_v17, %v3090_v53 }
 0x127   : > { %4493 = vmatpush3.bf16.xpose.msra.mxu1 %v2641_v62  ;;  %v3076_v62 = vrot.slane %v2711_v22, 5  ;;  %v2856_v22 = vor.u32 %v2855_v25, %v5925_v18  ;;  %v2905_v51 = vrot.slane %v2904_v52, 4 }
 0x128   : > { %4494 = vmatprep.subr.bf16.mxu1 %v6446_v35 }
 0x129   : > { %v3078_v40 = vrot.slane %v3076_v62, 4  ;;  %v3077_v63 = vsel %vm5568_vm14, %v4283_v54, %v3076_v62  ;;  %v2821_v54 = vrot.slane %v2819_v16, 5  ;;  %v5956_v62 = vrot.slane %v2859_v21, 5  ;;  %v6029_v21 = vld [vmem:[#allocation2 + $0x34] sm:$0xf] }
 0x12a   : > { %v2805_v57 = vshrl.u32 %v6029_v21, 16 }
 0x12b   : > { %v3080_v4 = vsel %vm5568_vm14, %v3078_v40, %v3079_v2  ;;  %v5967_v40 = vld [vmem:[#allocation2 + $0x68] sm:$0x1]  ;;  %v5969_v2 = vld [vmem:[#allocation2 + $0x58] sm:$0xf] }
 0x12c   : > { %4473 = vmatpush3.bf16.xpose.msra.mxu0 %v2513_v5  ;;  %v2893_v5 = vrot.slane %v2891_v14, 5  ;;  %v4291_v9 = vcombine.low %v3077_v63, %v3080_v4  ;;  %v3701_v52 = vrot.slane %v5969_v2, 5 }
 0x12d   : > { %4474 = vmatprep.subr.bf16.mxu0 %v6446_v35 }
 0x12e   : > { %v2894_v58 = vor.u32 %v2893_v5, %v2890_v27  ;;  %v2501_v27 = vsel %vm2211_vm0, %v4251_v43, 0  ;;  %v5978_v26 = vsel %vm2211_vm0, %v4291_v9, 0  ;;  %v3635_v9 = vld [vmem:[#allocation2 + $0x3c] sm:$0xe] }
 0x12f   : > { %4495 = vmatpush3.bf16.xpose.msra.mxu1 %v2638_v50  ;;  %v2718_v50 = vld [vmem:[#allocation2 + $0x68] sm:$0x1] }
 0x130   : > { %4496 = vmatprep.subr.bf16.mxu1 %v6446_v35  ;;  %v3093_v6 = vrot.slane %v2718_v50, 5  ;;  %v2907_v10 = vshll.u32 %v2718_v50, 16  ;;  %v2895_v14 = vrot.slane %v2894_v58, 4  ;;  %v3072_v50 = vrot.slane %v2709_v19, 5  ;;  %v6009_v58 = vld [vmem:[#allocation2 + $0x4c] sm:$0xf] }
 0x131   : > { %v6043_v19 = vld [vmem:[#allocation2 + $0x70] sm:$0xf] }
 0x132   : > { %v2909_v38 = vrot.slane %v2907_v10, 5  ;;  %v2900_v5 = vsel %vm5580_vm11, %v2895_v14, %v5914_v1  ;;  %v5984_v1 = vld [vmem:[#allocation2 + $0x5c] sm:$0x1]  ;;  %v3636_v10 = vld [vmem:[#allocation2 + $0x48] sm:$0xe] }
 0x133   : > { %v3704_v0 = vrot.slane %v5984_v1, 5 }
 0x134   : > { %4475 = vmatpush3.bf16.xpose.msra.mxu0 %v2510_v15  ;;  %v2886_v15 = vsel %vm5580_vm11, %v2881_v46, %v2885_v13  ;;  %v3069_v46 = vrot.slane %v5927_v61, 5  ;;  %v2818_v13 = vrot.slane %v2816_v12, 4  ;;  %v2910_v30 = vsel %vm5580_vm11, %v2905_v51, %v2909_v38 }
 0x135   : > { %4476 = vmatprep.subr.bf16.mxu0 %v6446_v35  ;;  %v4275_v45 = vcombine.low %v2876_v31, %v2886_v15  ;;  %v5988_v15 = vld [vmem:[#allocation2 + $0x64] sm:$0xf]  ;;  %v4276_v29 = vcombine.low %v2900_v5, %v2910_v30  ;;  %v6039_v51 = vsel %vm5568_vm14, %v4318_v33, %v3701_v52  ;;  %v4317_v38 = vrot.slane %v3636_v10, 9 }
 0x136   : > { %v3071_v59 = vrot.slane %v3069_v46, 4  ;;  %v2822_v34 = vor.u32 %v2821_v54, %v2818_v13  ;;  %v3708_v17 = vrot.slane %v5988_v15, 5  ;;  %v3694_v54 = vrot.slane %v6009_v58, 5 }
 0x137   : > { %4497 = vmatpush3.bf16.xpose.msra.mxu1 %v2635_v48  ;;  %v3092_v48 = vrot.slane %v3090_v53, 4  ;;  %v5954_v53 = vrot.slane %v2856_v22, 4  ;;  %v5975_v23 = vsel %vm2211_vm0, %v4275_v45, 0  ;;  %v6013_v45 = vld [vmem:[#allocation2 + $0x50] sm:$0x1]  ;;  %v2962_v22 = vsel %vm2211_vm0, %v4276_v29, 0 }
 0x138   : > { %4498 = vmatprep.subr.bf16.mxu1 %v6446_v35  ;;  %v3710_v4 = vrot.slane %v3708_v17, 4  ;;  %v6020_v12 = vrot.slane %v2822_v34, 4  ;;  %v2801_v34 = vshll.u32 %v6029_v21, 16  ;;  %v3696_v37 = vrot.slane %v3694_v54, 4 }
 0x139   : > { %v3094_v3 = vsel %vm5568_vm14, %v3092_v48, %v3093_v6  ;;  %v3711_v48 = vrot.slane %v5967_v40, 5  ;;  %v6001_v6 = vsel %vm5568_vm14, %v4282_v42, %v3069_v46  ;;  %v6045_v42 = vld [vmem:[#allocation2 + $0x74] sm:$0x1] }
 0x13a   : > { %v3718_v5 = vrot.slane %v6045_v42, 5 }
 0x13b   : > { %v6035_v14 = vsel %vm5568_vm14, %v3710_v4, %v3711_v48  ;;  %v6080_v4 = vsel %vm5568_vm14, %v4317_v38, %v3694_v54  ;;  %v6094_v38 = vld [vmem:[#allocation2 + $0x1c] sm:$0xf]  ;;  %v6115_v54 = vrot.slane %v2801_v34, 5 }
 0x13c   : > { %4477 = vmatpush3.bf16.xpose.msra.mxu0 %v2507_v41  ;;  %v2829_v41 = vshrl.u32 %v5927_v61, 16  ;;  %v4319_v61 = vrot.slane %v3638_v32, 9  ;;  %v3639_v32 = vld [vmem:[#allocation2 + $0x6c] sm:$0xe] }
 0x13d   : > { %4478 = vmatprep.subr.bf16.mxu0 %v6446_v35 }
 0x13e   : > { %v2831_v7 = vrot.slane %v2829_v41, 4  ;;  %v6017_v63 = vsel %vm5568_vm14, %v4319_v61, %v3708_v17  ;;  %v2704_v41 = vld [vmem:[#allocation2 + $0x30] sm:$0xf]  ;;  %v4316_v17 = vrot.slane %v3635_v9, 9 }
 0x13f   : > { %4499 = vmatpush3.bf16.xpose.msra.mxu1 %v2632_v60  ;;  %v4293_v60 = vcombine.low %v3091_v56, %v3094_v3  ;;  %v3703_v56 = vrot.slane %v3701_v52, 4  ;;  %v6031_v3 = vld [vmem:[#allocation2 + $0x44] sm:$0x1]  ;;  %v3634_v61 = vld [vmem:[#allocation2 + $0x30] sm:$0xe] }
 0x140   : > { %4500 = vmatprep.subr.bf16.mxu1 %v6446_v35  ;;  %v2832_v31 = vor.u32 %v2831_v7, %v5952_v28  ;;  %v3697_v7 = vrot.slane %v6013_v45, 5  ;;  %v6072_v52 = vld [vmem:[#allocation2 + $0x2c] sm:$0x1]  ;;  %v4315_v9 = vrot.slane %v3634_v61, 9 }
 0x141   : > { %v6051_v13 = vsel %vm5568_vm14, %v3703_v56, %v3704_v0  ;;  %v3690_v0 = vrot.slane %v6031_v3, 5  ;;  %v3676_v56 = vrot.slane %v6072_v52, 5 }
 0x142   : > { %v6022_v16 = vrot.slane %v2832_v31, 4  ;;  %v4320_v31 = vrot.slane %v3639_v32, 9  ;;  %v6084_v33 = vsel %vm5568_vm14, %v3696_v37, %v3697_v7 }
 0x144   : > { %4479 = vmatpush3.bf16.xpose.msra.mxu0 %v2504_v47  ;;  %v3146_v47 = vsel %vm2211_vm0, %v4293_v60, 0  ;;  %v2792_v60 = vshrl.u32 %v2704_v41, 16 }
 0x145   : > { %4480 = vmatprep.subr.bf16.mxu0 %v6446_v35 }
 0x146   : > { %v2794_v30 = vrot.slane %v2792_v60, 4 }
 0x147   : > { %4501 = vmatpush3.bf16.xpose.msra.mxu1 %v2629_v20  ;;  %v6026_v20 = vld [vmem:[#allocation2 + $0x40] sm:$0xf] }
 0x148   : > { %4526 = vmatprep.subr.bf16.mxu1 %v6446_v35  ;;  %v3687_v48 = vrot.slane %v6026_v20, 5 }
 0x14a   : > { %v6100_v7 = vsel %vm5568_vm14, %v4316_v17, %v3687_v48 }
 0x14c   : > { %4481 = vmatpush3.bf16.xpose.msra.mxu0 %v2501_v27  ;;  %v3715_v27 = vrot.slane %v6043_v19, 5 }
 0x14d   : > { %4506 = vmatprep.subr.bf16.mxu0 %v6446_v35 }
 0x14e   : > { %4503 = vmatmul.mubr.msk.bf16.vlgmr.msra.gmra.mxu1 %vm2211_vm0, %v5858_v49  ;;  %v6005_v49 = vsel %vm5568_vm14, %v3071_v59, %v3072_v50  ;;  %v6059_v59 = vld [vmem:[#allocation2 + $0x38] sm:$0x1]  ;;  %v2795_v50 = vshll.u32 %v2704_v41, 16  ;;  %v3717_v29 = vrot.slane %v3715_v27, 4  ;;  %v6076_v10 = vsel %vm5568_vm14, %v4320_v31, %v3715_v27  ;;  %v3633_v41 = vld [vmem:[#allocation2 + $0x24] sm:$0xe] }
 0x14f   : > { %4527 = vmatpush3.bf16.xpose.msra.mxu1 %v3146_v47  ;;  %4542 = vmatprep.mubr.msk.bf16.mxu1 %vm6509_vm12, %v6446_v35  ;;  %v6068_v47 = vld [vmem:[#allocation2 + $0x28] sm:$0xf]  ;;  %v3683_v27 = vrot.slane %v6059_v59, 5  ;;  %v6104_v31 = vld [vmem:[#allocation2 + $0x20] sm:$0x1]  ;;  %v4314_v61 = vrot.slane %v3633_v41, 9 }
 0x150   : > { %4528 = vmatprep.subr.bf16.mxu1 %v6446_v35  ;;  %v2797_v46 = vrot.slane %v2795_v50, 5  ;;  %v2807_v41 = vrot.slane %v2805_v57, 4  ;;  %v3669_v50 = vrot.slane %v6104_v31, 5 }
 0x153   : > { %4483 = vmatmul.mubr.msk.bf16.vlgmr.msra.gmra.mxu0 %vm2211_vm0, %v5811_v55  ;;  %v6057_v55 = vld [vmem:[#allocation2 + $0x34] sm:$0xf] }
 0x154   : > { %4507 = vmatpush3.bf16.xpose.msra.mxu0 %v2962_v22  ;;  %4522 = vmatprep.mubr.msk.bf16.mxu0 %vm6509_vm12, %v6446_v35  ;;  %v3689_v22 = vrot.slane %v3687_v48, 4  ;;  %v3680_v32 = vrot.slane %v6057_v55, 5 }
 0x155   : > { %4508 = vmatprep.subr.bf16.mxu0 %v6446_v35 }
 0x156   : > { %v6108_v37 = vsel %vm5568_vm14, %v3689_v22, %v3690_v0  ;;  %v3682_v48 = vrot.slane %v3680_v32, 4  ;;  %v3666_v0 = vrot.slane %v6094_v38, 5  ;;  %v6121_v22 = vsel %vm5568_vm14, %v4315_v9, %v3680_v32 }
 0x157   : > { %4529 = vmatpush3.bf16.xpose.msra.mxu1 %v5972_v39  ;;  %v6090_v39 = vsel %vm5568_vm14, %v3717_v29, %v3718_v5  ;;  %v3632_v5 = vld [vmem:[#allocation2 + $0x18] sm:$0xe]  ;;  %6514 = vst [vmem:[#allocation9_spill] sm:$0xff] %v6108_v37  ;;  %v3673_v29 = vrot.slane %v6068_v47, 5  ;;  %6515 = vst [vmem:[#allocation10_spill] sm:$0xff] %v6121_v22  ;;  %v6519_v32 = vsel %vm5580_vm11, %v5954_v53, %v5956_v62 }
 0x158   : > { %4530 = vmatprep.subr.bf16.mxu1 %v6446_v35  ;;  %v4313_v25 = vrot.slane %v3632_v5, 9  ;;  %v6125_v60 = vsel %vm5568_vm14, %v3682_v48, %v3683_v27  ;;  %v3668_v9 = vrot.slane %v3666_v0, 4  ;;  %v6520_v27 = vsel %vm5580_vm11, %v5949_v11, %v5925_v18  ;;  %v3010_v11 = vld [vmem:[#allocation2 + $0x30] sm:$0xe]  ;;  %v6163_v62 = vld [vmem:[#allocation2 + $0x28] sm:$0xf] }
 0x159   : > { %v3675_v43 = vrot.slane %v3673_v29, 4  ;;  %6516 = vst [vmem:[#allocation11_spill] sm:$0xff] %v6125_v60  ;;  %v6132_v5 = vsel %vm5568_vm14, %v4314_v61, %v3673_v29  ;;  %v4274_v48 = vcombine.low %v6520_v27, %v6519_v32  ;;  %v4290_v61 = vcombine.low %v6001_v6, %v6005_v49 }
 0x15a   : > { %6517 = vst [vmem:[#allocation12_spill] sm:$0xff] %v6132_v5  ;;  %v2828_v53 = vsel %vm5580_vm11, %v6020_v12, %v5952_v28  ;;  %v2838_v18 = vsel %vm5580_vm11, %v6022_v16, %v6024_v24  ;;  %v6167_v6 = vsel %vm5568_vm14, %v4313_v25, %v3666_v0  ;;  %v6171_v49 = vsel %vm5568_vm14, %v3668_v9, %v3669_v50 }
 0x15b   : > { %v6136_v57 = vsel %vm5568_vm14, %v3675_v43, %v3676_v56  ;;  %v3062_v43 = vrot.slane %v6029_v21, 5  ;;  %v2701_v56 = vld [vmem:[#allocation2 + $0x24] sm:$0xf]  ;;  %6521 = vst [vmem:[#allocation14_spill] sm:$0xff] %v6167_v6  ;;  %6522 = vst [vmem:[#allocation15_spill] sm:$0xff] %v6171_v49  ;;  %v2798_v32 = vor.u32 %v2797_v46, %v2794_v30  ;;  %v2808_v12 = vor.u32 %v2807_v41, %v6115_v54 }
 0x15c   : > { %4509 = vmatpush3.bf16.xpose.msra.mxu0 %v5975_v23  ;;  %v2706_v23 = vld [vmem:[#allocation2 + $0x38] sm:$0x1]  ;;  %6518 = vst [vmem:[#allocation13_spill] sm:$0xff] %v6136_v57  ;;  %v2768_v24 = vshrl.u32 %v2701_v56, 16  ;;  %v2771_v27 = vshll.u32 %v2701_v56, 16  ;;  %v4281_v34 = vrot.slane %v3010_v11, 9  ;;  %v4273_v46 = vcombine.low %v2828_v53, %v2838_v18 }
 0x15d   : > { %4510 = vmatprep.subr.bf16.mxu0 %v6446_v35  ;;  %v3064_v21 = vrot.slane %v3062_v43, 4  ;;  %v3065_v29 = vrot.slane %v2706_v23, 5  ;;  %v2811_v16 = vshll.u32 %v2706_v23, 16  ;;  %v2777_v25 = vshll.u32 %v6163_v62, 16  ;;  %v2703_v56 = vld [vmem:[#allocation2 + $0x2c] sm:$0x1] }
 0x15e   : > { %v2781_v0 = vshrl.u32 %v6163_v62, 16  ;;  %v3137_v50 = vsel %vm2211_vm0, %v4290_v61, 0  ;;  %v2799_v41 = vrot.slane %v2798_v32, 4  ;;  %v2809_v23 = vrot.slane %v2808_v12, 4  ;;  %v3009_v32 = vld [vmem:[#allocation2 + $0x24] sm:$0xe] }
 0x15f   : > { %4531 = vmatpush3.bf16.xpose.msra.mxu1 %v5978_v26  ;;  %v2956_v26 = vsel %vm2211_vm0, %v4274_v48, 0  ;;  %v3066_v30 = vsel %vm5568_vm14, %v3064_v21, %v3065_v29  ;;  %v2813_v9 = vrot.slane %v2811_v16, 5  ;;  %v2770_v28 = vrot.slane %v2768_v24, 4  ;;  %v2699_v21 = vld [vmem:[#allocation2 + $0x1c] sm:$0xf] }
 0x160   : > { %4532 = vmatprep.subr.bf16.mxu1 %v6446_v35  ;;  %v2773_v48 = vrot.slane %v2771_v27, 5  ;;  %v3063_v11 = vsel %vm5568_vm14, %v4281_v34, %v3062_v43  ;;  %v6186_v17 = vrot.slane %v2777_v25, 5  ;;  %v2783_v61 = vrot.slane %v2781_v0, 4  ;;  %v3008_v27 = vld [vmem:[#allocation2 + $0x18] sm:$0xe] }
 0x161   : > { %v6523_v53 = vmov 0.0   ;;  %v4289_v18 = vcombine.low %v3063_v11, %v3066_v30  ;;  %v2953_v29 = vsel %vm2211_vm0, %v4273_v46, 0  ;;  %v3058_v16 = vrot.slane %v2703_v56, 5 }
 0x162   : > { %v2787_v24 = vshll.u32 %v2703_v56, 16  ;;  %v2804_v34 = vsel %vm5580_vm11, %v2799_v41, %v6115_v54  ;;  %v2814_v43 = vsel %vm5580_vm11, %v2809_v23, %v2813_v9  ;;  %v2784_v0 = vor.u32 %v2783_v61, %v6186_v17 }
 0x163   : > { %v2753_v11 = vshll.u32 %v2699_v21, 16  ;;  %v2757_v46 = vshrl.u32 %v2699_v21, 16  ;;  %v3134_v49 = vsel %vm2211_vm0, %v4289_v18, 0  ;;  %v4280_v56 = vrot.slane %v3009_v32, 9  ;;  %v6205_v32 = vld [vmem:[#allocation2 + $0x10] sm:$0xf] }
 0x164   : > { %4511 = vmatpush3.bf16.xpose.msra.mxu0 %v2956_v26  ;;  %v3055_v26 = vrot.slane %v6163_v62, 5  ;;  %v2774_v62 = vor.u32 %v2773_v48, %v2770_v28  ;;  %v3048_v6 = vrot.slane %v2699_v21, 5  ;;  %v4272_v54 = vcombine.low %v2804_v34, %v2814_v43 }
 0x165   : > { %4512 = vmatprep.subr.bf16.mxu0 %v6446_v35  ;;  %v2698_v35 = vld [vmem:[#allocation2 + $0x18] sm:$0xf]  ;;  %v2789_v28 = vrot.slane %v2787_v24, 5  ;;  %v4279_v23 = vrot.slane %v3008_v27, 9  ;;  %v2759_v18 = vrot.slane %v2757_v46, 4 }
 0x166   : > { %v3057_v12 = vrot.slane %v3055_v26, 4  ;;  %v2744_v25 = vshrl.u32 %v2698_v35, 16  ;;  %v2747_v30 = vshll.u32 %v2698_v35, 16  ;;  %v2775_v9 = vrot.slane %v2774_v62, 4  ;;  %v2695_v24 = vld [vmem:[#allocation2 + $0xc] sm:$0xf] }
 0x167   : > { %4533 = vmatpush3.bf16.xpose.msra.mxu1 %v3137_v50  ;;  %v2700_v50 = vld [vmem:[#allocation2 + $0x20] sm:$0x1]  ;;  %v3050_v48 = vrot.slane %v3048_v6, 4  ;;  %v2785_v35 = vrot.slane %v2784_v0, 4  ;;  %v3056_v21 = vsel %vm5568_vm14, %v4280_v56, %v3055_v26  ;;  %v3049_v34 = vsel %vm5568_vm14, %v4279_v23, %v3048_v6  ;;  %v3341_v27 = vld [vmem:[#allocation2 + $0x6c] sm:$0xf] }
 0x168   : > { %4534 = vmatprep.subr.bf16.mxu1 %v6523_v53  ;;  %v3059_v41 = vsel %vm5568_vm14, %v3057_v12, %v3058_v16  ;;  %v3051_v61 = vrot.slane %v2700_v50, 5  ;;  %v2746_v57 = vrot.slane %v2744_v25, 4  ;;  %v2749_v5 = vrot.slane %v2747_v30, 5 }
 0x169   : > { %v2950_v12 = vsel %vm2211_vm0, %v4272_v54, 0  ;;  %v4288_v16 = vcombine.low %v3056_v21, %v3059_v41  ;;  %v2763_v62 = vshll.u32 %v2700_v50, 16  ;;  %v2790_v26 = vsel %vm5580_vm11, %v2785_v35, %v2789_v28  ;;  %v3007_v21 = vld [vmem:[#allocation2 + $0xc] sm:$0xe] }
 0x16a   : > { %v3052_v43 = vsel %vm5568_vm14, %v3050_v48, %v3051_v61  ;;  %v2750_v25 = vor.u32 %v2749_v5, %v2746_v57  ;;  %v3041_v30 = vrot.slane %v6205_v32, 5  ;;  %v2720_v46 = vshrl.u32 %v2695_v24, 16 }
 0x16b   : > { %v2729_v56 = vshll.u32 %v6205_v32, 16  ;;  %v2733_v6 = vshrl.u32 %v6205_v32, 16  ;;  %v3513_v50 = vshrl.u32 %v3341_v27, 16  ;;  %v3516_v54 = vshll.u32 %v3341_v27, 16 }
 0x16c   : > { %4513 = vmatpush3.bf16.xpose.msra.mxu0 %v2953_v29  ;;  %v6200_v29 = vrot.slane %v2753_v11, 5  ;;  %v2697_v11 = vld [vmem:[#allocation2 + $0x14] sm:$0x1]  ;;  %v3522_v41 = vshll.u32 %v6043_v19, 16  ;;  %v3526_v5 = vshrl.u32 %v6043_v19, 16  ;;  %v3131_v57 = vsel %vm2211_vm0, %v4288_v16, 0 }
 0x16d   : > { %4514 = vmatprep.subr.bf16.mxu0 %v6523_v53  ;;  %v4287_v23 = vcombine.low %v3049_v34, %v3052_v43  ;;  %v2751_v48 = vrot.slane %v2750_v25, 4  ;;  %v3043_v35 = vrot.slane %v3041_v30, 4  ;;  %v2722_v32 = vrot.slane %v2720_v46, 4 }
 0x16e   : > { %v2760_v0 = vor.u32 %v2759_v18, %v6200_v29  ;;  %v3044_v18 = vrot.slane %v2697_v11, 5  ;;  %v2735_v27 = vrot.slane %v2733_v6, 4  ;;  %v3515_v60 = vrot.slane %v3513_v50, 4 }
 0x16f   : > { %4535 = vmatpush3.bf16.xpose.msra.mxu1 %v3134_v49  ;;  %v2780_v49 = vsel %vm5580_vm11, %v2775_v9, %v6186_v17  ;;  %v2723_v17 = vshll.u32 %v2695_v24, 16  ;;  %v2765_v9 = vrot.slane %v2763_v62, 5  ;;  %v2731_v24 = vrot.slane %v2729_v56, 5  ;;  %v3338_v62 = vld [vmem:[#allocation2 + $0x60] sm:$0xf] }
 0x170   : > { %4536 = vmatprep.subr.bf16.mxu1 %v6523_v53  ;;  %v4271_v28 = vcombine.low %v2780_v49, %v2790_v26  ;;  %v2761_v61 = vrot.slane %v2760_v0, 4  ;;  %v3518_v22 = vrot.slane %v3516_v54, 5  ;;  %v3524_v19 = vrot.slane %v3522_v41, 5 }
 0x171   : > { %v3528_v37 = vrot.slane %v3526_v5, 4  ;;  %v3128_v49 = vsel %vm2211_vm0, %v4287_v23, 0  ;;  %v2756_v34 = vsel %vm5580_vm11, %v2751_v48, %v6200_v29  ;;  %v4278_v43 = vrot.slane %v3007_v21, 9 }
 0x172   : > { %v2947_v16 = vsel %vm2211_vm0, %v4271_v28, 0  ;;  %v2766_v26 = vsel %vm5580_vm11, %v2761_v61, %v2765_v9  ;;  %v2736_v0 = vor.u32 %v2735_v27, %v2731_v24  ;;  %v2739_v46 = vshll.u32 %v2697_v11, 16 }
 0x173   : > { %v3519_v56 = vor.u32 %v3518_v22, %v3515_v60  ;;  %v3529_v6 = vor.u32 %v3528_v37, %v3524_v19  ;;  %v3532_v50 = vshll.u32 %v6045_v42, 16  ;;  %v3489_v54 = vshrl.u32 %v3338_v62, 16 }
 0x174   : > { %4515 = vmatpush3.bf16.xpose.msra.mxu0 %v2950_v12  ;;  %v2725_v12 = vrot.slane %v2723_v17, 5  ;;  %v3045_v17 = vsel %vm5568_vm14, %v3043_v35, %v3044_v18  ;;  %v3492_v29 = vshll.u32 %v3338_v62, 16  ;;  %v3498_v41 = vshll.u32 %v5988_v15, 16 }
 0x175   : > { %4516 = vmatprep.subr.bf16.mxu0 %v6523_v53  ;;  %v3502_v5 = vshrl.u32 %v5988_v15, 16  ;;  %v3042_v11 = vsel %vm5568_vm14, %v4278_v43, %v3041_v30  ;;  %v2737_v23 = vrot.slane %v2736_v0, 4  ;;  %v2741_v9 = vrot.slane %v2739_v46, 5  ;;  %v3335_v30 = vld [vmem:[#allocation2 + $0x54] sm:$0xf] }
 0x176   : > { %v2726_v25 = vor.u32 %v2725_v12, %v2722_v32  ;;  %v4286_v22 = vcombine.low %v3042_v11, %v3045_v17  ;;  %v3520_v37 = vrot.slane %v3519_v56, 4  ;;  %v3530_v60 = vrot.slane %v3529_v6, 4  ;;  %v3332_v17 = vld [vmem:[#allocation2 + $0x48] sm:$0xf]  ;;  %v4694_v11 = vld [vmem:[#allocation2 + $0x6c] sm:$0xff]  }
 0x177   : > { %4537 = vmatpush3.bf16.xpose.msra.mxu1 %v3131_v57  ;;  %v4270_v57 = vcombine.low %v2756_v34, %v2766_v26  ;;  %v3534_v42 = vrot.slane %v3532_v50, 5  ;;  %v3491_v48 = vrot.slane %v3489_v54, 4  ;;  %v3494_v61 = vrot.slane %v3492_v29, 5  ;;  %v3096_v54 = vpop.permute.xlu0 %3095 }
 0x178   : > { %4538 = vmatprep.subr.bf16.mxu1 %v6523_v53  ;;  %v2727_v28 = vrot.slane %v2726_v25, 4  ;;  %v3500_v35 = vrot.slane %v3498_v41, 5  ;;  %v3504_v18 = vrot.slane %v3502_v5, 4  ;;  %v2742_v8 = vsel %vm5580_vm11, %v2737_v23, %v2741_v9 }
 0x179   : > { %v2944_v15 = vsel %vm2211_vm0, %v4270_v57, 0  ;;  %v3525_v32 = vsel %vm5580_vm11, %v3520_v37, %v3524_v19  ;;  %v3535_v12 = vsel %vm5580_vm11, %v3530_v60, %v3534_v42  ;;  %v3474_v27 = vshll.u32 %v5969_v2, 16 }
 0x17a   : > { %v2732_v21 = vsel %vm5580_vm11, %v2727_v28, %v2731_v24  ;;  %v3495_v34 = vor.u32 %v3494_v61, %v3491_v48  ;;  %v3505_v24 = vor.u32 %v3504_v18, %v3500_v35  ;;  %v3508_v43 = vshll.u32 %v5967_v40, 16 }
 0x17b   : > { %v4269_v62 = vcombine.low %v2732_v21, %v2742_v8  ;;  %v3465_v26 = vshrl.u32 %v3335_v30, 16  ;;  %v3468_v25 = vshll.u32 %v3335_v30, 16  ;;  %v4311_v19 = vcombine.low %v3525_v32, %v3535_v12  ;;  %v3329_v30 = vld [vmem:[#allocation2 + $0x3c] sm:$0xf] }
 0x17c   : > { %4517 = vmatpush3.bf16.xpose.msra.mxu0 %v2947_v16  ;;  %v3478_v16 = vshrl.u32 %v5969_v2, 16  ;;  %v3476_v0 = vrot.slane %v3474_v27, 5  ;;  %v3496_v56 = vrot.slane %v3495_v34, 4  ;;  %v3506_v6 = vrot.slane %v3505_v24, 4 }
 0x17d   : > { %4518 = vmatprep.subr.bf16.mxu0 %v6523_v53  ;;  %v3510_v50 = vrot.slane %v3508_v43, 5  ;;  %v2941_v2 = vsel %vm2211_vm0, %v4269_v62, 0  ;;  %v3467_v29 = vrot.slane %v3465_v26, 4  ;;  %v3470_v41 = vrot.slane %v3468_v25, 5  ;;  %v4695_v62 = vld [vmem:[#allocation2 + $0x60] sm:$0xff]  }
 0x17e   : > { %v3480_v46 = vrot.slane %v3478_v16, 4  ;;  %v3587_v40 = vsel %vm2211_vm0, %v4311_v19, 0  ;;  %v3441_v5 = vshrl.u32 %v3332_v17, 16  ;;  %v3444_v57 = vshll.u32 %v3332_v17, 16 }
 0x17f   : > { %4539 = vmatpush3.bf16.xpose.msra.mxu1 %v3128_v49  ;;  %v3125_v49 = vsel %vm2211_vm0, %v4286_v22, 0  ;;  %v3501_v23 = vsel %vm5580_vm11, %v3496_v56, %v3500_v35  ;;  %v3511_v9 = vsel %vm5580_vm11, %v3506_v6, %v3510_v50  ;;  %v3450_v22 = vshll.u32 %v6009_v58, 16 }
 0x180   : > { %4540 = vmatprep.subr.bf16.mxu1 %v6523_v53  ;;  %v3481_v28 = vor.u32 %v3480_v46, %v3476_v0  ;;  %v3454_v37 = vshrl.u32 %v6009_v58, 16  ;;  %v3471_v60 = vor.u32 %v3470_v41, %v3467_v29  ;;  %v3484_v42 = vshll.u32 %v5984_v1, 16 }
 0x181   : > { %v3443_v48 = vrot.slane %v3441_v5, 4  ;;  %v3446_v61 = vrot.slane %v3444_v57, 5  ;;  %v3275_v35 = vsel %vm2211_vm0, %v4694_v11, 0  ;;  %v4310_v18 = vcombine.low %v3501_v23, %v3511_v9  ;;  %v4696_v9 = vld [vmem:[#allocation2 + $0x54] sm:$0xff]  }
 0x182   : > { %v3452_v21 = vrot.slane %v3450_v22, 5  ;;  %v3456_v8 = vrot.slane %v3454_v37, 4  ;;  %v3472_v58 = vrot.slane %v3471_v60, 4  ;;  %v3486_v32 = vrot.slane %v3484_v42, 5 }
 0x183   : > { %v3447_v1 = vor.u32 %v3446_v61, %v3443_v48  ;;  %v3584_v12 = vsel %vm2211_vm0, %v4310_v18, 0  ;;  %v3417_v16 = vshrl.u32 %v3329_v30, 16  ;;  %v3460_v24 = vshll.u32 %v6013_v45, 16  ;;  %v3326_v45 = vld [vmem:[#allocation2 + $0x30] sm:$0xf] }
 0x184   : > { %4519 = vmatpush3.bf16.xpose.msra.mxu0 %v2944_v15  ;;  %v3482_v15 = vrot.slane %v3481_v28, 4  ;;  %v3457_v34 = vor.u32 %v3456_v8, %v3452_v21  ;;  %v3430_v43 = vshrl.u32 %v6026_v20, 16  ;;  %v3477_v26 = vsel %vm5580_vm11, %v3472_v58, %v3476_v0 }
 0x185   : > { %4520 = vmatprep.subr.bf16.mxu0 %v6523_v53  ;;  %v3448_v19 = vrot.slane %v3447_v1, 4  ;;  %v3419_v46 = vrot.slane %v3417_v16, 4  ;;  %v3462_v6 = vrot.slane %v3460_v24, 5  ;;  %v3436_v41 = vshll.u32 %v6031_v3, 16 }
 0x186   : > { %v3487_v27 = vsel %vm5580_vm11, %v3482_v15, %v3486_v32  ;;  %v3458_v56 = vrot.slane %v3457_v34, 4  ;;  %v3396_v5 = vshll.u32 %v3326_v45, 16  ;;  %v3402_v28 = vshll.u32 %v6057_v55, 16  ;;  %v3323_v15 = vld [vmem:[#allocation2 + $0x24] sm:$0xf] }
 0x187   : > { %4541 = vmatpush3.bf16.xpose.msra.mxu1 %v3125_v49  ;;  %v3420_v49 = vshll.u32 %v3329_v30, 16  ;;  %v4309_v25 = vcombine.low %v3477_v26, %v3487_v27  ;;  %v3453_v29 = vsel %vm5580_vm11, %v3448_v19, %v3452_v21  ;;  %v3406_v23 = vshrl.u32 %v6057_v55, 16  ;;  %v4697_v27 = vld [vmem:[#allocation2 + $0x48] sm:$0xff]  }
 0x188   : > { %4566 = vmatprep.subr.bf16.mxu1 %v6523_v53  ;;  %v3463_v57 = vsel %vm5580_vm11, %v3458_v56, %v3462_v6  ;;  %v3398_v42 = vrot.slane %v3396_v5, 5  ;;  %v3438_v3 = vrot.slane %v3436_v41, 5  ;;  %v3404_v61 = vrot.slane %v3402_v28, 5  ;;  %v4698_v56 = vld [vmem:[#allocation2 + $0x3c] sm:$0xff]  }
 0x189   : > { %v3422_v17 = vrot.slane %v3420_v49, 5  ;;  %v4308_v22 = vcombine.low %v3453_v29, %v3463_v57  ;;  %v3269_v18 = vsel %vm2211_vm0, %v4696_v9, 0  ;;  %v3412_v30 = vshll.u32 %v6059_v59, 16 }
 0x18a   : > { %v3369_v1 = vshrl.u32 %v3323_v15, 16  ;;  %v3378_v16 = vshll.u32 %v6068_v47, 16  ;;  %v3382_v49 = vshrl.u32 %v6068_v47, 16  ;;  %v3266_v26 = vsel %vm2211_vm0, %v4697_v27, 0 }
 0x18b   : > { %v3423_v0 = vor.u32 %v3422_v17, %v3419_v46  ;;  %v3578_v21 = vsel %vm2211_vm0, %v4308_v22, 0  ;;  %v3414_v24 = vrot.slane %v3412_v30, 5  ;;  %v3320_v46 = vld [vmem:[#allocation2 + $0x18] sm:$0xf]  ;;  %v3388_v47 = vshll.u32 %v6072_v52, 16 }
 0x18c   : > { %4521 = vmatpush3.bf16.xpose.msra.mxu0 %v2941_v2  ;;  %v3432_v2 = vrot.slane %v3430_v43, 4  ;;  %v3384_v19 = vrot.slane %v3382_v49, 4  ;;  %v3354_v29 = vshll.u32 %v6094_v38, 16  ;;  %v3263_v41 = vsel %vm2211_vm0, %v4698_v56, 0  ;;  %v3537_v49 = vpop.permute.xlu0 %3536 }
 0x18d   : > { %4546 = vmatprep.subr.bf16.mxu0 %v6523_v53  ;;  %v3424_v37 = vrot.slane %v3423_v0, 4  ;;  %v3358_v0 = vshrl.u32 %v6094_v38, 16  ;;  %v3390_v5 = vrot.slane %v3388_v47, 5  ;;  %v4699_v38 = vld [vmem:[#allocation2 + $0x30] sm:$0xff]   ;;  %v4771_v56 = vmov 0  }
 0x18e   : > { %4543 = vmatmul.mubr.msk.bf16.vlgmr.msra.gmra.mxu1 %vm2211_vm0, %v3096_v54  ;;  %v3272_v54 = vsel %vm2211_vm0, %v4695_v62, 0  ;;  %v3371_v62 = vrot.slane %v3369_v1, 4  ;;  %4675 = vset.pattern.permute.xlu0 %v4771_v56  ;;  %v6525_v47 = vcombine.low %v6017_v63, %v6035_v14  ;;  %v6528_v14 = vld [vmem:[#allocation9_spill] sm:$0xff] }
 0x18f   : > { %4567 = vmatpush3.bf16.xpose.msra.mxu1 %v3587_v40  ;;  %4582 = vmatprep.mubr.msk.bf16.mxu1 %vm6509_vm12, %v6523_v53  ;;  %v3393_v40 = vshrl.u32 %v3326_v45, 16  ;;  %v3345_v45 = vshrl.u32 %v3320_v46, 16  ;;  %v3360_v9 = vrot.slane %v3358_v0, 4 }
 0x190   : > { %4568 = vmatprep.subr.bf16.mxu1 %v6523_v53  ;;  %4676 = vset.pattern.permute.xlu1 %v4771_v56 }
 0x191   : > { %v3395_v60 = vrot.slane %v3393_v40, 4  ;;  %v3347_v57 = vrot.slane %v3345_v45, 4  ;;  %v6527_v45 = vcombine.low %v6080_v4, %v6084_v33  ;;  %v6533_v4 = vld [vmem:[#allocation12_spill] sm:$0xff]  ;;  %v6534_v33 = vld [vmem:[#allocation13_spill] sm:$0xff] }
 0x193   : > { %4523 = vmatmul.mubr.msk.bf16.vlgmr.msra.gmra.mxu0 %vm2211_vm0, %v5865_v44  ;;  %v3426_v44 = vshll.u32 %v6026_v20, 16  ;;  %v3581_v20 = vsel %vm2211_vm0, %v4309_v25, 0  ;;  %v3399_v8 = vor.u32 %v3398_v42, %v3395_v60  ;;  %v3380_v25 = vrot.slane %v3378_v16, 5 }
 0x194   : > { %4547 = vmatpush3.bf16.xpose.msra.mxu0 %v3275_v35  ;;  %4562 = vmatprep.mubr.msk.bf16.mxu0 %vm6509_vm12, %v6523_v53  ;;  %v3408_v35 = vrot.slane %v3406_v23, 4  ;;  %v3356_v23 = vrot.slane %v3354_v29, 5  ;;  %v3762_v63 = vsel %vm2211_vm0, %v6527_v45, 0 }
 0x195   : > { %4548 = vmatprep.subr.bf16.mxu0 %v6523_v53  ;;  %v3428_v50 = vrot.slane %v3426_v44, 5  ;;  %v3400_v44 = vrot.slane %v3399_v8, 4 }
 0x196   : > { %v3409_v32 = vor.u32 %v3408_v35, %v3404_v61  ;;  %v3260_v35 = vsel %vm2211_vm0, %v4699_v38, 0 }
 0x197   : > { %4569 = vmatpush3.bf16.xpose.msra.mxu1 %v3584_v12  ;;  %v3433_v11 = vor.u32 %v3432_v2, %v3428_v50  ;;  %v3429_v55 = vsel %vm5580_vm11, %v3424_v37, %v3428_v50  ;;  %v3372_v12 = vshll.u32 %v3323_v15, 16  ;;  %v3405_v6 = vsel %vm5580_vm11, %v3400_v44, %v3404_v61  ;;  %v3209_v44 = vpop.permute.xlu1 %3208 }
 0x198   : > { %4570 = vmatprep.subr.bf16.mxu1 %v6523_v53  ;;  %v3410_v43 = vrot.slane %v3409_v32, 4  ;;  %v3364_v37 = vshll.u32 %v6104_v31, 16 }
 0x199   : > { %v3434_v48 = vrot.slane %v3433_v11, 4  ;;  %v3374_v59 = vrot.slane %v3372_v12, 5  ;;  %v4701_v12 = vld [vmem:[#allocation2 + $0x18] sm:$0xff]  }
 0x19a   : > { %v3415_v50 = vsel %vm5580_vm11, %v3410_v43, %v3414_v24  ;;  %v3254_v16 = vsel %vm2211_vm0, %v4701_v12, 0 }
 0x19b   : > { %v3439_v58 = vsel %vm5580_vm11, %v3434_v48, %v3438_v3  ;;  %v3375_v2 = vor.u32 %v3374_v59, %v3371_v62  ;;  %v4306_v52 = vcombine.low %v3405_v6, %v3415_v50  ;;  %v3361_v3 = vor.u32 %v3360_v9, %v3356_v23 }
 0x19c   : > { %4549 = vmatpush3.bf16.xpose.msra.mxu0 %v3272_v54  ;;  %v4307_v34 = vcombine.low %v3429_v55, %v3439_v58  ;;  %v3385_v54 = vor.u32 %v3384_v19, %v3380_v25  ;;  %v4700_v55 = vld [vmem:[#allocation2 + $0x24] sm:$0xff]   ;;  %v6524_v62 = vcombine.low %v6076_v10, %v6090_v39  ;;  %v3768_v6 = vsel %vm2211_vm0, %v6525_v47, 0 }
 0x19d   : > { %4550 = vmatprep.subr.bf16.mxu0 %v6523_v53  ;;  %v3376_v40 = vrot.slane %v3375_v2, 4  ;;  %v3572_v22 = vsel %vm2211_vm0, %v4306_v52, 0  ;;  %v3362_v15 = vrot.slane %v3361_v3, 4  ;;  %v3257_v32 = vsel %vm2211_vm0, %v4700_v55, 0  ;;  %v3816_v10 = vld [vmem:[%s6430_s10] sm:$0xff] }
 0x19e   : > { %v3575_v17 = vsel %vm2211_vm0, %v4307_v34, 0  ;;  %v3386_v11 = vrot.slane %v3385_v54, 4  ;;  %v3771_v59 = vsel %vm2211_vm0, %v6524_v62, 0  ;;  %v3817_v39 = vld [vmem:[%s6430_s10 + $0x8] sm:$0xf]  ;;  %3820 = vperm.xlu0 %4675, %v3816_v10   ;;  %v6526_v50 = vcombine.low %v6039_v51, %v6051_v13  ;;  %v6530_v51 = vld [vmem:[#allocation10_spill] sm:$0xff] }
 0x19f   : > { %4571 = vmatpush3.bf16.xpose.msra.mxu1 %v3581_v20  ;;  %v3348_v20 = vshll.u32 %v3320_v46, 16  ;;  %v3381_v60 = vsel %vm5580_vm11, %v3376_v40, %v3380_v25  ;;  %3825 = vperm.xlu1 %4676, %v3817_v39   ;;  %v6529_v54 = vcombine.low %v6100_v7, %v6528_v14  ;;  %v6531_v13 = vld [vmem:[#allocation11_spill] sm:$0xff]  ;;  %v6536_v7 = vld [vmem:[#allocation14_spill] sm:$0xff] }
 0x1a0   : > { %4572 = vmatprep.subr.bf16.mxu1 %v6523_v53  ;;  %v3391_v42 = vsel %vm5580_vm11, %v3386_v11, %v3390_v5  ;;  %v3765_v2 = vsel %vm2211_vm0, %v6526_v50, 0  ;;  %v6532_v29 = vcombine.low %v6530_v51, %v6531_v13  ;;  %v6537_v40 = vld [vmem:[#allocation15_spill] sm:$0xff] }
 0x1a1   : > { %v3350_v28 = vrot.slane %v3348_v20, 5  ;;  %v4305_v61 = vcombine.low %v3381_v60, %v3391_v42  ;;  %v3759_v20 = vsel %vm2211_vm0, %v6529_v54, 0  ;;  %v6538_v5 = vcombine.low %v6536_v7, %v6537_v40 }
 0x1a2   : > { %v3756_v0 = vsel %vm2211_vm0, %v6532_v29, 0 }
 0x1a3   : > { %v3351_v48 = vor.u32 %v3350_v28, %v3347_v57  ;;  %v3569_v31 = vsel %vm2211_vm0, %v4305_v61, 0  ;;  %v3750_v57 = vsel %vm2211_vm0, %v6538_v5, 0  ;;  %v3721_v28 = vpop.permute.xlu1 %3720 }
 0x1a4   : > { %4551 = vmatpush3.bf16.xpose.msra.mxu0 %v3269_v18 }
 0x1a5   : > { %4552 = vmatprep.subr.bf16.mxu0 %v6523_v53  ;;  %v3352_v18 = vrot.slane %v3351_v48, 4 }
 0x1a7   : > { %4573 = vmatpush3.bf16.xpose.msra.mxu1 %v3578_v21  ;;  %v3366_v21 = vrot.slane %v3364_v37, 5  ;;  %v3357_v8 = vsel %vm5580_vm11, %v3352_v18, %v3356_v23 }
 0x1a8   : > { %4574 = vmatprep.subr.bf16.mxu1 %v6523_v53 }
 0x1a9   : > { %v3367_v30 = vsel %vm5580_vm11, %v3362_v15, %v3366_v21 }
 0x1aa   : > { %v4304_v58 = vcombine.low %v3357_v8, %v3367_v30 }
 0x1ac   : > { %4553 = vmatpush3.bf16.xpose.msra.mxu0 %v3266_v26  ;;  %v3566_v1 = vsel %vm2211_vm0, %v4304_v58, 0 }
 0x1ad   : > { %4554 = vmatprep.subr.bf16.mxu0 %v6523_v53 }
 0x1af   : > { %4575 = vmatpush3.bf16.xpose.msra.mxu1 %v3575_v17 }
 0x1b0   : > { %4576 = vmatprep.subr.bf16.mxu1 %v6523_v53 }
 0x1b4   : > { %4555 = vmatpush3.bf16.xpose.msra.mxu0 %v3263_v41  ;;  %v6535_v41 = vcombine.low %v6533_v4, %v6534_v33 }
 0x1b5   : > { %4556 = vmatprep.subr.bf16.mxu0 %v6523_v53 }
 0x1b6   : > { %v3753_v52 = vsel %vm2211_vm0, %v6535_v41, 0 }
 0x1b7   : > { %4577 = vmatpush3.bf16.xpose.msra.mxu1 %v3572_v22 }
 0x1b8   : > { %4578 = vmatprep.subr.bf16.mxu1 %v6523_v53 }
 0x1bc   : > { %4557 = vmatpush3.bf16.xpose.msra.mxu0 %v3260_v35 }
 0x1bd   : > { %4558 = vmatprep.subr.bf16.mxu0 %v6523_v53 }
 0x1bf   : > { %4579 = vmatpush3.bf16.xpose.msra.mxu1 %v3569_v31 }
 0x1c0   : > { %4580 = vmatprep.subr.bf16.mxu1 %v6523_v53 }
 0x1c4   : > { %4559 = vmatpush3.bf16.xpose.msra.mxu0 %v3257_v32 }
 0x1c5   : > { %4560 = vmatprep.subr.bf16.mxu0 %v6523_v53 }
 0x1c7   : > { %4581 = vmatpush3.bf16.xpose.msra.mxu1 %v3566_v1 }
 0x1ca   : > { %v2381_v27 = vpop.f32.mrf.mxu1 }
 0x1cc   : > { %v4464_v34 = vpop.f32.mrf.mxu1  ;;  %4561 = vmatpush3.bf16.xpose.msra.mxu0 %v3254_v16 }
 0x1cd   : > { %4586 = vmatprep.subr.bf16.mxu0 %v6523_v53 }
 0x1ce   : > { %v2384_v36 = vpop.f32.mrf.mxu1  ;;  %4583 = vmatmul.mubr.msk.bf16.vlgmr.msra.gmra.mxu1 %vm2211_vm0, %v3537_v49 }
 0x1d0   : > { %v4465_v24 = vpop.f32.mrf.mxu1 }
 0x1d3   : > { %v2273_v43 = vpop.f32.mrf.mxu0  ;;  %4563 = vmatmul.mubr.msk.bf16.vlgmr.msra.gmra.mxu0 %vm2211_vm0, %v3209_v44 }
 0x1d4   : > { %v2382_v26 = vadd.f32 %v2381_v27, %v2273_v43  ;;  %4587 = vmatpush3.bf16.xpose.msra.mxu0 %v3771_v59  ;;  %4602 = vmatprep.mubr.msk.bf16.mxu0 %vm6509_vm12, %v6523_v53 }
 0x1d5   : > { %v4444_v25 = vpop.f32.mrf.mxu0  ;;  %4588 = vmatprep.subr.bf16.mxu0 %v6523_v53 }
 0x1d7   : > { %v2276_v19 = vpop.f32.mrf.mxu0 }
 0x1d8   : > { %v2385_v46 = vadd.f32 %v2384_v36, %v2276_v19 }
 0x1d9   : > { %v4445_v17 = vpop.f32.mrf.mxu0 }
 0x1dc   : > { %4589 = vmatpush3.bf16.xpose.msra.mxu0 %v3768_v6 }
 0x1dd   : > { %4590 = vmatprep.subr.bf16.mxu0 %v6523_v53 }
 0x1e4   : > { %4591 = vmatpush3.bf16.xpose.msra.mxu0 %v3765_v2 }
 0x1e5   : > { %4592 = vmatprep.subr.bf16.mxu0 %v6523_v53 }
 0x1ec   : > { %4593 = vmatpush3.bf16.xpose.msra.mxu0 %v3762_v63 }
 0x1ed   : > { %4594 = vmatprep.subr.bf16.mxu0 %v6523_v53 }
 0x1f4   : > { %4595 = vmatpush3.bf16.xpose.msra.mxu0 %v3759_v20 }
 0x1f5   : > { %4596 = vmatprep.subr.bf16.mxu0 %v6523_v53 }
 0x1fc   : > { %4597 = vmatpush3.bf16.xpose.msra.mxu0 %v3756_v0 }
 0x1fd   : > { %4598 = vmatprep.subr.bf16.mxu0 %v6523_v53 }
 0x204   : > { %4599 = vmatpush3.bf16.xpose.msra.mxu0 %v3753_v52 }
 0x205   : > { %4600 = vmatprep.subr.bf16.mxu0 %v6523_v53 }
 0x20c   : > { %4601 = vmatpush3.bf16.xpose.msra.mxu0 %v3750_v57 }
 0x20e   : > { %v2686_v11 = vpop.f32.mrf.mxu1 }
 0x210   : > { %v4504_v23 = vpop.f32.mrf.mxu1 }
 0x212   : > { %v2689_v9 = vpop.f32.mrf.mxu1 }
 0x213   : > { %v2558_v22 = vpop.f32.mrf.mxu0  ;;  %4603 = vmatmul.mubr.msk.bf16.vlgmr.msra.gmra.mxu0 %vm2211_vm0, %v3721_v28 }
 0x214   : > { %v2565_v37 = vadd.f32 %v2558_v22, %v2382_v26  ;;  %v4505_v38 = vpop.f32.mrf.mxu1 }
 0x215   : > { %v4484_v60 = vpop.f32.mrf.mxu0 }
 0x216   : > { %v2693_v42 = vadd.f32 %v2686_v11, %v2565_v37 }
 0x217   : > { %v2561_v48 = vpop.f32.mrf.mxu0 }
 0x218   : > { %v2566_v3 = vadd.f32 %v2561_v48, %v2385_v46 }
 0x219   : > { %v4485_v53 = vpop.f32.mrf.mxu0  ;;  %v3821_v46 = vpop.permute.xlu0 %3820 }
 0x21a   : > { %v2694_v61 = vadd.f32 %v2689_v9, %v2566_v3  ;;  %v3826_v47 = vpop.permute.xlu1 %3825 }
 0x24e   : > { %v3182_v35 = vpop.f32.mrf.mxu1 }
 0x250   : > { %v4544_v18 = vpop.f32.mrf.mxu1 }
 0x252   : > { %v3185_v15 = vpop.f32.mrf.mxu1 }
 0x253   : > { %v2998_v21 = vpop.f32.mrf.mxu0 }
 0x254   : > { %v3005_v31 = vadd.f32 %v2998_v21, %v2693_v42  ;;  %v4545_v55 = vpop.f32.mrf.mxu1 }
 0x255   : > { %v4524_v8 = vpop.f32.mrf.mxu0 }
 0x256   : > { %v3189_v30 = vadd.f32 %v3182_v35, %v3005_v31 }
 0x257   : > { %v3001_v58 = vpop.f32.mrf.mxu0 }
 0x258   : > { %v3006_v32 = vadd.f32 %v3001_v58, %v2694_v61 }
 0x259   : > { %v4525_v1 = vpop.f32.mrf.mxu0 }
 0x25a   : > { %v3190_v12 = vadd.f32 %v3185_v15, %v3006_v32 }
 0x28e   : > { %v3623_v27 = vpop.f32.mrf.mxu1 }
 0x290   : > { %v4584_v16 = vpop.f32.mrf.mxu1 }
 0x292   : > { %v3626_v49 = vpop.f32.mrf.mxu1 }
 0x293   : > { %v3311_v34 = vpop.f32.mrf.mxu0 }
 0x294   : > { %v3318_v36 = vadd.f32 %v3311_v34, %v3189_v30  ;;  %v4585_v24 = vpop.f32.mrf.mxu1 }
 0x295   : > { %v4564_v44 = vpop.f32.mrf.mxu0 }
 0x296   : > { %v3630_v43 = vadd.f32 %v3623_v27, %v3318_v36 }
 0x297   : > { %v3314_v62 = vpop.f32.mrf.mxu0 }
 0x298   : > { %v3319_v59 = vadd.f32 %v3314_v62, %v3190_v12 }
 0x299   : > { %v4565_v26 = vpop.f32.mrf.mxu0 }
 0x29a   : > { %v3631_v25 = vadd.f32 %v3626_v49, %v3319_v59 }
 0x2d3   : > { %v3807_v19 = vpop.f32.mrf.mxu0 }
 0x2d4   : > { %v3814_v17 = vadd.f32 %v3807_v19, %v3630_v43 }
 0x2d5   : > { %v4604_v56 = vpop.f32.mrf.mxu0 }
 0x2d6   : > { %v3828_v10 = vadd.f32 %v3821_v46, %v3814_v17 }
 0x2d7   : > { %v3810_v39 = vpop.f32.mrf.mxu0 }
 0x2d8   : > { %v4343_v6 = vpack.c.bf16 %v3828_v10, %v3828_v10  ;;  %v3815_v50 = vadd.f32 %v3810_v39, %v3631_v25 }
 0x2d9   : > { %v4605_v2 = vpop.f32.mrf.mxu0 }
 0x2da   : > { %3838 = vst [vmem:[%s728_s30] sm:$0xf] %v4343_v6  ;;  %v3829_v45 = vadd.f32 %v3826_v47, %v3815_v50  ;;  %3846 = sbr.rel (!%p4878_p5) target bundleno = 743 (0x2e7), region = 68 }
 0x2dc   : > { %v4344_v63 = vpack.c.bf16 %v3829_v45, %v3829_v45 }
 0x2de   : > { %3839 = vst [vmem:[%s728_s30 + $0x4] sm:$0x3] %v4344_v63 }
 0x2e1   : > { %v3867_v14 = vld [vmem:[%s728_s30] sm:$0xf] }
 0x2e2   : > { %3868 = vst [vmem:[%s3850_s1] sm:$0xf] %v3867_v14 }
 0x2e5   : > { %v3869_v54 = vld [vmem:[%s728_s30 + $0x4] sm:$0xf] }
 0x2e6   : > { %3870 = vst [vmem:[%s3850_s1 + $0x8] sm:$0xf] %v3869_v54 }
 0x2e7 PF: > { %s21_s23 = sadd.s32 1, %s4757_s23   ;;  %s6539_s28 = sld [smem:[#allocation8_spill]] }
 0x2e8   : > { %p18_p2 = scmp.ge.s32.totalorder %s21_s23, 6   ;;  %s6540_s19 = sld [smem:[#allocation4_spill]] }
 0x2e9   : > { %s6541_s20 = sld [smem:[#allocation5_spill]]  ;;  %s6544_s17 = smov %s4737_s18 }
 0x2ea   : > { %s6542_s21 = sld [smem:[#allocation6_spill]]  ;;  %20 = sbr.rel (!%p18_p2) target bundleno = 8 (0x8), region = 162 }
 0x2eb   : > { %s6543_s22 = sld [smem:[#allocation7_spill]] }
 0x2ed   : > { %s6545_s18 = smov %s6539_s28 }

</bundles_post_ra>
